<compile_context>
chip_gen: v7x
topology: tpu7x:2x2x1
jax: 0.10.0
libtpu: 0.0.40
codegen_flags: <defaults>
</compile_context>

<pallas_src>
import functools

import numpy as np
import jax
import jax.numpy as jnp
from jax import lax
from jax.experimental import pallas as pl
from jax.experimental.pallas import tpu as pltpu


def _round_up(x, m):
    return (x + m - 1) // m * m


def _pick_block_rows(batch_rows, C, K, in_bytes, row_align):
    # VMEM budget per grid step, conservative enough for v7x (64 MiB physical;
    # leave headroom): double-buffered weak+neighbor input blocks, one f32 copy
    # of the neighbor block, plus ~8 [TB, C]-sized f32 temporaries.
    budget = 40 * 1024 * 1024
    per_row = 2 * (C + K * C) * in_bytes + K * C * 4 + 8 * C * 4
    tb = int(min(512, budget // max(per_row, 1)))
    if tb >= batch_rows:
        return batch_rows                           # whole padded batch in one block
    if tb >= 128:
        return (tb // 128) * 128                    # keeps lane-dense (1,TB) outputs legal
    return max(row_align, (tb // row_align) * row_align)


# ----------------------------- stage 1 kernel -------------------------------
def _stage1_kernel(weak_ref, nb_ref, maxp_ref, qbn_ref, *, lane_dense):
    # softmax(weak) with an exact [TB,1] reciprocal: maxp / qbn feed hard
    # thresholds (ct1) and the tau top-k selection, so no approx reciprocal here.
    w = weak_ref[...].astype(jnp.float32)                         # [TB, C]
    ew = jnp.exp(w - jnp.max(w, axis=1, keepdims=True))
    p = ew * (1.0 / jnp.sum(ew, axis=1, keepdims=True))
    maxv = jnp.max(p, axis=1)                                     # [TB]

    nbf = nb_ref[...].astype(jnp.float32)                         # [TB, K, C]
    K = nbf.shape[1]
    beta = jnp.zeros_like(p)
    # Per-neighbor loop: avoids the [TB,K,C] softmax / diff / diff^2 temporaries
    # of the fully vectorized formulation (only [TB,C]-sized values live per step).
    # TODO(synk): for C >~ 512 map the cross term onto the (idle) MXU via
    # d2 = ||p||^2 - 2 p.nbp^T + ||nbp||^2; at small C the MXU fill dominates.
    for k in range(K):                                            # K is static & small
        nb_k = nbf[:, k, :]                                       # [TB, C]
        e_k = jnp.exp(nb_k - jnp.max(nb_k, axis=1, keepdims=True))
        p_k = e_k * (1.0 / jnp.sum(e_k, axis=1, keepdims=True))
        d = p - p_k
        d2 = jnp.sum(d * d, axis=1, keepdims=True)                # [TB, 1]
        beta = beta + jnp.exp(-d2) * p_k                          # exp(-||p - n_k||^2) * n_k
    beta = beta * (1.0 / jnp.sum(beta, axis=1, keepdims=True))
    db = p - beta
    qv = jnp.sum(db * db, axis=1)                                 # [TB]

    if lane_dense:
        maxp_ref[...] = maxv[None, :]                             # lane-dense [1, TB]
        qbn_ref[...] = qv[None, :]
    else:
        maxp_ref[...] = maxv[:, None]                             # sublane [TB, 1]
        qbn_ref[...] = qv[:, None]


def _stage1(weak_p, nb_p, TB):
    Bp, C = weak_p.shape
    K = nb_p.shape[1]
    nblk = Bp // TB
    lane_dense = (TB % 128 == 0) or (nblk == 1)
    if lane_dense:
        out_shape = (jax.ShapeDtypeStruct((1, Bp), jnp.float32),
                     jax.ShapeDtypeStruct((1, Bp), jnp.float32))
        out_specs = [pl.BlockSpec((1, TB), lambda i: (0, i)),
                     pl.BlockSpec((1, TB), lambda i: (0, i))]
    else:
        out_shape = (jax.ShapeDtypeStruct((Bp, 1), jnp.float32),
                     jax.ShapeDtypeStruct((Bp, 1), jnp.float32))
        out_specs = [pl.BlockSpec((TB, 1), lambda i: (i, 0)),
                     pl.BlockSpec((TB, 1), lambda i: (i, 0))]

    maxp, qbn = pl.pallas_call(
        functools.partial(_stage1_kernel, lane_dense=lane_dense),
        out_shape=out_shape,
        grid_spec=pltpu.PrefetchScalarGridSpec(
            num_scalar_prefetch=0,
            grid=(nblk,),
            in_specs=[
                pl.BlockSpec((TB, C), lambda i: (i, 0)),
                # TODO(synk): if the trace shows exposed DMA on this (largest)
                # stream, add pipeline_mode=pl.Buffered(3) — needs VMEM headroom.
                pl.BlockSpec((TB, K, C), lambda i: (i, 0, 0)),
            ],
            out_specs=out_specs,
        ),
        compiler_params=pltpu.CompilerParams(
            dimension_semantics=("parallel",),
            vmem_limit_bytes=48 * 1024 * 1024),
    )(weak_p, nb_p)
    return maxp.reshape(Bp), qbn.reshape(Bp)


# --------------------- stage 2 (fused q / mask / counts / loss partials) ----
def _stage2_kernel(ct2_ref, weak_ref, strong_ref, alpha_ref, vsum_ref, counts_ref):
    @pl.when(pl.program_id(1) == 0)
    def _():
        vsum_ref[...] = jnp.zeros_like(vsum_ref)
        counts_ref[...] = jnp.zeros_like(counts_ref)

    ct2 = ct2_ref[0]                                              # SMEM scalar

    # softmax(weak) recomputed in-kernel (logits are read from HBM anyway).
    w = weak_ref[...].astype(jnp.float32)                         # [TB, C]
    wz = w - jnp.max(w, axis=1, keepdims=True)                    # <= 0, row max is 0
    ew = jnp.exp(wz)
    p = ew * (1.0 / jnp.sum(ew, axis=1, keepdims=True))

    alpha = alpha_ref[...]                                        # [TB, 1]; -1 => excluded row
    a_cl = jnp.maximum(alpha, 1.0)
    # Sharpened pseudo-label directly from logits:
    #   p^a / sum_j p_j^a == softmax(a * (w - max_w))  (single exp pass, no log,
    #   no underflow for large a since the max exponent is exactly 0).
    es = jnp.exp(a_cl * wz)
    sharp = es * (1.0 / jnp.sum(es, axis=1, keepdims=True))
    q = jnp.where(alpha > 1.0, sharp, p)                          # [TB, C]

    maxq = jnp.max(q, axis=1, keepdims=True)                      # [TB, 1]
    m = ((maxq > ct2) & (alpha >= 0.0)).astype(jnp.float32)       # confidence & mask0

    TB, C = q.shape
    col = lax.broadcasted_iota(jnp.int32, q.shape, 1)
    tgt = jnp.min(jnp.where(q == maxq, col, C), axis=1, keepdims=True)   # argmax
    onehot = (col == tgt).astype(jnp.float32)                     # [TB, C]

    s = strong_ref[...].astype(jnp.float32)                       # log-softmax(strong)
    z = s - jnp.max(s, axis=1, keepdims=True)
    logp = z - jnp.log(jnp.sum(jnp.exp(z), axis=1, keepdims=True))

    # TODO(synk): if bundle dumps show VALU/XLU as the saturating slot, move these
    # reductions onto the MXU via jnp.dot(m.reshape(1, TB), q*logp / onehot).
    mql = (m * q) * logp
    mon = m * onehot
    # Group-of-8 partial sums: tile-wise VPU adds, stored as full unmasked (8, C) blocks.
    vsum_ref[...] += jnp.sum(mql.reshape(TB // 8, 8, C), axis=0)
    counts_ref[...] += jnp.sum(mon.reshape(TB // 8, 8, C), axis=0)


def _stage2(weak_p, strong_p, alpha_enc, ct2, TB, ncores):
    Bp, C = weak_p.shape
    nblk = Bp // TB
    npc = nblk // ncores                                          # row-blocks per core
    ct2_arr = jnp.asarray([ct2], dtype=jnp.float32)

    def row_map(core, i, ct2_r):
        return (core * npc + i, 0)

    vsum, counts = pl.pallas_call(
        _stage2_kernel,
        out_shape=(
            jax.ShapeDtypeStruct((ncores * 8, C), jnp.float32),
            jax.ShapeDtypeStruct((ncores * 8, C), jnp.float32),
        ),
        grid_spec=pltpu.PrefetchScalarGridSpec(
            num_scalar_prefetch=1,                                # ct2 in SMEM
            grid=(ncores, npc),
            in_specs=[
                pl.BlockSpec((TB, C), row_map),
                pl.BlockSpec((TB, C), row_map),
                pl.BlockSpec((TB, 1), row_map),
            ],
            out_specs=[
                pl.BlockSpec((8, C), lambda core, i, ct2_r: (core, 0)),
                pl.BlockSpec((8, C), lambda core, i, ct2_r: (core, 0)),
            ],
        ),
        compiler_params=pltpu.CompilerParams(
            dimension_semantics=("parallel", "arbitrary"),        # core-split x accumulate
            vmem_limit_bytes=48 * 1024 * 1024),
    )(ct2_arr, weak_p, strong_p, alpha_enc)
    return vsum, counts


# ------------------------------- full forward --------------------------------
def confidence_based_ce(anchors_weak, anchors_strong, neighbors,
                        eta, ct1, ct2, apply_class_balancing=True,
                        input_dtype=None, block_rows=None):
    B, C = anchors_weak.shape
    K = neighbors.shape[1]

    # Optional reduced-precision input path (bf16): halves HBM/VMEM traffic of the
    # dominant neighbors stream; all in-kernel math remains f32.
    if input_dtype is not None and anchors_weak.dtype != input_dtype:
        anchors_weak = anchors_weak.astype(input_dtype)
        anchors_strong = anchors_strong.astype(input_dtype)
        neighbors = neighbors.astype(input_dtype)
    in_bytes = jnp.dtype(anchors_weak.dtype).itemsize
    row_align = max(8, 32 // in_bytes)                            # 8 (f32) / 16 (bf16)

    B_al = _round_up(B, row_align)
    if block_rows is not None:
        TB = min(_round_up(block_rows, row_align), B_al)
    else:
        TB = _pick_block_rows(B_al, C, K, in_bytes, row_align)
    ncores = 2 if B_al >= 2 * TB else 1                           # stage-2 megacore split (v7x)
    Bp = _round_up(B, ncores * TB)
    pad = Bp - B
    if pad:
        anchors_weak = jnp.pad(anchors_weak, ((0, pad), (0, 0)))
        anchors_strong = jnp.pad(anchors_strong, ((0, pad), (0, 0)))
        neighbors = jnp.pad(neighbors, ((0, pad), (0, 0), (0, 0)))

    maxp, qbn = _stage1(anchors_weak, neighbors, TB)              # [Bp], [Bp]

    # mask0 / tau / alpha glue (data-dependent topk; dynamic-size select done densely).
    valid = jnp.arange(Bp) < B
    mask0 = (maxp > ct1) & valid
    b = jnp.sum(mask0.astype(jnp.int32))
    topk = jnp.maximum((eta * b.astype(jnp.float32)).astype(jnp.int32), 1)
    qbn_sorted = jnp.sort(jnp.where(mask0, qbn, jnp.inf))
    # TODO(synk): b == 0 (no row passes ct1) yields tau=inf / n=0 -> NaN loss, exactly
    # like the PyTorch reference; guard upstream if this can occur in training.
    tau = jnp.maximum(qbn_sorted[topk - 1] * jnp.exp(jnp.float32(1.0)), 1e-30)
    alpha = -jnp.log(jnp.maximum(qbn, 1e-30) / tau)
    # Encode mask0 into alpha: excluded rows -> -1 sentinel (kernel: q=p, m=0);
    # included rows clamp to [0, 80] (<=1 already means q=p; 80 keeps the sharpened
    # softmax finite and is indistinguishable from a one-hot in float32).
    alpha_enc = jnp.where(mask0, jnp.clip(alpha, 0.0, 80.0), -1.0).astype(jnp.float32)

    vsum_p, counts_p = _stage2(anchors_weak, anchors_strong,
                               alpha_enc.reshape(Bp, 1), ct2, TB, ncores)
    vsum = jnp.sum(vsum_p, axis=0)                                # [C]
    counts = jnp.sum(counts_p, axis=0)                            # [C]
    n = jnp.sum(counts)                                           # rows passing both thresholds

    # class-balanced weights (dense equivalent of torch.unique + scatter)
    freq = counts / n
    weight = jnp.where(counts > 0, 1.0 / jnp.log(1.02 + freq), 1.0)
    # TODO(synk): apply_class_balancing=False path not implemented — the reference
    # PyTorch forward dereferences `weight` unconditionally, so only this path is valid.
    w_avg = weight / jnp.sum(weight) * jnp.mean(weight)           # [C]

    return -jnp.sum(w_avg * vsum) / n


# ------------------------------ numpy reference -------------------------------
def _reference_numpy(aw, as_, nb, eta, ct1, ct2):
    def softmax(x, axis):
        m = x.max(axis=axis, keepdims=True)
        e = np.exp(x - m)
        return e / e.sum(axis=axis, keepdims=True)

    wp = softmax(aw, 1)
    nbp = softmax(nb, 2)
    mask0 = wp.max(1) > ct1
    wp, nbp, as_m = wp[mask0], nbp[mask0], as_[mask0]
    b, c = wp.shape
    d2 = ((wp[:, None, :] - nbp) ** 2).sum(2)
    beta = (np.exp(-d2)[:, :, None] * nbp).sum(1)
    beta = beta / beta.sum(1, keepdims=True)
    qbn = ((wp - beta) ** 2).sum(1)
    topk = max(int(eta * b), 1)
    tau = np.sort(qbn)[topk - 1] * np.exp(1.0)
    alpha = -np.log(qbn / tau)
    sharp = wp ** alpha[:, None]
    sharp = sharp / sharp.sum(1, keepdims=True)
    q = np.where(alpha[:, None] > 1, sharp, wp)
    maxq, tgt = q.max(1), q.argmax(1)
    mask = maxq > ct2
    tgt_m = tgt[mask]
    n = tgt_m.shape[0]
    idx, counts = np.unique(tgt_m, return_counts=True)
    weight = np.ones(c, np.float64)
    weight[idx] = 1.0 / np.log(1.02 + counts.astype(np.float64) / n)
    inp = as_m[mask]
    z = inp - inp.max(1, keepdims=True)
    lp = z - np.log(np.exp(z).sum(1, keepdims=True))
    q_m = q[mask]
    w_avg = weight[None, :] / weight.sum() * weight.mean()
    return -(w_avg * q_m * lp).sum() / n


if __name__ == "__main__":
    eta, ct1, ct2 = 0.5, 0.25, 0.2
    key = jax.random.PRNGKey(0)
    k1, k2, k3, k4, k5, k6 = jax.random.split(key, 6)

    # --- run 1: f32 inputs, default (single-block) tiling; strict parity check ---
    B, K, C = 16, 8, 10
    aw = 2.0 * jax.random.normal(k1, (B, C), dtype=jnp.float32)
    as_ = jax.random.normal(k2, (B, C), dtype=jnp.float32)
    nb = jax.random.normal(k3, (B, K, C), dtype=jnp.float32)
    loss = jax.block_until_ready(confidence_based_ce(aw, as_, nb, eta, ct1, ct2))
    ref = _reference_numpy(np.asarray(aw, np.float64), np.asarray(as_, np.float64),
                           np.asarray(nb, np.float64), eta, ct1, ct2)
    np.testing.assert_allclose(float(loss), float(ref), rtol=5e-3, atol=1e-5)

    # --- run 2: f32, multi-block grid (exercises 2-core stage-2 split + sublane
    #     stage-1 outputs); strict parity check ---
    B2 = 32
    aw2 = 2.0 * jax.random.normal(k4, (B2, C), dtype=jnp.float32)
    as2 = jax.random.normal(k5, (B2, C), dtype=jnp.float32)
    nb2 = jax.random.normal(k6, (B2, K, C), dtype=jnp.float32)
    loss2 = jax.block_until_ready(
        confidence_based_ce(aw2, as2, nb2, eta, ct1, ct2, block_rows=16))
    ref2 = _reference_numpy(np.asarray(aw2, np.float64), np.asarray(as2, np.float64),
                            np.asarray(nb2, np.float64), eta, ct1, ct2)
    np.testing.assert_allclose(float(loss2), float(ref2), rtol=5e-3, atol=1e-5)

    # --- run 3: bf16-input path (halved HBM traffic); sanity check only, since bf16
    #     logits can flip borderline threshold decisions vs the f64 reference ---
    loss3 = jax.block_until_ready(
        confidence_based_ce(aw2, as2, nb2, eta, ct1, ct2,
                            input_dtype=jnp.bfloat16, block_rows=16))
    assert np.isfinite(float(loss3))
    assert abs(float(loss3) - float(ref2)) <= 0.5 * abs(float(ref2)) + 0.5

    print("KERNEL_OK")
</pallas_src>

<mosaic_0001>
module attributes {stable_mosaic.version = 11 : i64} {
  func.func @_stage1_kernel(%arg0: i32, %arg1: memref<16x10xf32, #tpu.memory_space<vmem>>, %arg2: memref<16x8x10xf32, #tpu.memory_space<vmem>>, %arg3: memref<1x16xf32, #tpu.memory_space<vmem>>, %arg4: memref<1x16xf32, #tpu.memory_space<vmem>>) attributes {dimension_semantics = [#tpu.dimension_semantics<parallel>], iteration_bounds = array<i64: 1>, scalar_prefetch = 0 : i64, scratch_operands = 0 : i64, tpu.core_type = #tpu.core_type<tc>, window_params = [{transform_indices = @transform_0, window_bounds = array<i64: 16, 10>}, {transform_indices = @transform_1, window_bounds = array<i64: 16, 8, 10>}, {transform_indices = @transform_2, window_bounds = array<i64: 1, 16>}, {transform_indices = @transform_3, window_bounds = array<i64: 1, 16>}]} {
    %c0 = arith.constant 0 : index
    %c0_0 = arith.constant 0 : index
    %0 = vector.load %arg1[%c0, %c0_0] : memref<16x10xf32, #tpu.memory_space<vmem>>, vector<16x10xf32>
    %cst = arith.constant dense<0xFF800000> : vector<16xf32>
    %1 = vector.multi_reduction <maximumf>, %0, %cst [1] : vector<16x10xf32> to vector<16xf32>
    %2 = vector.shape_cast %1 : vector<16xf32> to vector<16x1xf32>
    %3 = vector.broadcast %2 : vector<16x1xf32> to vector<16x10xf32>
    %4 = arith.subf %0, %3 : vector<16x10xf32>
    %5 = math.exp %4 : vector<16x10xf32>
    %cst_1 = arith.constant dense<0.000000e+00> : vector<16xf32>
    %6 = vector.multi_reduction <add>, %5, %cst_1 [1] : vector<16x10xf32> to vector<16xf32>
    %7 = vector.shape_cast %6 : vector<16xf32> to vector<16x1xf32>
    %cst_2 = arith.constant 1.000000e+00 : f32
    %8 = vector.broadcast %cst_2 : f32 to vector<16x1xf32>
    %9 = arith.divf %8, %7 : vector<16x1xf32>
    %10 = vector.broadcast %9 : vector<16x1xf32> to vector<16x10xf32>
    %11 = arith.mulf %5, %10 : vector<16x10xf32>
    %cst_3 = arith.constant dense<0xFF800000> : vector<16xf32>
    %12 = vector.multi_reduction <maximumf>, %11, %cst_3 [1] : vector<16x10xf32> to vector<16xf32>
    %c0_4 = arith.constant 0 : index
    %c0_5 = arith.constant 0 : index
    %c0_6 = arith.constant 0 : index
    %13 = vector.load %arg2[%c0_4, %c0_5, %c0_6] : memref<16x8x10xf32, #tpu.memory_space<vmem>>, vector<16x8x10xf32>
    %cst_7 = arith.constant 0.000000e+00 : f32
    %14 = vector.broadcast %cst_7 : f32 to vector<16x10xf32>
    %15 = vector.extract_strided_slice %13 {offsets = [0, 0, 0], sizes = [16, 1, 10], strides = [1, 1, 1]} : vector<16x8x10xf32> to vector<16x1x10xf32>
    %16 = vector.shape_cast %15 : vector<16x1x10xf32> to vector<16x10xf32>
    %cst_8 = arith.constant dense<0xFF800000> : vector<16xf32>
    %17 = vector.multi_reduction <maximumf>, %16, %cst_8 [1] : vector<16x10xf32> to vector<16xf32>
    %18 = vector.shape_cast %17 : vector<16xf32> to vector<16x1xf32>
    %19 = vector.broadcast %18 : vector<16x1xf32> to vector<16x10xf32>
    %20 = arith.subf %16, %19 : vector<16x10xf32>
    %21 = math.exp %20 : vector<16x10xf32>
    %cst_9 = arith.constant dense<0.000000e+00> : vector<16xf32>
    %22 = vector.multi_reduction <add>, %21, %cst_9 [1] : vector<16x10xf32> to vector<16xf32>
    %23 = vector.shape_cast %22 : vector<16xf32> to vector<16x1xf32>
    %cst_10 = arith.constant 1.000000e+00 : f32
    %24 = vector.broadcast %cst_10 : f32 to vector<16x1xf32>
    %25 = arith.divf %24, %23 : vector<16x1xf32>
    %26 = vector.broadcast %25 : vector<16x1xf32> to vector<16x10xf32>
    %27 = arith.mulf %21, %26 : vector<16x10xf32>
    %28 = arith.subf %11, %27 : vector<16x10xf32>
    %29 = arith.mulf %28, %28 : vector<16x10xf32>
    %cst_11 = arith.constant dense<0.000000e+00> : vector<16xf32>
    %30 = vector.multi_reduction <add>, %29, %cst_11 [1] : vector<16x10xf32> to vector<16xf32>
    %31 = vector.shape_cast %30 : vector<16xf32> to vector<16x1xf32>
    %cst_12 = arith.constant 0.000000e+00 : f32
    %32 = vector.broadcast %cst_12 : f32 to vector<16x1xf32>
    %33 = arith.subf %32, %31 : vector<16x1xf32>
    %34 = math.exp %33 : vector<16x1xf32>
    %35 = vector.broadcast %34 : vector<16x1xf32> to vector<16x10xf32>
    %36 = arith.mulf %35, %27 : vector<16x10xf32>
    %37 = arith.addf %14, %36 : vector<16x10xf32>
    %38 = vector.extract_strided_slice %13 {offsets = [0, 1, 0], sizes = [16, 1, 10], strides = [1, 1, 1]} : vector<16x8x10xf32> to vector<16x1x10xf32>
    %39 = vector.shape_cast %38 : vector<16x1x10xf32> to vector<16x10xf32>
    %cst_13 = arith.constant dense<0xFF800000> : vector<16xf32>
    %40 = vector.multi_reduction <maximumf>, %39, %cst_13 [1] : vector<16x10xf32> to vector<16xf32>
    %41 = vector.shape_cast %40 : vector<16xf32> to vector<16x1xf32>
    %42 = vector.broadcast %41 : vector<16x1xf32> to vector<16x10xf32>
    %43 = arith.subf %39, %42 : vector<16x10xf32>
    %44 = math.exp %43 : vector<16x10xf32>
    %cst_14 = arith.constant dense<0.000000e+00> : vector<16xf32>
    %45 = vector.multi_reduction <add>, %44, %cst_14 [1] : vector<16x10xf32> to vector<16xf32>
    %46 = vector.shape_cast %45 : vector<16xf32> to vector<16x1xf32>
    %cst_15 = arith.constant 1.000000e+00 : f32
    %47 = vector.broadcast %cst_15 : f32 to vector<16x1xf32>
    %48 = arith.divf %47, %46 : vector<16x1xf32>
    %49 = vector.broadcast %48 : vector<16x1xf32> to vector<16x10xf32>
    %50 = arith.mulf %44, %49 : vector<16x10xf32>
    %51 = arith.subf %11, %50 : vector<16x10xf32>
    %52 = arith.mulf %51, %51 : vector<16x10xf32>
    %cst_16 = arith.constant dense<0.000000e+00> : vector<16xf32>
    %53 = vector.multi_reduction <add>, %52, %cst_16 [1] : vector<16x10xf32> to vector<16xf32>
    %54 = vector.shape_cast %53 : vector<16xf32> to vector<16x1xf32>
    %cst_17 = arith.constant 0.000000e+00 : f32
    %55 = vector.broadcast %cst_17 : f32 to vector<16x1xf32>
    %56 = arith.subf %55, %54 : vector<16x1xf32>
    %57 = math.exp %56 : vector<16x1xf32>
    %58 = vector.broadcast %57 : vector<16x1xf32> to vector<16x10xf32>
    %59 = arith.mulf %58, %50 : vector<16x10xf32>
    %60 = arith.addf %37, %59 : vector<16x10xf32>
    %61 = vector.extract_strided_slice %13 {offsets = [0, 2, 0], sizes = [16, 1, 10], strides = [1, 1, 1]} : vector<16x8x10xf32> to vector<16x1x10xf32>
    %62 = vector.shape_cast %61 : vector<16x1x10xf32> to vector<16x10xf32>
    %cst_18 = arith.constant dense<0xFF800000> : vector<16xf32>
    %63 = vector.multi_reduction <maximumf>, %62, %cst_18 [1] : vector<16x10xf32> to vector<16xf32>
    %64 = vector.shape_cast %63 : vector<16xf32> to vector<16x1xf32>
    %65 = vector.broadcast %64 : vector<16x1xf32> to vector<16x10xf32>
    %66 = arith.subf %62, %65 : vector<16x10xf32>
    %67 = math.exp %66 : vector<16x10xf32>
    %cst_19 = arith.constant dense<0.000000e+00> : vector<16xf32>
    %68 = vector.multi_reduction <add>, %67, %cst_19 [1] : vector<16x10xf32> to vector<16xf32>
    %69 = vector.shape_cast %68 : vector<16xf32> to vector<16x1xf32>
    %cst_20 = arith.constant 1.000000e+00 : f32
    %70 = vector.broadcast %cst_20 : f32 to vector<16x1xf32>
    %71 = arith.divf %70, %69 : vector<16x1xf32>
    %72 = vector.broadcast %71 : vector<16x1xf32> to vector<16x10xf32>
    %73 = arith.mulf %67, %72 : vector<16x10xf32>
    %74 = arith.subf %11, %73 : vector<16x10xf32>
    %75 = arith.mulf %74, %74 : vector<16x10xf32>
    %cst_21 = arith.constant dense<0.000000e+00> : vector<16xf32>
    %76 = vector.multi_reduction <add>, %75, %cst_21 [1] : vector<16x10xf32> to vector<16xf32>
    %77 = vector.shape_cast %76 : vector<16xf32> to vector<16x1xf32>
    %cst_22 = arith.constant 0.000000e+00 : f32
    %78 = vector.broadcast %cst_22 : f32 to vector<16x1xf32>
    %79 = arith.subf %78, %77 : vector<16x1xf32>
    %80 = math.exp %79 : vector<16x1xf32>
    %81 = vector.broadcast %80 : vector<16x1xf32> to vector<16x10xf32>
    %82 = arith.mulf %81, %73 : vector<16x10xf32>
    %83 = arith.addf %60, %82 : vector<16x10xf32>
    %84 = vector.extract_strided_slice %13 {offsets = [0, 3, 0], sizes = [16, 1, 10], strides = [1, 1, 1]} : vector<16x8x10xf32> to vector<16x1x10xf32>
    %85 = vector.shape_cast %84 : vector<16x1x10xf32> to vector<16x10xf32>
    %cst_23 = arith.constant dense<0xFF800000> : vector<16xf32>
    %86 = vector.multi_reduction <maximumf>, %85, %cst_23 [1] : vector<16x10xf32> to vector<16xf32>
    %87 = vector.shape_cast %86 : vector<16xf32> to vector<16x1xf32>
    %88 = vector.broadcast %87 : vector<16x1xf32> to vector<16x10xf32>
    %89 = arith.subf %85, %88 : vector<16x10xf32>
    %90 = math.exp %89 : vector<16x10xf32>
    %cst_24 = arith.constant dense<0.000000e+00> : vector<16xf32>
    %91 = vector.multi_reduction <add>, %90, %cst_24 [1] : vector<16x10xf32> to vector<16xf32>
    %92 = vector.shape_cast %91 : vector<16xf32> to vector<16x1xf32>
    %cst_25 = arith.constant 1.000000e+00 : f32
    %93 = vector.broadcast %cst_25 : f32 to vector<16x1xf32>
    %94 = arith.divf %93, %92 : vector<16x1xf32>
    %95 = vector.broadcast %94 : vector<16x1xf32> to vector<16x10xf32>
    %96 = arith.mulf %90, %95 : vector<16x10xf32>
    %97 = arith.subf %11, %96 : vector<16x10xf32>
    %98 = arith.mulf %97, %97 : vector<16x10xf32>
    %cst_26 = arith.constant dense<0.000000e+00> : vector<16xf32>
    %99 = vector.multi_reduction <add>, %98, %cst_26 [1] : vector<16x10xf32> to vector<16xf32>
    %100 = vector.shape_cast %99 : vector<16xf32> to vector<16x1xf32>
    %cst_27 = arith.constant 0.000000e+00 : f32
    %101 = vector.broadcast %cst_27 : f32 to vector<16x1xf32>
    %102 = arith.subf %101, %100 : vector<16x1xf32>
    %103 = math.exp %102 : vector<16x1xf32>
    %104 = vector.broadcast %103 : vector<16x1xf32> to vector<16x10xf32>
    %105 = arith.mulf %104, %96 : vector<16x10xf32>
    %106 = arith.addf %83, %105 : vector<16x10xf32>
    %107 = vector.extract_strided_slice %13 {offsets = [0, 4, 0], sizes = [16, 1, 10], strides = [1, 1, 1]} : vector<16x8x10xf32> to vector<16x1x10xf32>
    %108 = vector.shape_cast %107 : vector<16x1x10xf32> to vector<16x10xf32>
    %cst_28 = arith.constant dense<0xFF800000> : vector<16xf32>
    %109 = vector.multi_reduction <maximumf>, %108, %cst_28 [1] : vector<16x10xf32> to vector<16xf32>
    %110 = vector.shape_cast %109 : vector<16xf32> to vector<16x1xf32>
    %111 = vector.broadcast %110 : vector<16x1xf32> to vector<16x10xf32>
    %112 = arith.subf %108, %111 : vector<16x10xf32>
    %113 = math.exp %112 : vector<16x10xf32>
    %cst_29 = arith.constant dense<0.000000e+00> : vector<16xf32>
    %114 = vector.multi_reduction <add>, %113, %cst_29 [1] : vector<16x10xf32> to vector<16xf32>
    %115 = vector.shape_cast %114 : vector<16xf32> to vector<16x1xf32>
    %cst_30 = arith.constant 1.000000e+00 : f32
    %116 = vector.broadcast %cst_30 : f32 to vector<16x1xf32>
    %117 = arith.divf %116, %115 : vector<16x1xf32>
    %118 = vector.broadcast %117 : vector<16x1xf32> to vector<16x10xf32>
    %119 = arith.mulf %113, %118 : vector<16x10xf32>
    %120 = arith.subf %11, %119 : vector<16x10xf32>
    %121 = arith.mulf %120, %120 : vector<16x10xf32>
    %cst_31 = arith.constant dense<0.000000e+00> : vector<16xf32>
    %122 = vector.multi_reduction <add>, %121, %cst_31 [1] : vector<16x10xf32> to vector<16xf32>
    %123 = vector.shape_cast %122 : vector<16xf32> to vector<16x1xf32>
    %cst_32 = arith.constant 0.000000e+00 : f32
    %124 = vector.broadcast %cst_32 : f32 to vector<16x1xf32>
    %125 = arith.subf %124, %123 : vector<16x1xf32>
    %126 = math.exp %125 : vector<16x1xf32>
    %127 = vector.broadcast %126 : vector<16x1xf32> to vector<16x10xf32>
    %128 = arith.mulf %127, %119 : vector<16x10xf32>
    %129 = arith.addf %106, %128 : vector<16x10xf32>
    %130 = vector.extract_strided_slice %13 {offsets = [0, 5, 0], sizes = [16, 1, 10], strides = [1, 1, 1]} : vector<16x8x10xf32> to vector<16x1x10xf32>
    %131 = vector.shape_cast %130 : vector<16x1x10xf32> to vector<16x10xf32>
    %cst_33 = arith.constant dense<0xFF800000> : vector<16xf32>
    %132 = vector.multi_reduction <maximumf>, %131, %cst_33 [1] : vector<16x10xf32> to vector<16xf32>
    %133 = vector.shape_cast %132 : vector<16xf32> to vector<16x1xf32>
    %134 = vector.broadcast %133 : vector<16x1xf32> to vector<16x10xf32>
    %135 = arith.subf %131, %134 : vector<16x10xf32>
    %136 = math.exp %135 : vector<16x10xf32>
    %cst_34 = arith.constant dense<0.000000e+00> : vector<16xf32>
    %137 = vector.multi_reduction <add>, %136, %cst_34 [1] : vector<16x10xf32> to vector<16xf32>
    %138 = vector.shape_cast %137 : vector<16xf32> to vector<16x1xf32>
    %cst_35 = arith.constant 1.000000e+00 : f32
    %139 = vector.broadcast %cst_35 : f32 to vector<16x1xf32>
    %140 = arith.divf %139, %138 : vector<16x1xf32>
    %141 = vector.broadcast %140 : vector<16x1xf32> to vector<16x10xf32>
    %142 = arith.mulf %136, %141 : vector<16x10xf32>
    %143 = arith.subf %11, %142 : vector<16x10xf32>
    %144 = arith.mulf %143, %143 : vector<16x10xf32>
    %cst_36 = arith.constant dense<0.000000e+00> : vector<16xf32>
    %145 = vector.multi_reduction <add>, %144, %cst_36 [1] : vector<16x10xf32> to vector<16xf32>
    %146 = vector.shape_cast %145 : vector<16xf32> to vector<16x1xf32>
    %cst_37 = arith.constant 0.000000e+00 : f32
    %147 = vector.broadcast %cst_37 : f32 to vector<16x1xf32>
    %148 = arith.subf %147, %146 : vector<16x1xf32>
    %149 = math.exp %148 : vector<16x1xf32>
    %150 = vector.broadcast %149 : vector<16x1xf32> to vector<16x10xf32>
    %151 = arith.mulf %150, %142 : vector<16x10xf32>
    %152 = arith.addf %129, %151 : vector<16x10xf32>
    %153 = vector.extract_strided_slice %13 {offsets = [0, 6, 0], sizes = [16, 1, 10], strides = [1, 1, 1]} : vector<16x8x10xf32> to vector<16x1x10xf32>
    %154 = vector.shape_cast %153 : vector<16x1x10xf32> to vector<16x10xf32>
    %cst_38 = arith.constant dense<0xFF800000> : vector<16xf32>
    %155 = vector.multi_reduction <maximumf>, %154, %cst_38 [1] : vector<16x10xf32> to vector<16xf32>
    %156 = vector.shape_cast %155 : vector<16xf32> to vector<16x1xf32>
    %157 = vector.broadcast %156 : vector<16x1xf32> to vector<16x10xf32>
    %158 = arith.subf %154, %157 : vector<16x10xf32>
    %159 = math.exp %158 : vector<16x10xf32>
    %cst_39 = arith.constant dense<0.000000e+00> : vector<16xf32>
    %160 = vector.multi_reduction <add>, %159, %cst_39 [1] : vector<16x10xf32> to vector<16xf32>
    %161 = vector.shape_cast %160 : vector<16xf32> to vector<16x1xf32>
    %cst_40 = arith.constant 1.000000e+00 : f32
    %162 = vector.broadcast %cst_40 : f32 to vector<16x1xf32>
    %163 = arith.divf %162, %161 : vector<16x1xf32>
    %164 = vector.broadcast %163 : vector<16x1xf32> to vector<16x10xf32>
    %165 = arith.mulf %159, %164 : vector<16x10xf32>
    %166 = arith.subf %11, %165 : vector<16x10xf32>
    %167 = arith.mulf %166, %166 : vector<16x10xf32>
    %cst_41 = arith.constant dense<0.000000e+00> : vector<16xf32>
    %168 = vector.multi_reduction <add>, %167, %cst_41 [1] : vector<16x10xf32> to vector<16xf32>
    %169 = vector.shape_cast %168 : vector<16xf32> to vector<16x1xf32>
    %cst_42 = arith.constant 0.000000e+00 : f32
    %170 = vector.broadcast %cst_42 : f32 to vector<16x1xf32>
    %171 = arith.subf %170, %169 : vector<16x1xf32>
    %172 = math.exp %171 : vector<16x1xf32>
    %173 = vector.broadcast %172 : vector<16x1xf32> to vector<16x10xf32>
    %174 = arith.mulf %173, %165 : vector<16x10xf32>
    %175 = arith.addf %152, %174 : vector<16x10xf32>
    %176 = vector.extract_strided_slice %13 {offsets = [0, 7, 0], sizes = [16, 1, 10], strides = [1, 1, 1]} : vector<16x8x10xf32> to vector<16x1x10xf32>
    %177 = vector.shape_cast %176 : vector<16x1x10xf32> to vector<16x10xf32>
    %cst_43 = arith.constant dense<0xFF800000> : vector<16xf32>
    %178 = vector.multi_reduction <maximumf>, %177, %cst_43 [1] : vector<16x10xf32> to vector<16xf32>
    %179 = vector.shape_cast %178 : vector<16xf32> to vector<16x1xf32>
    %180 = vector.broadcast %179 : vector<16x1xf32> to vector<16x10xf32>
    %181 = arith.subf %177, %180 : vector<16x10xf32>
    %182 = math.exp %181 : vector<16x10xf32>
    %cst_44 = arith.constant dense<0.000000e+00> : vector<16xf32>
    %183 = vector.multi_reduction <add>, %182, %cst_44 [1] : vector<16x10xf32> to vector<16xf32>
    %184 = vector.shape_cast %183 : vector<16xf32> to vector<16x1xf32>
    %cst_45 = arith.constant 1.000000e+00 : f32
    %185 = vector.broadcast %cst_45 : f32 to vector<16x1xf32>
    %186 = arith.divf %185, %184 : vector<16x1xf32>
    %187 = vector.broadcast %186 : vector<16x1xf32> to vector<16x10xf32>
    %188 = arith.mulf %182, %187 : vector<16x10xf32>
    %189 = arith.subf %11, %188 : vector<16x10xf32>
    %190 = arith.mulf %189, %189 : vector<16x10xf32>
    %cst_46 = arith.constant dense<0.000000e+00> : vector<16xf32>
    %191 = vector.multi_reduction <add>, %190, %cst_46 [1] : vector<16x10xf32> to vector<16xf32>
    %192 = vector.shape_cast %191 : vector<16xf32> to vector<16x1xf32>
    %cst_47 = arith.constant 0.000000e+00 : f32
    %193 = vector.broadcast %cst_47 : f32 to vector<16x1xf32>
    %194 = arith.subf %193, %192 : vector<16x1xf32>
    %195 = math.exp %194 : vector<16x1xf32>
    %196 = vector.broadcast %195 : vector<16x1xf32> to vector<16x10xf32>
    %197 = arith.mulf %196, %188 : vector<16x10xf32>
    %198 = arith.addf %175, %197 : vector<16x10xf32>
    %cst_48 = arith.constant dense<0.000000e+00> : vector<16xf32>
    %199 = vector.multi_reduction <add>, %198, %cst_48 [1] : vector<16x10xf32> to vector<16xf32>
    %200 = vector.shape_cast %199 : vector<16xf32> to vector<16x1xf32>
    %cst_49 = arith.constant 1.000000e+00 : f32
    %201 = vector.broadcast %cst_49 : f32 to vector<16x1xf32>
    %202 = arith.divf %201, %200 : vector<16x1xf32>
    %203 = vector.broadcast %202 : vector<16x1xf32> to vector<16x10xf32>
    %204 = arith.mulf %198, %203 : vector<16x10xf32>
    %205 = arith.subf %11, %204 : vector<16x10xf32>
    %206 = arith.mulf %205, %205 : vector<16x10xf32>
    %cst_50 = arith.constant dense<0.000000e+00> : vector<16xf32>
    %207 = vector.multi_reduction <add>, %206, %cst_50 [1] : vector<16x10xf32> to vector<16xf32>
    %208 = vector.shape_cast %12 : vector<16xf32> to vector<1x16xf32>
    %c0_51 = arith.constant 0 : index
    %c0_52 = arith.constant 0 : index
    %209 = vector.load %arg3[%c0_51, %c0_52] : memref<1x16xf32, #tpu.memory_space<vmem>>, vector<1x16xf32>
    tpu.vector_store %arg3[%c0_51, %c0_52], %208 {strides = array<i32>} : memref<1x16xf32, #tpu.memory_space<vmem>>, vector<1x16xf32>,
    %210 = vector.shape_cast %207 : vector<16xf32> to vector<1x16xf32>
    %c0_53 = arith.constant 0 : index
    %c0_54 = arith.constant 0 : index
    %211 = vector.load %arg4[%c0_53, %c0_54] : memref<1x16xf32, #tpu.memory_space<vmem>>, vector<1x16xf32>
    tpu.vector_store %arg4[%c0_53, %c0_54], %210 {strides = array<i32>} : memref<1x16xf32, #tpu.memory_space<vmem>>, vector<1x16xf32>,
    return
  }
  func.func @transform_0(%arg0: i32) -> (i32, i32) {
    %c0_i32 = arith.constant 0 : i32
    %c0_i32_0 = arith.constant 0 : i32
    return %arg0, %c0_i32 : i32, i32
  }
  func.func @transform_1(%arg0: i32) -> (i32, i32, i32) {
    %c0_i32 = arith.constant 0 : i32
    %c0_i32_0 = arith.constant 0 : i32
    %c0_i32_1 = arith.constant 0 : i32
    return %arg0, %c0_i32, %c0_i32_0 : i32, i32, i32
  }
  func.func @transform_2(%arg0: i32) -> (i32, i32) {
    %c0_i32 = arith.constant 0 : i32
    %c0_i32_0 = arith.constant 0 : i32
    return %c0_i32, %arg0 : i32, i32
  }
  func.func @transform_3(%arg0: i32) -> (i32, i32) {
    %c0_i32 = arith.constant 0 : i32
    %c0_i32_0 = arith.constant 0 : i32
    return %c0_i32, %arg0 : i32, i32
  }
}

</mosaic_0001>

<bundles_post_ra>
// kernel: tpu_custom_call.1
= control target key start
LH: loop header
LB: loop body
LE: loop exit
PB: predicated region body
PF: predicated region fallthrough
CT: control target
= control target key end

     0   :  { %9 = vsyncpa [#allocation3], 0  ;;  %vm87_vm0 = vcmask 1043459   ;;  %vm90_vm1 = vcmask 1044484   ;;  %vm93_vm2 = vcmask 1045509   ;;  %vm96_vm3 = vcmask 1046534   ;;  %s4734_s0 = inlined_call_operand.vmem [shape: f32[16,10], index: 0, kind: input, shape index: {}]   ;;  %s4735_s1 = inlined_call_operand.vmem [shape: f32[16,8,10], index: 1, kind: input, shape index: {}]   ;;  %s4736_s2 = inlined_call_operand.hbm [shape: f32[1,16], index: 2, kind: output, shape index: {0}]   ;;  %s4737_s3 = inlined_call_operand.hbm [shape: f32[1,16], index: 3, kind: output, shape index: {1}]  }
   0x1   :  { %v2881_v0 = vld [vmem:[%s4735_s1] sm:$0xff]  ;;  %v2886_v1 = vld [vmem:[%s4735_s1 + $0x8] sm:$0xff]  ;;  %v2891_v2 = vld [vmem:[%s4735_s1 + $0x10] sm:$0xff]  ;;  %vm99_vm4 = vcmask 1047559   ;;  %vm4739_vm5 = vcmask 80898   ;;  %vm17_vm6 = vcmask 80896  }
   0x2   :  { %v2896_v3 = vld [vmem:[%s4735_s1 + $0x18] sm:$0xff]  ;;  %v2901_v4 = vld [vmem:[%s4735_s1 + $0x20] sm:$0xff]  ;;  %v2906_v5 = vld [vmem:[%s4735_s1 + $0x28] sm:$0xff]  ;;  %v2909_v6 = vrot.slane %v2886_v1, 7  ;;  %v2912_v7 = vrot.slane %v2891_v2, 6  ;;  %vm81_vm7 = vcmask 1041409  }
   0x3   :  { %v2915_v8 = vrot.slane %v2896_v3, 5  ;;  %v2918_v9 = vrot.slane %v2901_v4, 4  ;;  %v2921_v10 = vrot.slane %v2906_v5, 3  ;;  %v2926_v11 = vld [vmem:[%s4735_s1 + $0x30] sm:$0xff]  ;;  %v2931_v12 = vld [vmem:[%s4735_s1 + $0x38] sm:$0xff]  ;;  %vm84_vm8 = vcmask 1042434  }
   0x4   :  { %v657_v13 = vsel %vm87_vm0, %v2909_v6, %v2881_v0  ;;  %v82_v15 = vsel %vm81_vm7, %v2909_v6, %v2881_v0  ;;  %v2942_v16 = vrot.slane %v2926_v11, 2  ;;  %v2947_v17 = vld [vmem:[%s4735_s1 + $0x48] sm:$0xff]  ;;  %v2954_v20 = vrot.slane %v2931_v12, 1  ;;  %v2962_v22 = vld [vmem:[%s4735_s1 + $0x50] sm:$0xff]  ;;  %v2973_v26 = vld [vmem:[%s4735_s1 + $0x40] sm:$0xff] }
   0x5   :  { %v658_v14 = vsel %vm90_vm1, %v2912_v7, %v657_v13  ;;  %v85_v19 = vsel %vm84_vm8, %v2912_v7, %v82_v15  ;;  %v373_v21 = vsel %vm84_vm8, %v2909_v6, %v2881_v0  ;;  %vm4738_vm9 = vcmask 80897   ;;  %v2978_v27 = vld [vmem:[%s4735_s1 + $0x58] sm:$0xff] }
   0x6   :  { %v659_v18 = vsel %vm93_vm2, %v2915_v8, %v658_v14  ;;  %v88_v24 = vsel %vm87_vm0, %v2915_v8, %v85_v19  ;;  %v374_v25 = vsel %vm87_vm0, %v2912_v7, %v373_v21 }
   0x7   :  { %v660_v23 = vsel %vm96_vm3, %v2918_v9, %v659_v18 }
   0x8   :  { %10 = vsyncpa [#allocation5], 0  ;;  %v661_v28 = vsel %vm99_vm4, %v2921_v10, %v660_v23  ;;  %v91_v29 = vsel %vm90_vm1, %v2918_v9, %v88_v24  ;;  %v375_v30 = vsel %vm90_vm1, %v2915_v8, %v374_v25  ;;  %v2989_v31 = vld [vmem:[%s4735_s1 + $0x60] sm:$0xff]  ;;  %v2992_v32 = vrot.slane %v2947_v17, 7  ;;  %v3002_v36 = vld [vmem:[%s4735_s1 + $0x68] sm:$0xff] }
   0x9   :  { %v674_v33 = vsel %vm4739_vm5, %v661_v28, -inf  ;;  %v94_v34 = vsel %vm93_vm2, %v2921_v10, %v91_v29  ;;  %v376_v35 = vsel %vm93_vm2, %v2918_v9, %v375_v30  ;;  %v3005_v37 = vrot.slane %v2962_v22, 6  ;;  %v62_v40 = vld [vmem:[%s4735_s1 + $0x70] sm:$0xff]  ;;  %v3017_v41 = vld [vmem:[%s4735_s1 + $0x78] sm:$0xff] }
   0xa   :  { %675 = vmax.xlane.f32.xlu1 %v674_v33  ;;  %v97_v38 = vsel %vm96_vm3, %v2942_v16, %v94_v34  ;;  %v377_v39 = vsel %vm96_vm3, %v2921_v10, %v376_v35  ;;  %v102_v42 = vsel %vm81_vm7, %v2992_v32, %v2973_v26  ;;  %v3023_v43 = vrot.slane %v2978_v27, 5 }
   0xb   :  { %v100_v44 = vsel %vm99_vm4, %v2954_v20, %v97_v38  ;;  %v378_v45 = vsel %vm99_vm4, %v2942_v16, %v377_v39  ;;  %v104_v46 = vsel %vm84_vm8, %v3005_v37, %v102_v42  ;;  %v3032_v47 = vrot.slane %v2989_v31, 4 }
   0xc   :  { %v117_v48 = vsel %vm17_vm6, %v100_v44, -inf  ;;  %v390_v49 = vsel %vm4738_vm9, %v378_v45, -inf  ;;  %v106_v50 = vsel %vm87_vm0, %v3023_v43, %v104_v46  ;;  %v3039_v51 = vrot.slane %v3002_v36, 3 }
   0xd   :  { %118 = vmax.xlane.f32.xlu0 %v117_v48  ;;  %v108_v52 = vsel %vm90_vm1, %v3032_v47, %v106_v50  ;;  %v3043_v53 = vrot.slane %v62_v40, 2  ;;  %v3046_v54 = vrot.slane %v3017_v41, 1  ;;  %v379_v55 = vsel %vm81_vm7, %v2973_v26, %v2954_v20 }
   0xe   :  { %391 = vmax.xlane.f32.xlu1 %v390_v49  ;;  %v110_v56 = vsel %vm93_vm2, %v3039_v51, %v108_v52  ;;  %v380_v57 = vsel %vm84_vm8, %v2992_v32, %v379_v55  ;;  %v662_v58 = vsel %vm81_vm7, %v2954_v20, %v2942_v16  ;;  %v1228_v59 = vsel %vm81_vm7, %v2921_v10, %v2918_v9 }
   0xf   :  { %v112_v60 = vsel %vm96_vm3, %v3043_v53, %v110_v56  ;;  %v381_v61 = vsel %vm87_vm0, %v3005_v37, %v380_v57  ;;  %v663_v62 = vsel %vm84_vm8, %v2973_v26, %v662_v58  ;;  %v1229_v63 = vsel %vm84_vm8, %v2942_v16, %v1228_v59 }
  0x10   :  { %v114_v13 = vsel %vm99_vm4, %v3046_v54, %v112_v60  ;;  %v382_v14 = vsel %vm90_vm1, %v3023_v43, %v381_v61  ;;  %v664_v15 = vsel %vm87_vm0, %v2992_v32, %v663_v62  ;;  %v1230_v18 = vsel %vm87_vm0, %v2954_v20, %v1229_v63 }
  0x11   :  { %v120_v19 = vsel %vm17_vm6, %v114_v13, -inf  ;;  %v383_v21 = vsel %vm93_vm2, %v3032_v47, %v382_v14  ;;  %v665_v23 = vsel %vm90_vm1, %v3005_v37, %v664_v15  ;;  %v1231_v24 = vsel %vm90_vm1, %v2973_v26, %v1230_v18 }
  0x12   :  { %121 = vmax.xlane.f32.xlu0 %v120_v19  ;;  %v384_v25 = vsel %vm96_vm3, %v3039_v51, %v383_v21  ;;  %v666_v28 = vsel %vm93_vm2, %v3023_v43, %v665_v23  ;;  %v1232_v29 = vsel %vm93_vm2, %v2992_v32, %v1231_v24  ;;  %v945_v30 = vsel %vm81_vm7, %v2942_v16, %v2921_v10 }
  0x13   :  { %v385_v33 = vsel %vm99_vm4, %v3043_v53, %v384_v25  ;;  %v667_v34 = vsel %vm96_vm3, %v3032_v47, %v666_v28  ;;  %v1233_v35 = vsel %vm96_vm3, %v3005_v37, %v1232_v29  ;;  %v946_v38 = vsel %vm84_vm8, %v2954_v20, %v945_v30 }
  0x14   :  { %v393_v39 = vsel %vm17_vm6, %v385_v33, -inf  ;;  %v668_v40 = vsel %vm99_vm4, %v3039_v51, %v667_v34  ;;  %v1234_v42 = vsel %vm99_vm4, %v3023_v43, %v1233_v35  ;;  %v947_v44 = vsel %vm87_vm0, %v2973_v26, %v946_v38 }
  0x15   :  { %394 = vmax.xlane.f32.xlu1 %v393_v39  ;;  %v677_v45 = vsel %vm17_vm6, %v668_v40, -inf  ;;  %v1245_v46 = vsel %vm17_vm6, %v1234_v42, -inf  ;;  %v948_v48 = vsel %vm90_vm1, %v2992_v32, %v947_v44  ;;  %v1511_v49 = vsel %vm81_vm7, %v2918_v9, %v2915_v8 }
  0x16   :  { %678 = vmax.xlane.f32.xlu0 %v677_v45  ;;  %v949_v50 = vsel %vm93_vm2, %v3005_v37, %v948_v48  ;;  %v1512_v52 = vsel %vm84_vm8, %v2921_v10, %v1511_v49  ;;  %v941_v55 = vsel %vm90_vm1, %v2909_v6, %v2881_v0  ;;  %vm957_vm10 = vcmask 80899  }
  0x17   :  { %v950_v56 = vsel %vm96_vm3, %v3023_v43, %v949_v50  ;;  %v1513_v57 = vsel %vm87_vm0, %v2942_v16, %v1512_v52  ;;  %v942_v58 = vsel %vm93_vm2, %v2912_v7, %v941_v55  ;;  %v1794_v59 = vsel %vm81_vm7, %v2915_v8, %v2912_v7 }
  0x18   :  { %v951_v60 = vsel %vm99_vm4, %v3032_v47, %v950_v56  ;;  %v1514_v61 = vsel %vm90_vm1, %v2954_v20, %v1513_v57  ;;  %v943_v62 = vsel %vm96_vm3, %v2915_v8, %v942_v58  ;;  %v1795_v63 = vsel %vm84_vm8, %v2918_v9, %v1794_v59 }
  0x19   :  { %1246 = vmax.xlane.f32.xlu1 %v1245_v46  ;;  %v961_v13 = vsel %vm17_vm6, %v951_v60, -inf  ;;  %v1515_v14 = vsel %vm93_vm2, %v2973_v26, %v1514_v61  ;;  %v944_v15 = vsel %vm99_vm4, %v2918_v9, %v943_v62  ;;  %v1796_v18 = vsel %vm87_vm0, %v2921_v10, %v1795_v63 }
  0x1a   :  { %962 = vmax.xlane.f32.xlu0 %v961_v13  ;;  %v1516_v19 = vsel %vm96_vm3, %v2992_v32, %v1515_v14  ;;  %v1797_v21 = vsel %vm90_vm1, %v2942_v16, %v1796_v18  ;;  %v1225_v23 = vsel %vm93_vm2, %v2909_v6, %v2881_v0  ;;  %v958_v25 = vsel %vm957_vm10, %v944_v15, -inf }
  0x1b   :  { %v1517_v24 = vsel %vm99_vm4, %v3005_v37, %v1516_v19  ;;  %v1798_v28 = vsel %vm93_vm2, %v2954_v20, %v1797_v21  ;;  %v1226_v29 = vsel %vm96_vm3, %v2912_v7, %v1225_v23  ;;  %vm4740_vm11 = vcmask 80900  }
  0x1c   :  { %v1529_v30 = vsel %vm17_vm6, %v1517_v24, -inf  ;;  %v1799_v33 = vsel %vm96_vm3, %v2973_v26, %v1798_v28  ;;  %v1227_v34 = vsel %vm99_vm4, %v2915_v8, %v1226_v29  ;;  %v2077_v38 = vsel %vm81_vm7, %v2912_v7, %v2909_v6 }
  0x1d   :  { %1530 = vmax.xlane.f32.xlu1 %v1529_v30  ;;  %v1800_v35 = vsel %vm99_vm4, %v2992_v32, %v1799_v33  ;;  %v2078_v40 = vsel %vm84_vm8, %v2915_v8, %v2077_v38  ;;  %v1242_v42 = vsel %vm4740_vm11, %v1227_v34, -inf  ;;  %vm396_vm12 = vcmask 73728   ;;  %v16_v30 = vld [vmem:[%s4734_s0 + $0x8] sm:$0xff]  ;;  %v15_v33 = vld [vmem:[%s4734_s0] sm:$0xff] }
  0x1e   :  { %959 = vmax.xlane.f32.xlu0 %v958_v25  ;;  %v1813_v39 = vsel %vm17_vm6, %v1800_v35, -inf  ;;  %v2079_v44 = vsel %vm87_vm0, %v2918_v9, %v2078_v40  ;;  %v952_v46 = vsel %vm81_vm7, %v3043_v53, %v3039_v51  ;;  %v1518_v48 = vsel %vm81_vm7, %v3032_v47, %v3023_v43 }
  0x1f   :  { %v2080_v45 = vsel %vm90_vm1, %v2921_v10, %v2079_v44  ;;  %v1519_v49 = vsel %vm84_vm8, %v3039_v51, %v1518_v48  ;;  %v397_v9 = vsel %vm396_vm12, %v3046_v54, -inf  ;;  %vm964_vm13 = vcmask 75776  }
  0x20   :  { %v2081_v8 = vsel %vm93_vm2, %v2942_v16, %v2080_v45  ;;  %v953_v52 = vsel %vm84_vm8, %v3046_v54, %v952_v46  ;;  %v669_v16 = vsel %vm81_vm7, %v3046_v54, %v3043_v53  ;;  %v2084_v55 = vsel %vm81_vm7, %v3005_v37, %v2992_v32 }
  0x21   :  { %1814 = vmax.xlane.f32.xlu1 %v1813_v39  ;;  %v2082_v10 = vsel %vm96_vm3, %v2954_v20, %v2081_v8  ;;  %vm680_vm14 = vcmask 74752   ;;  %v1520_v20 = vsel %vm87_vm0, %v3043_v53, %v1519_v49  ;;  %v2085_v57 = vsel %vm84_vm8, %v3023_v43, %v2084_v55 }
  0x22   :  { %1243 = vmax.xlane.f32.xlu0 %v1242_v42  ;;  %v2083_v50 = vsel %vm99_vm4, %v2973_v26, %v2082_v10  ;;  %v1509_v58 = vsel %vm96_vm3, %v2909_v6, %v2881_v0  ;;  %v2086_v59 = vsel %vm87_vm0, %v3032_v47, %v2085_v57  ;;  %v1801_v32 = vsel %vm81_vm7, %v3023_v43, %v3005_v37 }
  0x23   :  { %v2097_v56 = vsel %vm17_vm6, %v2083_v50, -inf  ;;  %v965_v60 = vsel %vm964_vm13, %v953_v52, -inf  ;;  %v2087_v61 = vsel %vm90_vm1, %v3039_v51, %v2086_v59  ;;  %v1802_v62 = vsel %vm84_vm8, %v3032_v47, %v1801_v32 }
  0x24   :  { %v681_v63 = vsel %vm680_vm14, %v669_v16, -inf  ;;  %v1521_v13 = vsel %vm90_vm1, %v3046_v54, %v1520_v20  ;;  %vm4741_vm15 = vcmask 77824   ;;  %v1803_v14 = vsel %vm87_vm0, %v3039_v51, %v1802_v62 }
  0x25   :  { %398 = vmax.xlane.f32.xlu1 %v397_v9  ;;  %v1510_v37 = vsel %vm99_vm4, %v2912_v7, %v1509_v58  ;;  %vm4742_vm9 = vcmask 80901   ;;  %v2088_v43 = vsel %vm93_vm2, %v3043_v53, %v2087_v61  ;;  %v1804_v15 = vsel %vm90_vm1, %v3043_v53, %v1803_v14 }
  0x26   :  { %2098 = vmax.xlane.f32.xlu0 %v2097_v56  ;;  %v1533_v18 = vsel %vm4741_vm15, %v1521_v13, -inf  ;;  %v1235_v19 = vsel %vm81_vm7, %v3039_v51, %v3032_v47  ;;  %v1526_v21 = vsel %vm4742_vm9, %v1510_v37, -inf  ;;  %v2089_v7 = vsel %vm96_vm3, %v3046_v54, %v2088_v43 }
  0x27   :  { %vm4743_vm5 = vcmask 79872   ;;  %v1805_v23 = vsel %vm93_vm2, %v3046_v54, %v1804_v15  ;;  %vm1816_vm11 = vcmask 78848   ;;  %v1236_v24 = vsel %vm84_vm8, %v3043_v53, %v1235_v19 }
  0x28   :  { %v2101_v25 = vsel %vm4743_vm5, %v2089_v7, -inf  ;;  %v1817_v28 = vsel %vm1816_vm11, %v1805_v23, -inf  ;;  %v1793_v47 = vsel %vm99_vm4, %v2909_v6, %v2881_v0  ;;  %vm1809_vm15 = vcmask 80902  }
  0x29   :  { %966 = vmax.xlane.f32.xlu1 %v965_v60  ;;  %v1237_v51 = vsel %vm87_vm0, %v3046_v54, %v1236_v24  ;;  %vm1248_vm9 = vcmask 76800   ;;  %v1810_v29 = vsel %vm1809_vm15, %v1793_v47, -inf  ;;  %v21_v6 = vsel %vm17_vm6, %v16_v30, -inf }
  0x2a   :  { %682 = vmax.xlane.f32.xlu0 %v681_v63  ;;  %v1249_v53 = vsel %vm1248_vm9, %v1237_v51, -inf  ;;  %v18_v54 = vsel %vm17_vm6, %v15_v33, -inf  ;;  %vm2093_vm5 = vcmask 80903  }
  0x2b   :  { %v2094_v34 = vsel %vm2093_vm5, %v2881_v0, -inf }
  0x2d   :  { %1534 = vmax.xlane.f32.xlu1 %v1533_v18 }
  0x2e   :  { %1527 = vmax.xlane.f32.xlu0 %v1526_v21 }
  0x31   :  { %2102 = vmax.xlane.f32.xlu1 %v2101_v25 }
  0x32   :  { %1818 = vmax.xlane.f32.xlu0 %v1817_v28 }
  0x35   :  { %1811 = vmax.xlane.f32.xlu1 %v1810_v29 }
  0x36   :  { %1250 = vmax.xlane.f32.xlu0 %v1249_v53 }
  0x39   :  { %22 = vmax.xlane.f32.xlu1 %v21_v6 }
  0x3a   :  { %19 = vmax.xlane.f32.xlu0 %v18_v54 }
  0x3e   :  { %2095 = vmax.xlane.f32.xlu0 %v2094_v34 }
  0x97   :  { %v676_v35 = vpop.xlane.xlu1 %675 }
  0x98   :  { %v687_v38 = vrot.slane %v676_v35, 1  ;;  %v688_v39 = vrot.slane %v676_v35, 2  ;;  %v689_v40 = vrot.slane %v676_v35, 3  ;;  %v690_v42 = vrot.slane %v676_v35, 4 }
  0x99   :  { %v691_v44 = vrot.slane %v676_v35, 5  ;;  %v717_v45 = vsub.f32 %v2881_v0, %v676_v35 }
  0x9a   :  { %v718_v46 = vsub.f32 %v2886_v1, %v687_v38  ;;  %v719_v48 = vsub.f32 %v2891_v2, %v688_v39  ;;  %v720_v8 = vsub.f32 %v2896_v3, %v689_v40  ;;  %v721_v49 = vsub.f32 %v2901_v4, %v690_v42  ;;  %v3266_v9 = vpop.xlane.xlu0 %118 }
  0x9b   :  { %4880 = vst [vmem:[#allocation8_spill] sm:$0xff] %v3266_v9  ;;  %v722_v10 = vsub.f32 %v2906_v5, %v691_v44  ;;  %v733_v50 = vmul.f32 1.442695, %v717_v45  ;;  %v125_v52 = vrot.slane %v3266_v9, 1  ;;  %v126_v16 = vrot.slane %v3266_v9, 2  ;;  %v392_v18 = vpop.xlane.xlu1 %391 }
  0x9c   :  { %v735_v55 = vmul.f32 1.442695, %v718_v46  ;;  %v737_v56 = vmul.f32 1.442695, %v719_v48  ;;  %v739_v20 = vmul.f32 1.442695, %v720_v8  ;;  %v155_v59 = vsub.f32 %v2881_v0, %v3266_v9 }
  0x9d   :  { %2444 = vpow2.f32 %v733_v50  ;;  %v741_v57 = vmul.f32 1.442695, %v721_v49  ;;  %v127_v58 = vrot.slane %v3266_v9, 3  ;;  %v743_v32 = vmul.f32 1.442695, %v722_v10 }
  0x9e   :  { %2446 = vpow2.f32 %v735_v55  ;;  %v128_v60 = vrot.slane %v3266_v9, 4  ;;  %v156_v61 = vsub.f32 %v2886_v1, %v125_v52  ;;  %v157_v62 = vsub.f32 %v2891_v2, %v126_v16 }
  0x9f   :  { %2448 = vpow2.f32 %v737_v56  ;;  %v129_v63 = vrot.slane %v3266_v9, 5  ;;  %v158_v13 = vsub.f32 %v2896_v3, %v127_v58  ;;  %v171_v43 = vmul.f32 1.442695, %v155_v59  ;;  %v3286_v6 = vpop.xlane.xlu0 %121 }
  0xa0   :  { %2450 = vpow2.f32 %v739_v20  ;;  %v159_v14 = vsub.f32 %v2901_v4, %v128_v60  ;;  %v173_v15 = vmul.f32 1.442695, %v156_v61  ;;  %v175_v21 = vmul.f32 1.442695, %v157_v62 }
  0xa1   :  { %2452 = vpow2.f32 %v741_v57  ;;  %v403_v7 = vrot.slane %v392_v18, 1  ;;  %v177_v23 = vmul.f32 1.442695, %v158_v13  ;;  %v404_v24 = vrot.slane %v392_v18, 2 }
  0xa2   :  { %2454 = vpow2.f32 %v743_v32  ;;  %v405_v25 = vrot.slane %v392_v18, 3  ;;  %v406_v28 = vrot.slane %v392_v18, 4  ;;  %v179_v47 = vmul.f32 1.442695, %v159_v14 }
  0xa3   :  { %2456 = vpow2.f32 %v171_v43  ;;  %v407_v51 = vrot.slane %v392_v18, 5  ;;  %v433_v29 = vsub.f32 %v2881_v0, %v392_v18  ;;  %v434_v53 = vsub.f32 %v2886_v1, %v403_v7  ;;  %v3320_v43 = vpop.xlane.xlu1 %394 }
  0xa4   :  { %2458 = vpow2.f32 %v173_v15  ;;  %v435_v30 = vsub.f32 %v2891_v2, %v404_v24  ;;  %v436_v33 = vsub.f32 %v2896_v3, %v405_v25  ;;  %v408_v54 = vrot.slane %v392_v18, 6  ;;  %4885 = vst [vmem:[#allocation13_spill] sm:$0xff] %v3320_v43 }
  0xa5   :  { %2460 = vpow2.f32 %v175_v21  ;;  %v437_v34 = vsub.f32 %v2901_v4, %v406_v28  ;;  %v438_v35 = vsub.f32 %v2906_v5, %v407_v51  ;;  %v449_v39 = vmul.f32 1.442695, %v433_v29 }
  0xa6   :  { %2462 = vpow2.f32 %v177_v23  ;;  %v451_v40 = vmul.f32 1.442695, %v434_v53  ;;  %v453_v42 = vmul.f32 1.442695, %v435_v30  ;;  %v455_v45 = vmul.f32 1.442695, %v436_v33 }
  0xa7   :  { %v3290_v38 = vpop.eup %2444  ;;  %2464 = vpow2.f32 %v179_v47  ;;  %v457_v46 = vmul.f32 1.442695, %v437_v34  ;;  %v163_v48 = vsub.f32 %v2973_v26, %v3286_v6  ;;  %v132_v49 = vrot.slane %v3286_v6, 1 }
  0xa8   :  { %v3292_v44 = vpop.eup %2446  ;;  %2466 = vpow2.f32 %v449_v39  ;;  %v133_v10 = vrot.slane %v3286_v6, 2  ;;  %v134_v50 = vrot.slane %v3286_v6, 3  ;;  %v3304_v16 = vsub.f32 %v2906_v5, %v129_v63  ;;  %v3343_v39 = vpop.xlane.xlu0 %678 }
  0xa9   :  { %4881 = vst [vmem:[#allocation9_spill] sm:$0xff] %v3292_v44  ;;  %v3296_v8 = vpop.eup %2448  ;;  %2468 = vpow2.f32 %v451_v40  ;;  %v459_v55 = vmul.f32 1.442695, %v438_v35  ;;  %v135_v56 = vrot.slane %v3286_v6, 4  ;;  %v3310_v57 = vsub.f32 %v2926_v11, %v408_v54  ;;  %4890 = vst [vmem:[#allocation18_spill] sm:$0xff] %v3343_v39 }
  0xaa   :  { %4882 = vst [vmem:[#allocation10_spill] sm:$0xff] %v3296_v8  ;;  %v3301_v52 = vpop.eup %2450  ;;  %4884 = vst [vmem:[#allocation12_spill] sm:$0xff] %v3304_v16  ;;  %2470 = vpow2.f32 %v453_v42  ;;  %v164_v58 = vsub.f32 %v2947_v17, %v132_v49  ;;  %v165_v59 = vsub.f32 %v2962_v22, %v133_v10  ;;  %v136_v60 = vrot.slane %v3286_v6, 5 }
  0xab   :  { %4883 = vst [vmem:[#allocation11_spill] sm:$0xff] %v3301_v52  ;;  %v3307_v20 = vpop.eup %2452  ;;  %2472 = vpow2.f32 %v455_v45  ;;  %v166_v61 = vsub.f32 %v2978_v27, %v134_v50  ;;  %v167_v62 = vsub.f32 %v2989_v31, %v135_v56  ;;  %v187_v13 = vmul.f32 1.442695, %v163_v48 }
  0xac   :  { %v3314_v32 = vpop.eup %2454  ;;  %2474 = vpow2.f32 %v457_v46  ;;  %v189_v14 = vmul.f32 1.442695, %v164_v58  ;;  %v191_v18 = vmul.f32 1.442695, %v165_v59  ;;  %v409_v7 = vrot.slane %v3320_v43, 7 }
  0xad   :  { %v3322_v15 = vpop.eup %2456  ;;  %2476 = vpow2.f32 %v459_v55  ;;  %v193_v21 = vmul.f32 1.442695, %v166_v61  ;;  %v410_v24 = vrot.slane %v3320_v43, 1  ;;  %v411_v25 = vrot.slane %v3320_v43, 2 }
  0xae   :  { %4886 = vst [vmem:[#allocation14_spill] sm:$0xff] %v3322_v15  ;;  %v3325_v23 = vpop.eup %2458  ;;  %2478 = vpow2.f32 %v187_v13  ;;  %v412_v28 = vrot.slane %v3320_v43, 3  ;;  %v3334_v29 = vsub.f32 %v3002_v36, %v136_v60  ;;  %v195_v53 = vmul.f32 1.442695, %v167_v62 }
  0xaf   :  { %4887 = vst [vmem:[#allocation15_spill] sm:$0xff] %v3325_v23  ;;  %v3330_v47 = vpop.eup %2460  ;;  %2480 = vpow2.f32 %v189_v14  ;;  %v413_v33 = vrot.slane %v3320_v43, 4  ;;  %v440_v54 = vsub.f32 %v2931_v12, %v409_v7  ;;  %v441_v34 = vsub.f32 %v2973_v26, %v3320_v43 }
  0xb0   :  { %4888 = vst [vmem:[#allocation16_spill] sm:$0xff] %v3330_v47  ;;  %v3336_v30 = vpop.eup %2462  ;;  %v442_v35 = vsub.f32 %v2947_v17, %v410_v24  ;;  %2482 = vpow2.f32 %v191_v18  ;;  %v443_v42 = vsub.f32 %v2962_v22, %v411_v25  ;;  %v444_v45 = vsub.f32 %v2978_v27, %v412_v28 }
  0xb1   :  { %4889 = vst [vmem:[#allocation17_spill] sm:$0xff] %v3336_v30  ;;  %v3345_v40 = vpop.eup %2464  ;;  %2484 = vpow2.f32 %v193_v21  ;;  %v463_v48 = vmul.f32 1.442695, %v440_v54  ;;  %v465_v49 = vmul.f32 1.442695, %v441_v34  ;;  %v692_v56 = vrot.slane %v3343_v39, 6 }
  0xb2   :  { %4891 = vst [vmem:[#allocation19_spill] sm:$0xff] %v3345_v40  ;;  %v3350_v46 = vpop.eup %2466  ;;  %v467_v10 = vmul.f32 1.442695, %v442_v35  ;;  %2486 = vpow2.f32 %v195_v53  ;;  %v469_v55 = vmul.f32 1.442695, %v443_v42  ;;  %v693_v58 = vrot.slane %v3343_v39, 7 }
  0xb3   :  { %4892 = vst [vmem:[#allocation20_spill] sm:$0xff] %v3350_v46  ;;  %v3352_v50 = vpop.eup %2468  ;;  %2488 = vpow2.f32 %v463_v48  ;;  %v471_v60 = vmul.f32 1.442695, %v444_v45  ;;  %v694_v61 = vrot.slane %v3343_v39, 1  ;;  %v695_v62 = vrot.slane %v3343_v39, 2  ;;  %v3379_v48 = vpop.xlane.xlu1 %1246 }
  0xb4   :  { %4893 = vst [vmem:[#allocation21_spill] sm:$0xff] %v3352_v50  ;;  %v3356_v59 = vpop.eup %2470  ;;  %v3364_v18 = vsub.f32 %v2989_v31, %v413_v33  ;;  %2490 = vpow2.f32 %v465_v49  ;;  %v723_v21 = vsub.f32 %v2926_v11, %v692_v56  ;;  %v724_v24 = vsub.f32 %v2931_v12, %v693_v58  ;;  %4900 = vst [vmem:[#allocation28_spill] sm:$0xff] %v3379_v48 }
  0xb5   :  { %4894 = vst [vmem:[#allocation22_spill] sm:$0xff] %v3356_v59  ;;  %v3360_v13 = vpop.eup %2472  ;;  %2492 = vpow2.f32 %v467_v10  ;;  %v725_v25 = vsub.f32 %v2973_v26, %v3343_v39  ;;  %v726_v28 = vsub.f32 %v2947_v17, %v694_v61  ;;  %v696_v54 = vrot.slane %v3343_v39, 3 }
  0xb6   :  { %4895 = vst [vmem:[#allocation23_spill] sm:$0xff] %v3360_v13  ;;  %4896 = vst [vmem:[#allocation24_spill] sm:$0xff] %v3364_v18  ;;  %v3367_v7 = vpop.eup %2474  ;;  %2494 = vpow2.f32 %v469_v55  ;;  %v727_v31 = vsub.f32 %v2962_v22, %v695_v62  ;;  %v745_v33 = vmul.f32 1.442695, %v723_v21  ;;  %v747_v35 = vmul.f32 1.442695, %v724_v24 }
  0xb7   :  { %4897 = vst [vmem:[#allocation25_spill] sm:$0xff] %v3367_v7  ;;  %v3373_v53 = vpop.eup %2476  ;;  %2496 = vpow2.f32 %v471_v60  ;;  %v749_v42 = vmul.f32 1.442695, %v725_v25  ;;  %v751_v45 = vmul.f32 1.442695, %v726_v28  ;;  %v1258_v56 = vrot.slane %v3379_v48, 4  ;;  %v3395_v28 = vpop.xlane.xlu0 %962 }
  0xb8   :  { %4898 = vst [vmem:[#allocation26_spill] sm:$0xff] %v3373_v53  ;;  %v3377_v34 = vpop.eup %2478  ;;  %2498 = vpow2.f32 %v745_v33  ;;  %v753_v10 = vmul.f32 1.442695, %v727_v31  ;;  %v1259_v55 = vrot.slane %v3379_v48, 5  ;;  %v1260_v61 = vrot.slane %v3379_v48, 6  ;;  %4904 = vst [vmem:[#allocation32_spill] sm:$0xff] %v3395_v28  ;;  %v3432_v39 = vpop.xlane.xlu1 %1530 }
  0xb9   :  { %4899 = vst [vmem:[#allocation27_spill] sm:$0xff] %v3377_v34  ;;  %v3381_v49 = vpop.eup %2480  ;;  %2500 = vpow2.f32 %v747_v35  ;;  %v1261_v60 = vrot.slane %v3379_v48, 7  ;;  %v3392_v24 = vsub.f32 %v2978_v27, %v696_v54  ;;  %v1289_v25 = vsub.f32 %v2901_v4, %v1258_v56  ;;  %4913 = vst [vmem:[#allocation41_spill] sm:$0xff] %v3432_v39 }
  0xba   :  { %4901 = vst [vmem:[#allocation29_spill] sm:$0xff] %v3381_v49  ;;  %v3388_v62 = vpop.eup %2482  ;;  %2502 = vpow2.f32 %v749_v42  ;;  %v1290_v33 = vsub.f32 %v2906_v5, %v1259_v55  ;;  %v1291_v35 = vsub.f32 %v2926_v11, %v1260_v61  ;;  %v1262_v27 = vrot.slane %v3379_v48, 1 }
  0xbb   :  { %4902 = vst [vmem:[#allocation30_spill] sm:$0xff] %v3388_v62  ;;  %4903 = vst [vmem:[#allocation31_spill] sm:$0xff] %v3392_v24  ;;  %v3397_v31 = vpop.eup %2484  ;;  %2504 = vpow2.f32 %v751_v45  ;;  %v1292_v58 = vsub.f32 %v2931_v12, %v1261_v60  ;;  %v1293_v54 = vsub.f32 %v2973_v26, %v3379_v48  ;;  %v1309_v42 = vmul.f32 1.442695, %v1289_v25 }
  0xbc   :  { %4905 = vst [vmem:[#allocation33_spill] sm:$0xff] %v3397_v31  ;;  %v3402_v14 = vpop.eup %2486  ;;  %2506 = vpow2.f32 %v753_v10  ;;  %v1311_v21 = vmul.f32 1.442695, %v1290_v33  ;;  %v1313_v36 = vmul.f32 1.442695, %v1291_v35  ;;  %v1009_v55 = vsub.f32 %v2973_v26, %v3395_v28 }
  0xbd   :  { %4906 = vst [vmem:[#allocation34_spill] sm:$0xff] %v3402_v14  ;;  %v3407_v56 = vpop.eup %2488  ;;  %v1315_v45 = vmul.f32 1.442695, %v1292_v58  ;;  %2508 = vpow2.f32 %v1309_v42  ;;  %v1317_v60 = vmul.f32 1.442695, %v1293_v54  ;;  %v975_v10 = vrot.slane %v3395_v28, 5 }
  0xbe   :  { %4907 = vst [vmem:[#allocation35_spill] sm:$0xff] %v3407_v56  ;;  %v3411_v61 = vpop.eup %2490  ;;  %v976_v19 = vrot.slane %v3395_v28, 6  ;;  %2510 = vpow2.f32 %v1311_v21  ;;  %v977_v33 = vrot.slane %v3395_v28, 7  ;;  %v978_v58 = vrot.slane %v3395_v28, 1 }
  0xbf   :  { %4908 = vst [vmem:[#allocation36_spill] sm:$0xff] %v3411_v61  ;;  %v3415_v37 = vpop.eup %2492  ;;  %v3424_v42 = vsub.f32 %v2947_v17, %v1262_v27  ;;  %2512 = vpow2.f32 %v1313_v36  ;;  %v1006_v54 = vsub.f32 %v2906_v5, %v975_v10  ;;  %v979_v27 = vrot.slane %v3395_v28, 2 }
  0xc0   :  { %4909 = vst [vmem:[#allocation37_spill] sm:$0xff] %v3415_v37  ;;  %v3420_v35 = vpop.eup %2494  ;;  %2514 = vpow2.f32 %v1315_v45  ;;  %v1007_v25 = vsub.f32 %v2926_v11, %v976_v19  ;;  %v1008_v21 = vsub.f32 %v2931_v12, %v977_v33  ;;  %v1010_v24 = vsub.f32 %v2947_v17, %v978_v58 }
  0xc1   :  { %4910 = vst [vmem:[#allocation38_spill] sm:$0xff] %v3420_v35  ;;  %4911 = vst [vmem:[#allocation39_spill] sm:$0xff] %v3424_v42  ;;  %v3427_v63 = vpop.eup %2496  ;;  %2516 = vpow2.f32 %v1317_v60  ;;  %v1027_v51 = vmul.f32 1.442695, %v1006_v54  ;;  %v1033_v36 = vmul.f32 1.442695, %v1009_v55  ;;  %v1577_v19 = vsub.f32 %v2973_v26, %v3432_v39 }
  0xc2   :  { %4912 = vst [vmem:[#allocation40_spill] sm:$0xff] %v3427_v63  ;;  %v3434_v61 = vpop.eup %2498  ;;  %v1029_v10 = vmul.f32 1.442695, %v1007_v25  ;;  %v1031_v48 = vmul.f32 1.442695, %v1008_v21  ;;  %v1541_v17 = vrot.slane %v3432_v39, 3  ;;  %v3461_v21 = vpop.xlane.xlu1 %1814 }
  0xc3   :  { %4914 = vst [vmem:[#allocation42_spill] sm:$0xff] %v3434_v61  ;;  %v3437_v42 = vpop.eup %2500  ;;  %v1035_v45 = vmul.f32 1.442695, %v1010_v24  ;;  %2518 = vpow2.f32 %v1027_v51  ;;  %v1542_v58 = vrot.slane %v3432_v39, 4  ;;  %v1543_v60 = vrot.slane %v3432_v39, 5  ;;  %4920 = vst [vmem:[#allocation48_spill] sm:$0xff] %v3461_v21 }
  0xc4   :  { %4915 = vst [vmem:[#allocation43_spill] sm:$0xff] %v3437_v42  ;;  %v3441_v33 = vpop.eup %2502  ;;  %2520 = vpow2.f32 %v1029_v10  ;;  %v1544_v25 = vrot.slane %v3432_v39, 6  ;;  %v1545_v24 = vrot.slane %v3432_v39, 7  ;;  %v1572_v51 = vsub.f32 %v2896_v3, %v1541_v17  ;;  %v960_v42 = vpop.xlane.xlu0 %959 }
  0xc5   :  { %4916 = vst [vmem:[#allocation44_spill] sm:$0xff] %v3441_v33  ;;  %v3446_v61 = vpop.eup %2504  ;;  %2522 = vpow2.f32 %v1031_v48  ;;  %v1573_v33 = vsub.f32 %v2901_v4, %v1542_v58  ;;  %v1601_v37 = vmul.f32 1.442695, %v1577_v19 }
  0xc6   :  { %4917 = vst [vmem:[#allocation45_spill] sm:$0xff] %v3446_v61  ;;  %v3451_v54 = vpop.eup %2506  ;;  %2524 = vpow2.f32 %v1033_v36  ;;  %v1574_v61 = vsub.f32 %v2906_v5, %v1543_v60  ;;  %v1575_v55 = vsub.f32 %v2926_v11, %v1544_v25  ;;  %v1576_v10 = vsub.f32 %v2931_v12, %v1545_v24 }
  0xc7   :  { %4918 = vst [vmem:[#allocation46_spill] sm:$0xff] %v3451_v54  ;;  %v3459_v63 = vpop.eup %2508  ;;  %2526 = vpow2.f32 %v1035_v45  ;;  %v1591_v35 = vmul.f32 1.442695, %v1572_v51  ;;  %v1593_v54 = vmul.f32 1.442695, %v1573_v33  ;;  %v1001_v36 = vsub.f32 %v2881_v0, %v960_v42 }
  0xc8   :  { %4919 = vst [vmem:[#allocation47_spill] sm:$0xff] %v3459_v63  ;;  %v3463_v48 = vpop.eup %2510  ;;  %v1595_v17 = vmul.f32 1.442695, %v1574_v61  ;;  %v1597_v58 = vmul.f32 1.442695, %v1575_v55  ;;  %v971_v25 = vrot.slane %v960_v42, 1 }
  0xc9   :  { %4921 = vst [vmem:[#allocation49_spill] sm:$0xff] %v3463_v48  ;;  %v1599_v28 = vmul.f32 1.442695, %v1576_v10  ;;  %v3466_v60 = vpop.eup %2512  ;;  %2528 = vpow2.f32 %v1591_v35  ;;  %v972_v12 = vrot.slane %v960_v42, 2  ;;  %v973_v24 = vrot.slane %v960_v42, 3 }
  0xca   :  { %4922 = vst [vmem:[#allocation50_spill] sm:$0xff] %v3466_v60  ;;  %v3468_v63 = vpop.eup %2514  ;;  %2530 = vpow2.f32 %v1593_v54  ;;  %v974_v45 = vrot.slane %v960_v42, 4  ;;  %v1017_v19 = vmul.f32 1.442695, %v1001_v36  ;;  %v1824_v33 = vrot.slane %v3461_v21, 2  ;;  %v1244_v42 = vpop.xlane.xlu0 %1243 }
  0xcb   :  { %4923 = vst [vmem:[#allocation51_spill] sm:$0xff] %v3468_v63  ;;  %v3471_v51 = vpop.eup %2516  ;;  %2532 = vpow2.f32 %v1595_v17  ;;  %v1002_v61 = vsub.f32 %v2886_v1, %v971_v25  ;;  %v1003_v0 = vsub.f32 %v2891_v2, %v972_v12  ;;  %v1004_v55 = vsub.f32 %v2896_v3, %v973_v24 }
  0xcc   :  { %4924 = vst [vmem:[#allocation52_spill] sm:$0xff] %v3471_v51  ;;  %2534 = vpow2.f32 %v1597_v58  ;;  %v1005_v35 = vsub.f32 %v2901_v4, %v974_v45  ;;  %v1825_v10 = vrot.slane %v3461_v21, 3  ;;  %v1826_v54 = vrot.slane %v3461_v21, 4 }
  0xcd   :  { %v3479_v36 = vpop.eup %2518  ;;  %v3482_v63 = vsub.f32 %v2962_v22, %v979_v27  ;;  %2536 = vpow2.f32 %v1599_v28  ;;  %v1019_v17 = vmul.f32 1.442695, %v1002_v61  ;;  %v1021_v1 = vmul.f32 1.442695, %v1003_v0 }
  0xce   :  { %4925 = vst [vmem:[#allocation53_spill] sm:$0xff] %v3479_v36  ;;  %v3484_v25 = vpop.eup %2520  ;;  %2538 = vpow2.f32 %v1601_v37  ;;  %v1023_v12 = vmul.f32 1.442695, %v1004_v55  ;;  %v1827_v58 = vrot.slane %v3461_v21, 5  ;;  %v1828_v24 = vrot.slane %v3461_v21, 6 }
  0xcf   :  { %4926 = vst [vmem:[#allocation54_spill] sm:$0xff] %v3482_v63  ;;  %4927 = vst [vmem:[#allocation55_spill] sm:$0xff] %v3484_v25  ;;  %v3488_v45 = vpop.eup %2522  ;;  %2540 = vpow2.f32 %v1017_v19  ;;  %v1025_v36 = vmul.f32 1.442695, %v1005_v35  ;;  %v1855_v22 = vsub.f32 %v2891_v2, %v1824_v33  ;;  %v1856_v28 = vsub.f32 %v2896_v3, %v1825_v10 }
  0xd0   :  { %4928 = vst [vmem:[#allocation56_spill] sm:$0xff] %v3488_v45  ;;  %v3492_v27 = vpop.eup %2524  ;;  %2542 = vpow2.f32 %v1019_v17  ;;  %v1857_v37 = vsub.f32 %v2901_v4, %v1826_v54  ;;  %v1858_v61 = vsub.f32 %v2906_v5, %v1827_v58  ;;  %v1859_v51 = vsub.f32 %v2926_v11, %v1828_v24  ;;  %v3503_v17 = vpop.xlane.xlu0 %2098 }
  0xd1   :  { %4929 = vst [vmem:[#allocation57_spill] sm:$0xff] %v3492_v27  ;;  %v3497_v0 = vpop.eup %2526  ;;  %2544 = vpow2.f32 %v1021_v1  ;;  %v1861_v19 = vsub.f32 %v2973_v26, %v3461_v21  ;;  %v1873_v2 = vmul.f32 1.442695, %v1855_v22  ;;  %v1875_v33 = vmul.f32 1.442695, %v1856_v28  ;;  %v399_v24 = vpop.xlane.xlu1 %398 }
  0xd2   :  { %4930 = vst [vmem:[#allocation58_spill] sm:$0xff] %v3497_v0  ;;  %2546 = vpow2.f32 %v1023_v12  ;;  %v1877_v35 = vmul.f32 1.442695, %v1857_v37  ;;  %v1879_v4 = vmul.f32 1.442695, %v1858_v61  ;;  %v1255_v1 = vrot.slane %v1244_v42, 1 }
  0xd3   :  { %v3505_v3 = vpop.eup %2528  ;;  %2548 = vpow2.f32 %v1025_v36  ;;  %v1881_v5 = vmul.f32 1.442695, %v1859_v51  ;;  %v1885_v10 = vmul.f32 1.442695, %v1861_v19  ;;  %v1256_v11 = vrot.slane %v1244_v42, 2  ;;  %v3514_v12 = vld [vmem:[%s4735_s1] sm:$0xff] }
  0xd4   :  { %4931 = vst [vmem:[#allocation59_spill] sm:$0xff] %v3505_v3  ;;  %v3507_v54 = vpop.eup %2530  ;;  %2550 = vpow2.f32 %v1873_v2  ;;  %v1257_v58 = vrot.slane %v1244_v42, 3  ;;  %4934 = vst [vmem:[#allocation62_spill] sm:$0xff] %v3514_v12  ;;  %v1285_v36 = vsub.f32 %v3514_v12, %v1244_v42  ;;  %v416_v22 = vrot.slane %v399_v24, 7  ;;  %v3523_v37 = vld [vmem:[%s4735_s1 + $0x8] sm:$0xff]  ;;  %v3529_v19 = vld [vmem:[%s4735_s1 + $0x10] sm:$0xff] }
  0xd5   :  { %4932 = vst [vmem:[#allocation60_spill] sm:$0xff] %v3507_v54  ;;  %v3509_v26 = vpop.eup %2532  ;;  %2552 = vpow2.f32 %v1875_v33  ;;  %v2107_v51 = vrot.slane %v3503_v17, 1  ;;  %v1286_v61 = vsub.f32 %v3523_v37, %v1255_v1  ;;  %v1287_v42 = vsub.f32 %v3529_v19, %v1256_v11  ;;  %v2793_v2 = vld [vmem:[%s4735_s1 + $0x18] sm:$0xff] }
  0xd6   :  { %4933 = vst [vmem:[#allocation61_spill] sm:$0xff] %v3509_v26  ;;  %v3518_v28 = vpop.eup %2534  ;;  %2554 = vpow2.f32 %v1877_v35  ;;  %v1288_v33 = vsub.f32 %v2793_v2, %v1257_v58  ;;  %v1301_v24 = vmul.f32 1.442695, %v1285_v36  ;;  %v448_v55 = vsub.f32 %v3017_v41, %v416_v22 }
  0xd7   :  { %4935 = vst [vmem:[#allocation63_spill] sm:$0xff] %v3518_v28  ;;  %v3535_v35 = vpop.eup %2536  ;;  %2556 = vpow2.f32 %v1879_v4  ;;  %v2108_v1 = vrot.slane %v3503_v17, 2  ;;  %v1829_v27 = vrot.slane %v3461_v21, 7  ;;  %v1303_v45 = vmul.f32 1.442695, %v1286_v61  ;;  %v3559_v28 = vld [vmem:[%s4735_s1 + $0x38] sm:$0xff] }
  0xd8   :  { %4936 = vst [vmem:[#allocation64_spill] sm:$0xff] %v3535_v35  ;;  %v3539_v0 = vpop.eup %2538  ;;  %2558 = vpow2.f32 %v1881_v5  ;;  %v1305_v11 = vmul.f32 1.442695, %v1287_v42  ;;  %v1307_v63 = vmul.f32 1.442695, %v1288_v33  ;;  %v2109_v58 = vrot.slane %v3503_v17, 3  ;;  %v967_v35 = vpop.xlane.xlu1 %966 }
  0xd9   :  { %4937 = vst [vmem:[#allocation65_spill] sm:$0xff] %v3539_v0  ;;  %v3542_v25 = vpop.eup %2540  ;;  %2560 = vpow2.f32 %v1885_v10  ;;  %v2110_v4 = vrot.slane %v3503_v17, 4  ;;  %v479_v22 = vmul.f32 1.442695, %v448_v55  ;;  %v2111_v0 = vrot.slane %v3503_v17, 5  ;;  %4941 = vst [vmem:[#allocation69_spill] sm:$0xff] %v3559_v28 }
  0xda   :  { %v3546_v36 = vpop.eup %2542  ;;  %2562 = vpow2.f32 %v1301_v24  ;;  %v2138_v61 = vsub.f32 %v3523_v37, %v2107_v51  ;;  %v2139_v10 = vsub.f32 %v3529_v19, %v2108_v1  ;;  %v2140_v42 = vsub.f32 %v2793_v2, %v2109_v58  ;;  %v2796_v51 = vld [vmem:[%s4735_s1 + $0x28] sm:$0xff]  ;;  %v2797_v58 = vld [vmem:[%s4735_s1 + $0x40] sm:$0xff] }
  0xdb   :  { %4938 = vst [vmem:[#allocation66_spill] sm:$0xff] %v3546_v36  ;;  %v3550_v5 = vpop.eup %2544  ;;  %2564 = vpow2.f32 %v1303_v45  ;;  %v3562_v55 = vsub.f32 %v3559_v28, %v1829_v27  ;;  %v2795_v45 = vld [vmem:[%s4735_s1 + $0x20] sm:$0xff]  ;;  %v2142_v2 = vsub.f32 %v2796_v51, %v2111_v0  ;;  %v2145_v27 = vsub.f32 %v2797_v58, %v3503_v17 }
  0xdc   :  { %4939 = vst [vmem:[#allocation67_spill] sm:$0xff] %v3550_v5  ;;  %v3554_v33 = vpop.eup %2546  ;;  %2566 = vpow2.f32 %v1305_v11  ;;  %v2141_v24 = vsub.f32 %v2795_v45, %v2110_v4  ;;  %v2155_v11 = vmul.f32 1.442695, %v2138_v61  ;;  %v2157_v41 = vmul.f32 1.442695, %v2139_v10  ;;  %v1535_v10 = vpop.xlane.xlu1 %1534 }
  0xdd   :  { %4940 = vst [vmem:[#allocation68_spill] sm:$0xff] %v3554_v33  ;;  %4942 = vst [vmem:[#allocation70_spill] sm:$0xff] %v3562_v55  ;;  %v3570_v1 = vpop.eup %2548  ;;  %2568 = vpow2.f32 %v1307_v63  ;;  %v683_v55 = vpop.xlane.xlu0 %682  ;;  %v2159_v4 = vmul.f32 1.442695, %v2140_v42  ;;  %v2163_v26 = vmul.f32 1.442695, %v2142_v2 }
  0xde   :  { %4943 = vst [vmem:[#allocation71_spill] sm:$0xff] %v3570_v1  ;;  %v3576_v21 = vpop.eup %2550  ;;  %2570 = vpow2.f32 %v479_v22  ;;  %v2161_v45 = vmul.f32 1.442695, %v2141_v24  ;;  %v2169_v0 = vmul.f32 1.442695, %v2145_v27  ;;  %v982_v63 = vrot.slane %v967_v35, 5 }
  0xdf   :  { %4944 = vst [vmem:[#allocation72_spill] sm:$0xff] %v3576_v21  ;;  %v3578_v54 = vpop.eup %2552  ;;  %2572 = vpow2.f32 %v2155_v11  ;;  %v983_v51 = vrot.slane %v967_v35, 6  ;;  %v984_v39 = vrot.slane %v967_v35, 7  ;;  %v699_v58 = vrot.slane %v683_v55, 6  ;;  %v3587_v22 = vld [vmem:[%s4735_s1 + $0x68] sm:$0xff]  ;;  %v3593_v24 = vld [vmem:[%s4735_s1 + $0x70] sm:$0xff] }
  0xe0   :  { %4945 = vst [vmem:[#allocation73_spill] sm:$0xff] %v3578_v54  ;;  %v3580_v3 = vpop.eup %2554  ;;  %2574 = vpow2.f32 %v2157_v41  ;;  %v700_v61 = vrot.slane %v683_v55, 7  ;;  %v1014_v42 = vsub.f32 %v3587_v22, %v982_v63  ;;  %v1548_v41 = vrot.slane %v1535_v10, 3  ;;  %v3601_v2 = vld [vmem:[%s4735_s1 + $0x78] sm:$0xff] }
  0xe1   :  { %4946 = vst [vmem:[#allocation74_spill] sm:$0xff] %v3580_v3  ;;  %v3582_v60 = vpop.eup %2556  ;;  %2576 = vpow2.f32 %v2159_v4  ;;  %v1015_v35 = vsub.f32 %v3593_v24, %v983_v51  ;;  %v1016_v27 = vsub.f32 %v3601_v2, %v984_v39  ;;  %v731_v11 = vsub.f32 %v3593_v24, %v699_v58  ;;  %v1528_v54 = vpop.xlane.xlu0 %1527 }
  0xe2   :  { %4947 = vst [vmem:[#allocation75_spill] sm:$0xff] %v3582_v60  ;;  %v3596_v55 = vpop.eup %2558  ;;  %2578 = vpow2.f32 %v2161_v45  ;;  %v732_v4 = vsub.f32 %v3601_v2, %v700_v61  ;;  %v1043_v60 = vmul.f32 1.442695, %v1014_v42  ;;  %v1549_v3 = vrot.slane %v1535_v10, 4 }
  0xe3   :  { %4948 = vst [vmem:[#allocation76_spill] sm:$0xff] %v3596_v55  ;;  %v3606_v63 = vpop.eup %2560  ;;  %2580 = vpow2.f32 %v2163_v26  ;;  %v1045_v51 = vmul.f32 1.442695, %v1015_v35  ;;  %v1047_v45 = vmul.f32 1.442695, %v1016_v27  ;;  %v1550_v39 = vrot.slane %v1535_v10, 5 }
  0xe4   :  { %4949 = vst [vmem:[#allocation77_spill] sm:$0xff] %v3606_v63  ;;  %v3608_v55 = vpop.eup %2562  ;;  %2582 = vpow2.f32 %v2169_v0  ;;  %v761_v21 = vmul.f32 1.442695, %v731_v11  ;;  %v763_v48 = vmul.f32 1.442695, %v732_v4  ;;  %v1551_v58 = vrot.slane %v1535_v10, 6 }
  0xe5   :  { %v3610_v40 = vpop.eup %2564  ;;  %2584 = vpow2.f32 %v1043_v60  ;;  %v1552_v56 = vrot.slane %v1535_v10, 7  ;;  %v3617_v26 = vld [vmem:[%s4735_s1 + $0x58] sm:$0xff]  ;;  %v3623_v0 = vld [vmem:[%s4735_s1 + $0x60] sm:$0xff]  ;;  %v1539_v35 = vrot.slane %v1528_v54, 1  ;;  %v1582_v10 = vsub.f32 %v3587_v22, %v1550_v39 }
  0xe6   :  { %v3612_v61 = vpop.eup %2566  ;;  %2586 = vpow2.f32 %v1045_v51  ;;  %4951 = vst [vmem:[#allocation79_spill] sm:$0xff] %v3617_v26  ;;  %v1580_v42 = vsub.f32 %v3617_v26, %v1548_v41  ;;  %v1581_v60 = vsub.f32 %v3623_v0, %v1549_v3  ;;  %v1583_v11 = vsub.f32 %v3593_v24, %v1551_v58  ;;  %v3640_v58 = vpop.xlane.xlu1 %2102 }
  0xe7   :  { %4950 = vst [vmem:[#allocation78_spill] sm:$0xff] %v3612_v61  ;;  %v3626_v27 = vpop.eup %2568  ;;  %2588 = vpow2.f32 %v1047_v45  ;;  %v1584_v4 = vsub.f32 %v3601_v2, %v1552_v56  ;;  %v1540_v30 = vrot.slane %v1528_v54, 2  ;;  %v1611_v3 = vmul.f32 1.442695, %v1582_v10 }
  0xe8   :  { %4952 = vst [vmem:[#allocation80_spill] sm:$0xff] %v3626_v27  ;;  %v3631_v51 = vpop.eup %2570  ;;  %2590 = vpow2.f32 %v761_v21  ;;  %v1607_v41 = vmul.f32 1.442695, %v1580_v42  ;;  %v1609_v63 = vmul.f32 1.442695, %v1581_v60  ;;  %v1569_v45 = vsub.f32 %v3514_v12, %v1528_v54 }
  0xe9   :  { %4953 = vst [vmem:[#allocation81_spill] sm:$0xff] %v3631_v51  ;;  %v3633_v18 = vpop.eup %2572  ;;  %2592 = vpow2.f32 %v763_v48  ;;  %v1613_v43 = vmul.f32 1.442695, %v1583_v11  ;;  %v1615_v15 = vmul.f32 1.442695, %v1584_v4  ;;  %v1570_v39 = vsub.f32 %v3523_v37, %v1539_v35 }
  0xea   :  { %4954 = vst [vmem:[#allocation82_spill] sm:$0xff] %v3633_v18  ;;  %v3635_v14 = vpop.eup %2574  ;;  %2594 = vpow2.f32 %v1607_v41  ;;  %v1571_v56 = vsub.f32 %v3529_v19, %v1540_v30  ;;  %v2114_v42 = vrot.slane %v3640_v58, 1  ;;  %v2115_v48 = vrot.slane %v3640_v58, 2 }
  0xeb   :  { %4955 = vst [vmem:[#allocation83_spill] sm:$0xff] %v3635_v14  ;;  %v3642_v21 = vpop.eup %2576  ;;  %2596 = vpow2.f32 %v1609_v63  ;;  %v2116_v60 = vrot.slane %v3640_v58, 3  ;;  %v1585_v11 = vmul.f32 1.442695, %v1569_v45  ;;  %v1587_v54 = vmul.f32 1.442695, %v1570_v39 }
  0xec   :  { %4956 = vst [vmem:[#allocation84_spill] sm:$0xff] %v3642_v21  ;;  %v3647_v10 = vpop.eup %2578  ;;  %2598 = vpow2.f32 %v1611_v3  ;;  %v1589_v4 = vmul.f32 1.442695, %v1571_v56  ;;  %v2117_v30 = vrot.slane %v3640_v58, 4  ;;  %v2118_v19 = vrot.slane %v3640_v58, 5  ;;  %v3660_v3 = vld [vmem:[%s4735_s1 + $0x48] sm:$0xff] }
  0xed   :  { %4957 = vst [vmem:[#allocation85_spill] sm:$0xff] %v3647_v10  ;;  %v3649_v35 = vpop.eup %2580  ;;  %2600 = vpow2.f32 %v1613_v43  ;;  %v2119_v63 = vrot.slane %v3640_v58, 6  ;;  %4960 = vst [vmem:[#allocation88_spill] sm:$0xff] %v3660_v3  ;;  %v2146_v45 = vsub.f32 %v3660_v3, %v2114_v42  ;;  %v3666_v43 = vld [vmem:[%s4735_s1 + $0x50] sm:$0xff]  ;;  %v2148_v21 = vsub.f32 %v3617_v26, %v2116_v60 }
  0xee   :  { %4958 = vst [vmem:[#allocation86_spill] sm:$0xff] %v3649_v35  ;;  %v3654_v41 = vpop.eup %2582  ;;  %2602 = vpow2.f32 %v1615_v15  ;;  %4961 = vst [vmem:[#allocation89_spill] sm:$0xff] %v3666_v43  ;;  %v2147_v39 = vsub.f32 %v3666_v43, %v2115_v48  ;;  %v2149_v15 = vsub.f32 %v3623_v0, %v2117_v30  ;;  %v1819_v35 = vpop.xlane.xlu0 %1818 }
  0xef   :  { %4959 = vst [vmem:[#allocation87_spill] sm:$0xff] %v3654_v41  ;;  %v3669_v56 = vpop.eup %2584  ;;  %2604 = vpow2.f32 %v1585_v11  ;;  %v2150_v41 = vsub.f32 %v3587_v22, %v2118_v19  ;;  %v2151_v14 = vsub.f32 %v3593_v24, %v2119_v63  ;;  %v2171_v18 = vmul.f32 1.442695, %v2146_v45 }
  0xf0   :  { %4962 = vst [vmem:[#allocation90_spill] sm:$0xff] %v3669_v56  ;;  %v3674_v10 = vpop.eup %2586  ;;  %2606 = vpow2.f32 %v1587_v54  ;;  %v2173_v48 = vmul.f32 1.442695, %v2147_v39  ;;  %v2175_v11 = vmul.f32 1.442695, %v2148_v21  ;;  %v1831_v23 = vrot.slane %v1819_v35, 2  ;;  %v1812_v39 = vpop.xlane.xlu1 %1811 }
  0xf1   :  { %4963 = vst [vmem:[#allocation91_spill] sm:$0xff] %v3674_v10  ;;  %v3678_v3 = vpop.eup %2588  ;;  %2608 = vpow2.f32 %v1589_v4  ;;  %v2177_v47 = vmul.f32 1.442695, %v2149_v15  ;;  %v2179_v30 = vmul.f32 1.442695, %v2150_v41  ;;  %v1832_v42 = vrot.slane %v1819_v35, 3 }
  0xf2   :  { %v3680_v60 = vpop.eup %2590  ;;  %2610 = vpow2.f32 %v2171_v18  ;;  %v2181_v19 = vmul.f32 1.442695, %v2151_v14  ;;  %v1833_v54 = vrot.slane %v1819_v35, 4  ;;  %v1834_v28 = vrot.slane %v1819_v35, 5 }
  0xf3   :  { %4964 = vst [vmem:[#allocation92_spill] sm:$0xff] %v3680_v60  ;;  %v3682_v16 = vpop.eup %2592  ;;  %2612 = vpow2.f32 %v2173_v48  ;;  %v1835_v45 = vrot.slane %v1819_v35, 6  ;;  %v1836_v4 = vrot.slane %v1819_v35, 7  ;;  %v1863_v21 = vsub.f32 %v3666_v43, %v1831_v23  ;;  %v1251_v48 = vpop.xlane.xlu0 %1250 }
  0xf4   :  { %4965 = vst [vmem:[#allocation93_spill] sm:$0xff] %v3682_v16  ;;  %v3684_v63 = vpop.eup %2594  ;;  %2614 = vpow2.f32 %v2175_v11  ;;  %v1864_v14 = vsub.f32 %v3617_v26, %v1832_v42  ;;  %v1865_v18 = vsub.f32 %v3623_v0, %v1833_v54  ;;  %v1866_v41 = vsub.f32 %v3587_v22, %v1834_v28 }
  0xf5   :  { %4966 = vst [vmem:[#allocation94_spill] sm:$0xff] %v3684_v63  ;;  %v3687_v15 = vpop.eup %2596  ;;  %2616 = vpow2.f32 %v2177_v47  ;;  %v1867_v11 = vsub.f32 %v3593_v24, %v1835_v45  ;;  %v1868_v35 = vsub.f32 %v3601_v2, %v1836_v4  ;;  %v1889_v31 = vmul.f32 1.442695, %v1863_v21 }
  0xf6   :  { %4967 = vst [vmem:[#allocation95_spill] sm:$0xff] %v3687_v15  ;;  %v3692_v9 = vpop.eup %2598  ;;  %2618 = vpow2.f32 %v2179_v30  ;;  %v1891_v43 = vmul.f32 1.442695, %v1864_v14  ;;  %v1893_v47 = vmul.f32 1.442695, %v1865_v18  ;;  %v1823_v26 = vrot.slane %v1812_v39, 1 }
  0xf7   :  { %4968 = vst [vmem:[#allocation96_spill] sm:$0xff] %v3692_v9  ;;  %v3696_v23 = vpop.eup %2600  ;;  %2620 = vpow2.f32 %v2181_v19  ;;  %v1895_v34 = vmul.f32 1.442695, %v1866_v41  ;;  %v1897_v54 = vmul.f32 1.442695, %v1867_v11  ;;  %v1853_v30 = vsub.f32 %v3514_v12, %v1812_v39  ;;  %v23_v41 = vpop.xlane.xlu1 %22 }
  0xf8   :  { %4969 = vst [vmem:[#allocation97_spill] sm:$0xff] %v3696_v23  ;;  %v3698_v42 = vpop.eup %2602  ;;  %2622 = vpow2.f32 %v1889_v31  ;;  %v1899_v28 = vmul.f32 1.442695, %v1868_v35  ;;  %v1265_v45 = vrot.slane %v1251_v48, 4  ;;  %v1266_v4 = vrot.slane %v1251_v48, 5  ;;  %v20_v35 = vpop.xlane.xlu0 %19 }
  0xf9   :  { %4970 = vst [vmem:[#allocation98_spill] sm:$0xff] %v3698_v42  ;;  %v3700_v53 = vpop.eup %2604  ;;  %2624 = vpow2.f32 %v1891_v43  ;;  %v1854_v19 = vsub.f32 %v3523_v37, %v1823_v26  ;;  %v1267_v14 = vrot.slane %v1251_v48, 6  ;;  %v1268_v18 = vrot.slane %v1251_v48, 7 }
  0xfa   :  { %4971 = vst [vmem:[#allocation99_spill] sm:$0xff] %v3700_v53  ;;  %v3703_v21 = vpop.eup %2606  ;;  %2626 = vpow2.f32 %v1893_v47  ;;  %v1869_v31 = vmul.f32 1.442695, %v1853_v30  ;;  %v1297_v11 = vsub.f32 %v3623_v0, %v1265_v45  ;;  %v1298_v43 = vsub.f32 %v3587_v22, %v1266_v4 }
  0xfb   :  { %4972 = vst [vmem:[#allocation100_spill] sm:$0xff] %v3703_v21  ;;  %v3706_v62 = vpop.eup %2608  ;;  %2628 = vpow2.f32 %v1895_v34  ;;  %v1871_v12 = vmul.f32 1.442695, %v1854_v19  ;;  %v1299_v47 = vsub.f32 %v3593_v24, %v1267_v14  ;;  %v1300_v37 = vsub.f32 %v3601_v2, %v1268_v18  ;;  %v2805_v34 = vld [vmem:[%s4734_s0 + $0x8] sm:$0xff]  ;;  %v2806_v19 = vld [vmem:[%s4734_s0] sm:$0xff] }
  0xfc   :  { %4973 = vst [vmem:[#allocation101_spill] sm:$0xff] %v3706_v62  ;;  %v3710_v39 = vpop.eup %2610  ;;  %2630 = vpow2.f32 %v1897_v54  ;;  %v1325_v48 = vmul.f32 1.442695, %v1297_v11  ;;  %v1327_v49 = vmul.f32 1.442695, %v1298_v43  ;;  %v25_v30 = vsub.f32 %v2805_v34, %v23_v41 }
  0xfd   :  { %4974 = vst [vmem:[#allocation102_spill] sm:$0xff] %v3710_v39  ;;  %v3714_v26 = vpop.eup %2612  ;;  %2632 = vpow2.f32 %v1899_v28  ;;  %v2120_v4 = vrot.slane %v3640_v58, 7  ;;  %v1329_v54 = vmul.f32 1.442695, %v1299_v47  ;;  %v24_v14 = vsub.f32 %v2806_v19, %v20_v35  ;;  %v3738_v35 = vld [vmem:[%s4735_s1 + $0x30] sm:$0xff]  ;;  %s2856_s1 = smov [#allocation2]  }
  0xfe   :  { %4975 = vst [vmem:[#allocation103_spill] sm:$0xff] %v3714_v26  ;;  %v3719_v45 = vpop.eup %2614  ;;  %2634 = vpow2.f32 %v1869_v31  ;;  %v1331_v28 = vmul.f32 1.442695, %v1300_v37  ;;  %v523_v11 = vrot.slane %v3631_v51, 1  ;;  %v805_v43 = vrot.slane %v3680_v60, 2  ;;  %s2420_s29 = sshll.u32 %s2856_s1, 4  ;;  %s2421_s29 = int_to_ptr.vmem [resolvable:$true] %s2420_s29 }
  0xff   :  { %4976 = vst [vmem:[#allocation104_spill] sm:$0xff] %v3719_v45  ;;  %v3725_v18 = vpop.eup %2616  ;;  %2636 = vpow2.f32 %v1871_v12  ;;  %v28_v34 = vmul.f32 1.442695, %v25_v30  ;;  %v806_v58 = vrot.slane %v3682_v16, 1  ;;  %v1087_v31 = vrot.slane %v3669_v56, 3  ;;  %s2808_s30 = scalar_lea.vmem %s2421_s29, 16  ;;  %p2813_p1 = scmp.lt.s32.totalorder %s2421_s29, %s2421_s29 }
 0x100   :  { %4977 = vst [vmem:[#allocation105_spill] sm:$0xff] %v3725_v18  ;;  %v3729_v41 = vpop.eup %2618  ;;  %2638 = vpow2.f32 %v1325_v48  ;;  %v4980_v12 = vrot.slane %v3503_v17, 6  ;;  %v26_v19 = vmul.f32 1.442695, %v24_v14  ;;  %v1088_v48 = vrot.slane %v3674_v10, 2  ;;  %p2809_p0 = scmp.ne.s32.totalorder %s2421_s29, %s2808_s30  ;;  %s2812_s4 = scalar_lea.vmem %s2421_s29, 32 }
 0x101   :  { %4978 = vst [vmem:[#allocation106_spill] sm:$0xff] %v3729_v41  ;;  %v3733_v47 = vpop.eup %2620  ;;  %2640 = vpow2.f32 %v1327_v49  ;;  %v3749_v56 = vsub.f32 %v3601_v2, %v2120_v4  ;;  %v1065_v16 = vrot.slane %v3546_v36, 7  ;;  %v1067_v60 = vrot.slane %v3550_v5, 6  ;;  %p2814_p2 = scmp.lt.s32.totalorder %s2812_s4, %s2808_s30 }
 0x102   :  { %4979 = vst [vmem:[#allocation107_spill] sm:$0xff] %v3733_v47  ;;  %v3743_v37 = vsub.f32 %v3738_v35, %v4980_v12  ;;  %v3746_v30 = vpop.eup %2622  ;;  %2642 = vpow2.f32 %v1329_v54  ;;  %v3756_v12 = vsel %vm396_vm12, %v523_v11, 0.0  ;;  %v807_v49 = vsel %vm81_vm7, %v806_v58, %v805_v43 }
 0x103   :  { %4981 = vst [vmem:[#allocation108_spill] sm:$0xff] %v3746_v30  ;;  %v3753_v51 = vpop.eup %2624  ;;  %2644 = vpow2.f32 %v1331_v28  ;;  %v1090_v14 = vrot.slane %v3678_v3, 1  ;;  %v1089_v4 = vsel %vm81_vm7, %v1088_v48, %v1087_v31  ;;  %v1066_v54 = vsel %vm90_vm1, %v1065_v16, %v3542_v25  ;;  %p2815_p3 = por %p2814_p2, %p2813_p1 }
 0x104   :  { %4982 = vst [vmem:[#allocation109_spill] sm:$0xff] %v3753_v51  ;;  %v3760_v10 = vpop.eup %2626  ;;  %2646 = vpow2.f32 %v28_v34  ;;  %v1069_v5 = vrot.slane %v3554_v33, 5  ;;  %v1068_v28 = vsel %vm93_vm2, %v1067_v60, %v1066_v54  ;;  %v1071_v11 = vrot.slane %v3570_v1, 4 }
 0x105   :  { %4983 = vst [vmem:[#allocation110_spill] sm:$0xff] %v3760_v10  ;;  %v3766_v36 = vpop.eup %2628  ;;  %2648 = vpow2.f32 %v26_v19  ;;  %v1633_v43 = vrot.slane %v3703_v21, 7  ;;  %v1635_v31 = vrot.slane %v3706_v62, 6  ;;  %v1651_v48 = vrot.slane %v3684_v63, 5  ;;  %p2816_p4 = pnand %p2815_p3, %p2809_p0 }
 0x106   :  { %4984 = vst [vmem:[#allocation111_spill] sm:$0xff] %v3766_v36  ;;  %v3771_v58 = vpop.eup %2630  ;;  %v1070_v34 = vsel %vm96_vm3, %v1069_v5, %v1068_v28  ;;  %v1652_v16 = vrot.slane %v3687_v15, 4  ;;  %v1091_v19 = vsel %vm84_vm8, %v1090_v14, %v1089_v4  ;;  %v1654_v54 = vrot.slane %v3692_v9, 3 }
 0x107   :  { %4985 = vst [vmem:[#allocation112_spill] sm:$0xff] %v3771_v58  ;;  %v3777_v33 = vpop.eup %2632  ;;  %v1634_v60 = vsel %vm96_vm3, %v1633_v43, %v3700_v53  ;;  %v1656_v21 = vrot.slane %v3696_v23, 2  ;;  %v817_v5 = vsel %vm680_vm14, %v807_v49, 0.0  ;;  %v1072_v28 = vsel %vm99_vm4, %v1071_v11, %v1070_v34 }
 0x108   :  { %4986 = vst [vmem:[#allocation113_spill] sm:$0xff] %v3777_v33  ;;  %v3784_v1 = vpop.eup %2634  ;;  %v1636_v62 = vsel %vm99_vm4, %v1635_v31, %v1634_v60  ;;  %v1653_v15 = vsel %vm81_vm7, %v1652_v16, %v1651_v48  ;;  %v1658_v4 = vrot.slane %v3698_v42, 1  ;;  %v1349_v43 = vrot.slane %v3610_v40, 7 }
 0x109   :  { %v3790_v63 = vpop.eup %2636  ;;  %v1655_v14 = vsel %vm84_vm8, %v1654_v54, %v1653_v15  ;;  %v1351_v53 = vrot.slane %v3612_v61, 6  ;;  %v3799_v49 = vsel %vm964_vm13, %v1091_v19, 0.0  ;;  %v781_v31 = vrot.slane %v3292_v44, 7 }
 0x10a   :  { %v3796_v23 = vpop.eup %2638  ;;  %v1917_v11 = vrot.slane %v3790_v63, 7  ;;  %v1657_v34 = vsel %vm87_vm0, %v1656_v21, %v1655_v14  ;;  %v3807_v15 = vsel %vm957_vm10, %v1072_v28, 0.0  ;;  %v1350_v16 = vsel %vm93_vm2, %v1349_v43, %v3608_v55 }
 0x10b   :  { %4987 = vst [vmem:[#allocation114_spill] sm:$0xff] %v3796_v23  ;;  %v3804_v48 = vpop.eup %2640  ;;  %v783_v60 = vrot.slane %v3296_v8, 6  ;;  %v785_v54 = vrot.slane %v3301_v52, 5  ;;  %vm4990_vm12 = vcmask 80901   ;;  %v1352_v21 = vsel %vm96_vm3, %v1351_v53, %v1350_v16 }
 0x10c   :  { %4988 = vst [vmem:[#allocation115_spill] sm:$0xff] %v3804_v48  ;;  %v3813_v19 = vpop.eup %2642  ;;  %v3816_v42 = vsel %vm4990_vm12, %v1636_v62, 0.0  ;;  %v1353_v14 = vrot.slane %v3626_v27, 5  ;;  %v782_v28 = vsel %vm87_vm0, %v781_v31, %v3290_v38  ;;  %v1918_v43 = vsel %vm99_vm4, %v1917_v11, %v3784_v1 }
 0x10d   :  { %4989 = vst [vmem:[#allocation116_spill] sm:$0xff] %v3813_v19  ;;  %v3822_v9 = vpop.eup %2644  ;;  %v1659_v8 = vsel %vm90_vm1, %v1658_v4, %v1657_v34  ;;  %v784_v61 = vsel %vm90_vm1, %v783_v60, %v782_v28  ;;  %v787_v52 = vrot.slane %v3307_v20, 4  ;;  %v789_v27 = vrot.slane %v3314_v32, 3 }
 0x10e   :  { %4991 = vst [vmem:[#allocation117_spill] sm:$0xff] %v3822_v9  ;;  %v3829_v62 = vpop.eup %2646  ;;  %v1354_v53 = vsel %vm99_vm4, %v1353_v14, %v1352_v21  ;;  %v786_v16 = vsel %vm93_vm2, %v785_v54, %v784_v61  ;;  %v1369_v31 = vrot.slane %v3796_v23, 4  ;;  %v1370_v34 = vrot.slane %v3804_v48, 3 }
 0x10f   :  { %v3835_v44 = vpop.eup %2648  ;;  %v33_v11 = vsel %vm17_vm6, %v3829_v62, 0.0  ;;  %v788_v4 = vsel %vm96_vm3, %v787_v52, %v786_v16  ;;  %v1372_v60 = vrot.slane %v3813_v19, 2  ;;  %v1947_v61 = vsel %vm1809_vm15, %v1918_v43, 0.0 }
 0x110   :  { %34 = vadd.xlane.f32.xlu1 %v33_v11  ;;  %v30_v21 = vsel %vm17_vm6, %v3835_v44, 0.0  ;;  %vm4992_vm10 = vcmask 77824   ;;  %v461_v14 = vmul.f32 1.442695, %v3310_v57  ;;  %v790_v28 = vsel %vm99_vm4, %v789_v27, %v788_v4 }
 0x111   :  { %v3846_v54 = vsel %vm4992_vm10, %v1659_v8, 0.0  ;;  %31 = vadd.xlane.f32.xlu0 %v30_v21  ;;  %v1371_v52 = vsel %vm81_vm7, %v1370_v34, %v1369_v31  ;;  %v497_v16 = vrot.slane %v3352_v50, 7  ;;  %v499_v19 = vrot.slane %v3356_v59, 6 }
 0x112   :  { %vm4993_vm13 = vcmask 80900   ;;  %v1374_v48 = vrot.slane %v3822_v9, 1  ;;  %2650 = vpow2.f32 %v461_v14  ;;  %v501_v8 = vrot.slane %v3360_v13, 5  ;;  %v4997_v9 = vld [vmem:[#allocation29_spill] sm:$0xff] }
 0x113   :  { %v3854_v11 = vsel %vm4993_vm13, %v1354_v53, 0.0  ;;  %v1373_v43 = vsel %vm84_vm8, %v1372_v60, %v1371_v52  ;;  %v498_v57 = vsel %vm84_vm8, %v497_v16, %v3350_v46  ;;  %v503_v27 = vrot.slane %v3367_v7, 4 }
 0x114   :  { %v4994_v31 = vrot.slane %v3286_v6, 6  ;;  %534 = vadd.xlane.f32.xlu1 %v3756_v12  ;;  %vm4995_vm14 = vcmask 80898   ;;  %v500_v34 = vsel %vm87_vm0, %v499_v19, %v498_v57  ;;  %v4996_v21 = vrot.slane %v3286_v6, 7 }
 0x115   :  { %v3867_v53 = vsel %vm4995_vm14, %v790_v28, 0.0  ;;  %v197_v14 = vmul.f32 1.442695, %v3334_v29  ;;  %818 = vadd.xlane.f32.xlu0 %v817_v5  ;;  %v502_v52 = vsel %vm90_vm1, %v501_v8, %v500_v34  ;;  %v233_v23 = vrot.slane %v4997_v9, 7  ;;  %v4999_v28 = vld [vmem:[#allocation26_spill] sm:$0xff]  ;;  %v5001_v5 = vld [vmem:[#allocation33_spill] sm:$0xff] }
 0x116   :  { %v169_v4 = vsub.f32 %v3593_v24, %v4994_v31  ;;  %v170_v60 = vsub.f32 %v3601_v2, %v4996_v21  ;;  %v4998_v31 = vld [vmem:[#allocation30_spill] sm:$0xff]  ;;  %v1375_v12 = vsel %vm87_vm0, %v1374_v48, %v1373_v43  ;;  %v505_v13 = vrot.slane %v4999_v28, 3  ;;  %v5000_v2 = vld [vmem:[#allocation27_spill] sm:$0xff]  ;;  %v5005_v21 = vld [vmem:[#allocation69_spill] sm:$0xff] }
 0x117   :  { %v235_v7 = vrot.slane %v4998_v31, 6  ;;  %2652 = vpow2.f32 %v197_v14  ;;  %v504_v6 = vsel %vm93_vm2, %v503_v27, %v502_v52  ;;  %v234_v29 = vsel %vm81_vm7, %v233_v23, %v5000_v2  ;;  %v5006_v14 = vld [vmem:[#allocation12_spill] sm:$0xff]  ;;  %v5007_v52 = vld [vmem:[#allocation15_spill] sm:$0xff] }
 0x118   :  { %v199_v16 = vmul.f32 1.442695, %v169_v4  ;;  %v201_v19 = vmul.f32 1.442695, %v170_v60  ;;  %v237_v57 = vrot.slane %v5001_v5, 5  ;;  %1102 = vadd.xlane.f32.xlu1 %v3799_v49  ;;  %v5002_v4 = vld [vmem:[#allocation8_spill] sm:$0xff] }
 0x119   :  { %v236_v8 = vsel %vm84_vm8, %v235_v7, %v234_v29  ;;  %v5003_v34 = vrot.slane %v5002_v4, 6  ;;  %v5004_v43 = vrot.slane %v5002_v4, 7  ;;  %1948 = vadd.xlane.f32.xlu0 %v1947_v61  ;;  %v181_v23 = vmul.f32 1.442695, %v5006_v14  ;;  %v5008_v28 = vld [vmem:[#allocation16_spill] sm:$0xff]  ;;  %v5009_v7 = vld [vmem:[#allocation34_spill] sm:$0xff] }
 0x11a   :  { %2654 = vpow2.f32 %v199_v16  ;;  %v238_v27 = vsel %vm87_vm0, %v237_v57, %v236_v8  ;;  %v219_v16 = vrot.slane %v5007_v52, 7  ;;  %v221_v49 = vrot.slane %v5008_v28, 6  ;;  %v5010_v4 = vld [vmem:[#allocation14_spill] sm:$0xff] }
 0x11b   :  { %2656 = vpow2.f32 %v201_v19  ;;  %v161_v48 = vsub.f32 %v3738_v35, %v5003_v34  ;;  %v162_v60 = vsub.f32 %v5005_v21, %v5004_v43  ;;  %v1385_v19 = vsel %vm1248_vm9, %v1375_v12, 0.0  ;;  %v5011_v34 = vld [vmem:[#allocation13_spill] sm:$0xff] }
 0x11c   :  { %v239_v29 = vrot.slane %v5009_v7, 4  ;;  %v506_v35 = vsel %vm96_vm3, %v505_v13, %v504_v6  ;;  %2658 = vpow2.f32 %v181_v23  ;;  %v220_v61 = vsel %vm81_vm7, %v219_v16, %v5010_v4  ;;  %v3903_v43 = vpop.eup %2650  ;;  %1096 = vadd.xlane.f32.xlu1 %v3807_v15  ;;  %v5015_v13 = vld [vmem:[#allocation24_spill] sm:$0xff] }
 0x11d   :  { %v183_v59 = vmul.f32 1.442695, %v161_v48  ;;  %v185_v50 = vmul.f32 1.442695, %v162_v60  ;;  %v5012_v57 = vrot.slane %v5011_v34, 5  ;;  %5013 = vst [vmem:[#allocation29_spill] sm:$0xff] %v3903_v43  ;;  %1664 = vadd.xlane.f32.xlu0 %v3816_v42  ;;  %v222_v23 = vsel %vm84_vm8, %v221_v49, %v220_v61 }
 0x11e   :  { %v240_v12 = vsel %vm90_vm1, %v239_v29, %v238_v27  ;;  %v5014_v48 = vrot.slane %v5011_v34, 6  ;;  %v473_v6 = vmul.f32 1.442695, %v5015_v13  ;;  %v507_v14 = vrot.slane %v3903_v43, 2  ;;  %v5017_v27 = vld [vmem:[#allocation35_spill] sm:$0xff]  ;;  %v5020_v13 = vld [vmem:[#allocation38_spill] sm:$0xff] }
 0x11f   :  { %v446_v8 = vsub.f32 %v3587_v22, %v5012_v57  ;;  %2660 = vpow2.f32 %v183_v59  ;;  %v5016_v57 = vld [vmem:[#allocation17_spill] sm:$0xff]  ;;  %v509_v59 = vrot.slane %v5017_v27, 1  ;;  %v5018_v29 = vld [vmem:[#allocation19_spill] sm:$0xff]  ;;  %v513_v52 = vrot.slane %v5020_v13, 6  ;;  %v5021_v61 = vld [vmem:[#allocation36_spill] sm:$0xff] }
 0x120   :  { %v447_v60 = vsub.f32 %v3593_v24, %v5014_v48  ;;  %2662 = vpow2.f32 %v185_v50  ;;  %v223_v28 = vrot.slane %v5016_v57, 5  ;;  %v225_v34 = vrot.slane %v5018_v29, 4  ;;  %v5019_v24 = vld [vmem:[#allocation37_spill] sm:$0xff]  ;;  %1670 = vadd.xlane.f32.xlu1 %v3846_v54  ;;  %v5022_v29 = vld [vmem:[#allocation40_spill] sm:$0xff]  ;;  %v5029_v43 = vld [vmem:[#allocation39_spill] sm:$0xff] }
 0x121   :  { %v475_v16 = vmul.f32 1.442695, %v446_v8  ;;  %2664 = vpow2.f32 %v473_v6  ;;  %v511_v48 = vrot.slane %v5019_v24, 7  ;;  %v3919_v42 = vpop.eup %2652  ;;  %v508_v50 = vsel %vm99_vm4, %v507_v14, %v506_v35  ;;  %1380 = vadd.xlane.f32.xlu0 %v3854_v11  ;;  %v5023_v4 = vld [vmem:[#allocation28_spill] sm:$0xff]  ;;  %v5025_v27 = vld [vmem:[#allocation89_spill] sm:$0xff] }
 0x122   :  { %v477_v15 = vmul.f32 1.442695, %v447_v60  ;;  %v224_v49 = vsel %vm87_vm0, %v223_v28, %v222_v23  ;;  %v510_v8 = vsel %vm81_vm7, %v5021_v61, %v509_v59  ;;  %v241_v6 = vrot.slane %v3919_v42, 3  ;;  %v5028_v59 = vld [vmem:[#allocation79_spill] sm:$0xff] }
 0x123   :  { %2666 = vpow2.f32 %v475_v16  ;;  %v512_v16 = vsel %vm84_vm8, %v511_v48, %v510_v8  ;;  %v515_v57 = vrot.slane %v5022_v29, 5  ;;  %v5024_v54 = vrot.slane %v5023_v4, 2 }
 0x124   :  { %2668 = vpow2.f32 %v477_v15  ;;  %v3926_v60 = vpop.eup %2654  ;;  %v514_v23 = vsel %vm87_vm0, %v513_v52, %v512_v16  ;;  %v5027_v15 = vrot.slane %v5023_v4, 3  ;;  %v1319_v46 = vmul.f32 1.442695, %v5029_v43  ;;  %812 = vadd.xlane.f32.xlu1 %v3867_v53 }
 0x125   :  { %v1295_v35 = vsub.f32 %v5025_v27, %v5024_v54  ;;  %v3935_v14 = vpop.eup %2656  ;;  %v243_v28 = vrot.slane %v3926_v60, 2  ;;  %vm5030_vm9 = vcmask 80897   ;;  %v242_v8 = vsel %vm93_vm2, %v241_v6, %v240_v12  ;;  %1386 = vadd.xlane.f32.xlu0 %v1385_v19  ;;  %v5033_v6 = vld [vmem:[#allocation49_spill] sm:$0xff] }
 0x126   :  { %5026 = vst [vmem:[#allocation30_spill] sm:$0xff] %v3935_v14  ;;  %v1296_v11 = vsub.f32 %v5028_v59, %v5027_v15  ;;  %v527_v48 = vsel %vm5030_vm9, %v508_v50, 0.0  ;;  %v245_v29 = vrot.slane %v3935_v14, 1  ;;  %v226_v54 = vsel %vm90_vm1, %v225_v34, %v224_v49  ;;  %v3949_v4 = vpop.eup %2658  ;;  %v5032_v15 = vld [vmem:[#allocation47_spill] sm:$0xff]  ;;  %v5035_v49 = vld [vmem:[#allocation50_spill] sm:$0xff] }
 0x127   :  { %v244_v13 = vsel %vm96_vm3, %v243_v28, %v242_v8  ;;  %2670 = vpow2.f32 %v1319_v46  ;;  %v1321_v52 = vmul.f32 1.442695, %v1295_v35  ;;  %5031 = vst [vmem:[#allocation27_spill] sm:$0xff] %v3949_v4  ;;  %v516_v50 = vsel %vm90_vm1, %v515_v57, %v514_v23  ;;  %v3959_v46 = vpop.xlane.xlu0 %2095 }
 0x128   :  { %v1323_v16 = vmul.f32 1.442695, %v1296_v11  ;;  %v246_v43 = vsel %vm99_vm4, %v245_v29, %v244_v13  ;;  %v1355_v12 = vrot.slane %v5032_v15, 4  ;;  %v1356_v14 = vrot.slane %v5033_v6, 3  ;;  %v5037_v13 = vld [vmem:[#allocation51_spill] sm:$0xff]  ;;  %528 = vadd.xlane.f32.xlu1 %v527_v48  ;;  %v5046_v6 = vld [vmem:[#allocation52_spill] sm:$0xff] }
 0x129   :  { %v3955_v24 = vpop.eup %2660  ;;  %v252_v53 = vsel %vm17_vm6, %v246_v43, 0.0  ;;  %v227_v34 = vrot.slane %v3949_v4, 3  ;;  %2672 = vpow2.f32 %v1321_v52  ;;  %v1358_v35 = vrot.slane %v5035_v49, 2  ;;  %v5038_v43 = vld [vmem:[#allocation18_spill] sm:$0xff] }
 0x12a   :  { %5034 = vst [vmem:[#allocation33_spill] sm:$0xff] %v3955_v24  ;;  %v3962_v19 = vpop.eup %2662  ;;  %v229_v29 = vrot.slane %v3955_v24, 2  ;;  %2674 = vpow2.f32 %v1323_v16  ;;  %v1357_v57 = vsel %vm81_vm7, %v1356_v14, %v1355_v12  ;;  %v1360_v28 = vrot.slane %v5037_v13, 1  ;;  %253 = vadd.xlane.f32.xlu0 %v252_v53  ;;  %v5041_v12 = vld [vmem:[#allocation62_spill] sm:$0xff]  ;;  %v5044_v53 = vld [vmem:[#allocation31_spill] sm:$0xff] }
 0x12b   :  { %5036 = vst [vmem:[#allocation8_spill] sm:$0xff] %v3962_v19  ;;  %v3967_v23 = vpop.eup %2664  ;;  %v228_v11 = vsel %vm93_vm2, %v227_v34, %v226_v54  ;;  %v231_v8 = vrot.slane %v3962_v19, 1  ;;  %v1359_v52 = vsel %vm84_vm8, %v1358_v35, %v1357_v57  ;;  %v5039_v4 = vrot.slane %v5038_v43, 4 }
 0x12c   :  { %v230_v14 = vsel %vm96_vm3, %v229_v29, %v228_v11  ;;  %v517_v16 = vrot.slane %v3967_v23, 4  ;;  %v5042_v54 = vrot.slane %v5038_v43, 5  ;;  %v1361_v57 = vsel %vm87_vm0, %v1360_v28, %v1359_v52  ;;  %v5047_v52 = vld [vmem:[#allocation43_spill] sm:$0xff] }
 0x12d   :  { %v729_v49 = vsub.f32 %v3623_v0, %v5039_v4  ;;  %v3975_v15 = vpop.eup %2666  ;;  %v232_v35 = vsel %vm99_vm4, %v231_v8, %v230_v14  ;;  %v755_v24 = vmul.f32 1.442695, %v5044_v53  ;;  %v1362_v28 = vsel %vm90_vm1, %v5046_v6, %v1361_v57 }
 0x12e   :  { %5040 = vst [vmem:[#allocation69_spill] sm:$0xff] %v3975_v15  ;;  %v730_v34 = vsub.f32 %v3587_v22, %v5042_v54  ;;  %v3984_v19 = vpop.eup %2668  ;;  %v519_v4 = vrot.slane %v3975_v15, 3  ;;  %v249_v29 = vsel %vm17_vm6, %v232_v35, 0.0  ;;  %v518_v11 = vsel %vm93_vm2, %v517_v16, %v516_v50  ;;  %v5045_v54 = vld [vmem:[#allocation42_spill] sm:$0xff] }
 0x12f   :  { %5043 = vst [vmem:[#allocation12_spill] sm:$0xff] %v3984_v19  ;;  %v521_v48 = vrot.slane %v3984_v19, 2  ;;  %v757_v13 = vmul.f32 1.442695, %v729_v49  ;;  %250 = vadd.xlane.f32.xlu1 %v249_v29  ;;  %2676 = vpow2.f32 %v755_v24  ;;  %v791_v8 = vrot.slane %v5045_v54, 2  ;;  %v5049_v49 = vld [vmem:[#allocation45_spill] sm:$0xff] }
 0x130   :  { %v520_v22 = vsel %vm96_vm3, %v519_v4, %v518_v11  ;;  %v759_v43 = vmul.f32 1.442695, %v730_v34  ;;  %v792_v35 = vrot.slane %v5047_v52, 1  ;;  %v795_v16 = vrot.slane %v5049_v49, 7  ;;  %v5050_v4 = vld [vmem:[#allocation41_spill] sm:$0xff]  ;;  %v5052_v34 = vld [vmem:[#allocation88_spill] sm:$0xff] }
 0x131   :  { %v522_v14 = vsel %vm99_vm4, %v521_v48, %v520_v22  ;;  %2678 = vpow2.f32 %v757_v13  ;;  %v3999_v53 = vpop.eup %2670  ;;  %v5051_v24 = vrot.slane %v5050_v4, 1  ;;  %v5053_v13 = vrot.slane %v5050_v4, 2  ;;  %v5054_v22 = vld [vmem:[#allocation59_spill] sm:$0xff]  ;;  %v5057_v54 = vld [vmem:[#allocation60_spill] sm:$0xff]  ;;  %v5060_v4 = vld [vmem:[#allocation46_spill] sm:$0xff] }
 0x132   :  { %5048 = vst [vmem:[#allocation34_spill] sm:$0xff] %v3999_v53  ;;  %v530_v50 = vsel %vm17_vm6, %v522_v14, 0.0  ;;  %2680 = vpow2.f32 %v759_v43  ;;  %v1363_v48 = vrot.slane %v3999_v53, 7  ;;  %v793_v11 = vsel %vm81_vm7, %v792_v35, %v791_v8  ;;  %v5056_v43 = vld [vmem:[#allocation44_spill] sm:$0xff] }
 0x133   :  { %v1578_v29 = vsub.f32 %v5052_v34, %v5051_v24  ;;  %531 = vadd.xlane.f32.xlu0 %v530_v50  ;;  %v1579_v57 = vsub.f32 %v5025_v27, %v5053_v13  ;;  %v1637_v6 = vrot.slane %v5054_v22, 5  ;;  %v4012_v52 = vpop.eup %2672  ;;  %v794_v14 = vsel %vm84_vm8, %v5056_v43, %v793_v11  ;;  %v5058_v24 = vld [vmem:[#allocation61_spill] sm:$0xff] }
 0x134   :  { %5055 = vst [vmem:[#allocation13_spill] sm:$0xff] %v4012_v52  ;;  %v1638_v19 = vrot.slane %v5057_v54, 4  ;;  %v1640_v50 = vrot.slane %v5058_v24, 3  ;;  %v4018_v15 = vpop.eup %2674  ;;  %v1364_v8 = vsel %vm93_vm2, %v1363_v48, %v1362_v28  ;;  %v1365_v35 = vrot.slane %v4012_v52, 6  ;;  %v5061_v54 = vld [vmem:[#allocation63_spill] sm:$0xff]  ;;  %v5062_v48 = vld [vmem:[#allocation64_spill] sm:$0xff] }
 0x135   :  { %v1603_v49 = vmul.f32 1.442695, %v1578_v29  ;;  %5059 = vst [vmem:[#allocation24_spill] sm:$0xff] %v4018_v15  ;;  %v797_v27 = vrot.slane %v5060_v4, 6  ;;  %v1605_v13 = vmul.f32 1.442695, %v1579_v57  ;;  %v796_v53 = vsel %vm87_vm0, %v795_v16, %v794_v14 }
 0x136   :  { %v1367_v22 = vrot.slane %v4018_v15, 5  ;;  %v1639_v29 = vsel %vm81_vm7, %v1638_v19, %v1637_v6  ;;  %v1366_v11 = vsel %vm96_vm3, %v1365_v35, %v1364_v8  ;;  %v1642_v43 = vrot.slane %v5061_v54, 2  ;;  %v5063_v4 = vld [vmem:[#allocation32_spill] sm:$0xff]  ;;  %v5066_v14 = vld [vmem:[#allocation54_spill] sm:$0xff]  ;;  %v5067_v8 = vld [vmem:[#allocation53_spill] sm:$0xff] }
 0x137   :  { %2682 = vpow2.f32 %v1603_v49  ;;  %v1641_v24 = vsel %vm84_vm8, %v1640_v50, %v1639_v29  ;;  %v1644_v52 = vrot.slane %v5062_v48, 1  ;;  %v5064_v57 = vrot.slane %v5063_v4, 3  ;;  %v5074_v54 = vld [vmem:[#allocation70_spill] sm:$0xff] }
 0x138   :  { %2684 = vpow2.f32 %v1605_v13  ;;  %v1368_v28 = vsel %vm99_vm4, %v1367_v22, %v1366_v11  ;;  %v5065_v16 = vrot.slane %v5063_v4, 4  ;;  %v1643_v19 = vsel %vm87_vm0, %v1642_v43, %v1641_v24  ;;  %v5069_v43 = vld [vmem:[#allocation56_spill] sm:$0xff] }
 0x139   :  { %v1012_v15 = vsub.f32 %v5028_v59, %v5064_v57  ;;  %v1382_v6 = vsel %vm17_vm6, %v1368_v28, 0.0  ;;  %v1037_v50 = vmul.f32 1.442695, %v5066_v14  ;;  %v1073_v35 = vrot.slane %v5067_v8, 3  ;;  %v4041_v13 = vpop.eup %2676  ;;  %v5068_v59 = vld [vmem:[#allocation55_spill] sm:$0xff] }
 0x13a   :  { %v1013_v49 = vsub.f32 %v3623_v0, %v5065_v16  ;;  %1383 = vadd.xlane.f32.xlu1 %v1382_v6  ;;  %v798_v22 = vsel %vm90_vm1, %v797_v27, %v796_v53  ;;  %v1074_v57 = vrot.slane %v5068_v59, 2  ;;  %v799_v0 = vrot.slane %v4041_v13, 5 }
 0x13b   :  { %v1039_v29 = vmul.f32 1.442695, %v1012_v15  ;;  %v4045_v4 = vpop.eup %2678  ;;  %v1645_v28 = vsel %vm90_vm1, %v1644_v52, %v1643_v19  ;;  %2686 = vpow2.f32 %v1037_v50  ;;  %v1076_v24 = vrot.slane %v5069_v43, 1  ;;  %v5071_v50 = vld [vmem:[#allocation65_spill] sm:$0xff] }
 0x13c   :  { %v1041_v11 = vmul.f32 1.442695, %v1013_v49  ;;  %v4050_v16 = vpop.eup %2680  ;;  %v5070_v6 = vsub.f32 %v5041_v12, %v3959_v46  ;;  %v801_v15 = vrot.slane %v4045_v4, 4  ;;  %v1075_v53 = vsel %vm81_vm7, %v1074_v57, %v1073_v35  ;;  %v5072_v46 = vld [vmem:[#allocation48_spill] sm:$0xff]  ;;  %v5075_v57 = vld [vmem:[#allocation57_spill] sm:$0xff] }
 0x13d   :  { %2688 = vpow2.f32 %v1039_v29  ;;  %v800_v27 = vsel %vm93_vm2, %v799_v0, %v798_v22  ;;  %v803_v49 = vrot.slane %v4050_v16, 3  ;;  %v1077_v52 = vsel %vm84_vm8, %v1076_v24, %v1075_v53  ;;  %v5076_v0 = vld [vmem:[#allocation72_spill] sm:$0xff]  ;;  %v5077_v43 = vld [vmem:[#allocation73_spill] sm:$0xff] }
 0x13e   :  { %v4055_v14 = vmul.f32 1.442695, %v5070_v6  ;;  %2690 = vpow2.f32 %v1041_v11  ;;  %v802_v19 = vsel %vm96_vm3, %v801_v15, %v800_v27  ;;  %v1646_v48 = vsel %vm93_vm2, %v5071_v50, %v1645_v28  ;;  %v5079_v27 = vld [vmem:[#allocation74_spill] sm:$0xff] }
 0x13f   :  { %v5073_v12 = vrot.slane %v5072_v46, 1  ;;  %v1883_v29 = vmul.f32 1.442695, %v5074_v54  ;;  %v804_v35 = vsel %vm99_vm4, %v803_v49, %v802_v19  ;;  %v1078_v22 = vsel %vm87_vm0, %v5075_v57, %v1077_v52  ;;  %v5081_v49 = vld [vmem:[#allocation58_spill] sm:$0xff] }
 0x140   :  { %v1919_v11 = vrot.slane %v5076_v0, 6  ;;  %v1920_v24 = vrot.slane %v5077_v43, 5  ;;  %v814_v15 = vsel %vm17_vm6, %v804_v35, 0.0  ;;  %v1922_v46 = vrot.slane %v5079_v27, 4 }
 0x141   :  { %v1862_v6 = vsub.f32 %v5052_v34, %v5073_v12  ;;  %v4074_v53 = vpop.eup %2682  ;;  %2692 = vpow2.f32 %v1883_v29  ;;  %815 = vadd.xlane.f32.xlu0 %v814_v15  ;;  %v1079_v19 = vrot.slane %v5081_v49, 7  ;;  %v5082_v12 = vld [vmem:[#allocation75_spill] sm:$0xff]  ;;  %v1934_v15 = vrot.slane %v3753_v51, 5 }
 0x142   :  { %5078 = vst [vmem:[#allocation36_spill] sm:$0xff] %v4074_v53  ;;  %v4078_v34 = vpop.eup %2684  ;;  %v1647_v54 = vrot.slane %v4074_v53, 7  ;;  %v1921_v52 = vsel %vm81_vm7, %v1920_v24, %v1919_v11  ;;  %v1924_v0 = vrot.slane %v5082_v12, 3  ;;  %v1936_v53 = vrot.slane %v3760_v10, 4  ;;  %v5083_v24 = vld [vmem:[#allocation76_spill] sm:$0xff] }
 0x143   :  { %v1887_v28 = vmul.f32 1.442695, %v1862_v6  ;;  %5080 = vst [vmem:[#allocation28_spill] sm:$0xff] %v4078_v34  ;;  %v1649_v43 = vrot.slane %v4078_v34, 6  ;;  %v1923_v35 = vsel %vm84_vm8, %v1922_v46, %v1921_v52  ;;  %v1933_v6 = vrot.slane %v3746_v30, 6 }
 0x144   :  { %v1648_v29 = vsel %vm96_vm3, %v1647_v54, %v1646_v48  ;;  %v1080_v27 = vsel %vm90_vm1, %v1079_v19, %v1078_v22  ;;  %v1925_v11 = vsel %vm87_vm0, %v1924_v0, %v1923_v35  ;;  %v1926_v12 = vrot.slane %v5083_v24, 2 }
 0x145   :  { %2694 = vpow2.f32 %v1887_v28  ;;  %v1650_v50 = vsel %vm99_vm4, %v1649_v43, %v1648_v29  ;;  %v1938_v28 = vrot.slane %v3766_v36, 3  ;;  %v4095_v34 = vpop.eup %2686  ;;  %v1935_v48 = vsel %vm81_vm7, %v1934_v15, %v1933_v6  ;;  %v5085_v29 = vld [vmem:[#allocation82_spill] sm:$0xff] }
 0x146   :  { %v1666_v46 = vsel %vm17_vm6, %v1650_v50, 0.0  ;;  %v1940_v22 = vrot.slane %v3771_v58, 2  ;;  %v5084_v54 = vrot.slane %v3503_v17, 7  ;;  %v1081_v43 = vrot.slane %v4095_v34, 6  ;;  %v5086_v58 = vld [vmem:[#allocation83_spill] sm:$0xff] }
 0x147   :  { %v4103_v52 = vpop.eup %2688  ;;  %1667 = vadd.xlane.f32.xlu1 %v1666_v46  ;;  %v1937_v0 = vsel %vm84_vm8, %v1936_v53, %v1935_v48  ;;  %v2165_v35 = vmul.f32 1.442695, %v3743_v37  ;;  %v2201_v24 = vrot.slane %v5085_v29, 7  ;;  %v1942_v53 = vrot.slane %v3777_v33, 1 }
 0x148   :  { %v2144_v19 = vsub.f32 %v5005_v21, %v5084_v54  ;;  %v4109_v50 = vpop.eup %2690  ;;  %v1083_v6 = vrot.slane %v4103_v52, 5  ;;  %v1939_v15 = vsel %vm87_vm0, %v1938_v28, %v1937_v0  ;;  %v2202_v21 = vrot.slane %v5086_v58, 6 }
 0x149   :  { %v1082_v54 = vsel %vm93_vm2, %v1081_v43, %v1080_v27  ;;  %v1085_v46 = vrot.slane %v4109_v50, 4  ;;  %v1941_v36 = vsel %vm90_vm1, %v1940_v22, %v1939_v15  ;;  %2696 = vpow2.f32 %v2165_v35 }
 0x14a   :  { %v2167_v17 = vmul.f32 1.442695, %v2144_v19  ;;  %v1084_v37 = vsel %vm96_vm3, %v1083_v6, %v1082_v54  ;;  %v2203_v48 = vsel %vm81_vm7, %v2202_v21, %v2201_v24  ;;  %v1927_v27 = vsel %vm90_vm1, %v1926_v12, %v1925_v11  ;;  %v5088_v19 = vld [vmem:[#allocation84_spill] sm:$0xff]  ;;  %v5090_v54 = vld [vmem:[#allocation85_spill] sm:$0xff] }
 0x14b   :  { %v4120_v10 = vpop.eup %2692  ;;  %v1086_v28 = vsel %vm99_vm4, %v1085_v46, %v1084_v37  ;;  %v2204_v43 = vrot.slane %v5088_v19, 5  ;;  %v1943_v35 = vsel %vm93_vm2, %v1942_v53, %v1941_v36  ;;  %v2183_v6 = vmul.f32 1.442695, %v3749_v56  ;;  %v5091_v36 = vld [vmem:[#allocation77_spill] sm:$0xff] }
 0x14c   :  { %2698 = vpow2.f32 %v2167_v17  ;;  %5087 = vst [vmem:[#allocation89_spill] sm:$0xff] %v4120_v10  ;;  %v1098_v22 = vsel %vm17_vm6, %v1086_v28, 0.0  ;;  %v1928_v0 = vrot.slane %v4120_v10, 1  ;;  %v2216_v17 = vrot.slane %v3714_v26, 6  ;;  %v5108_v26 = vld [vmem:[#allocation71_spill] sm:$0xff] }
 0x14d   :  { %2700 = vpow2.f32 %v4055_v14  ;;  %1099 = vadd.xlane.f32.xlu0 %v1098_v22  ;;  %v2205_v24 = vsel %vm84_vm8, %v2204_v43, %v2203_v48  ;;  %v2215_v14 = vrot.slane %v3710_v39, 7  ;;  %v2218_v12 = vrot.slane %v3719_v45, 5 }
 0x14e   :  { %v1929_v11 = vsel %vm93_vm2, %v1928_v0, %v1927_v27  ;;  %v2206_v46 = vrot.slane %v5090_v54, 4  ;;  %2702 = vpow2.f32 %v2183_v6  ;;  %v2220_v53 = vrot.slane %v3725_v18, 4  ;;  %v5092_v0 = vld [vmem:[#allocation86_spill] sm:$0xff]  ;;  %v5102_v18 = vld [vmem:[#allocation91_spill] sm:$0xff] }
 0x14f   :  { %v4130_v15 = vpop.eup %2694  ;;  %v1930_v56 = vsel %vm96_vm3, %v5091_v36, %v1929_v11  ;;  %v2217_v37 = vsel %vm81_vm7, %v2216_v17, %v2215_v14  ;;  %v1953_v28 = vsel %vm1816_vm11, %v1943_v35, 0.0  ;;  %v2208_v6 = vrot.slane %v5092_v0, 3 }
 0x150   :  { %5089 = vst [vmem:[#allocation79_spill] sm:$0xff] %v4130_v15  ;;  %v1931_v21 = vrot.slane %v4130_v15, 7  ;;  %v2207_v43 = vsel %vm87_vm0, %v2206_v46, %v2205_v24  ;;  %v2219_v27 = vsel %vm84_vm8, %v2218_v12, %v2217_v37  ;;  %v2222_v54 = vrot.slane %v3729_v41, 3 }
 0x151   :  { %1954 = vadd.xlane.f32.xlu0 %v1953_v28  ;;  %v2221_v14 = vsel %vm87_vm0, %v2220_v53, %v2219_v27  ;;  %v2209_v11 = vsel %vm90_vm1, %v2208_v6, %v2207_v43  ;;  %v2224_v24 = vrot.slane %v3733_v47, 2  ;;  %v5096_v28 = vld [vmem:[#allocation87_spill] sm:$0xff]  ;;  %vm5097_vm11 = vcmask 79872  }
 0x152   :  { %v1932_v48 = vsel %vm99_vm4, %v1931_v21, %v1930_v56  ;;  %v2223_v56 = vsel %vm90_vm1, %v2222_v54, %v2221_v14 }
 0x153   :  { %v1950_v22 = vsel %vm17_vm6, %v1932_v48, 0.0  ;;  %v4151_v17 = vpop.eup %2696  ;;  %v2225_v27 = vsel %vm93_vm2, %v2224_v24, %v2223_v56 }
 0x154   :  { %1951 = vadd.xlane.f32.xlu1 %v1950_v22  ;;  %5093 = vst [vmem:[#allocation39_spill] sm:$0xff] %v4151_v17  ;;  %v2210_v35 = vrot.slane %v4151_v17, 2 }
 0x156   :  { %v4154_v21 = vpop.eup %2698  ;;  %v2211_v37 = vsel %vm93_vm2, %v2210_v35, %v2209_v11 }
 0x157   :  { %5094 = vst [vmem:[#allocation18_spill] sm:$0xff] %v4154_v21  ;;  %v4158_v12 = vpop.eup %2700  ;;  %v2212_v46 = vrot.slane %v4154_v21, 1 }
 0x158   :  { %v4164_v48 = vpop.eup %2702  ;;  %v2231_v54 = vsel %vm2093_vm5, %v4158_v12, 0.0 }
 0x159   :  { %v2213_v53 = vsel %vm96_vm3, %v2212_v46, %v2211_v37  ;;  %5095 = vst [vmem:[#allocation62_spill] sm:$0xff] %v4164_v48  ;;  %v2226_v6 = vrot.slane %v4164_v48, 1 }
 0x15a   :  { %v2214_v43 = vsel %vm99_vm4, %v5096_v28, %v2213_v53 }
 0x15b   :  { %v2234_v22 = vsel %vm17_vm6, %v2214_v43, 0.0  ;;  %v2227_v21 = vsel %vm96_vm3, %v2226_v6, %v2225_v27 }
 0x15c   :  { %2235 = vadd.xlane.f32.xlu1 %v2234_v22  ;;  %v2237_v14 = vsel %vm5097_vm11, %v2227_v21, 0.0 }
 0x15d   :  { %2238 = vadd.xlane.f32.xlu0 %v2237_v14 }
 0x160   :  { %2232 = vadd.xlane.f32.xlu1 %v2231_v54 }
 0x19d   :  { %v35_v11 = vpop.xlane.xlu1 %34 }
 0x19e   :  { %v32_v35 = vpop.xlane.xlu0 %31  ;;  %2704 = vrcp.f32 %v35_v11 }
 0x1a1   :  { %v535_v46 = vpop.xlane.xlu1 %534 }
 0x1a2   :  { %2706 = vrcp.f32 %v535_v46  ;;  %v819_v24 = vpop.xlane.xlu0 %818  ;;  %v5098_v46 = vld [vmem:[#allocation81_spill] sm:$0xff] }
 0x1a3   :  { %2708 = vrcp.f32 %v819_v24 }
 0x1a4   :  { %2710 = vrcp.f32 %v32_v35 }
 0x1a5   :  { %v1103_v56 = vpop.xlane.xlu1 %1102 }
 0x1a6   :  { %2712 = vrcp.f32 %v1103_v56  ;;  %v1949_v37 = vpop.xlane.xlu0 %1948 }
 0x1a7   :  { %2714 = vrcp.f32 %v1949_v37  ;;  %v5099_v37 = vld [vmem:[#allocation92_spill] sm:$0xff] }
 0x1a8   :  { %v2705_v27 = vpop.eup %2704 }
 0x1a9   :  { %v1097_v53 = vpop.xlane.xlu1 %1096  ;;  %v4179_v56 = vmul.f32 %v2705_v27, %v3829_v62  ;;  %v5100_v27 = vld [vmem:[#allocation93_spill] sm:$0xff] }
 0x1aa   :  { %2716 = vrcp.f32 %v1097_v53  ;;  %v1665_v43 = vpop.xlane.xlu0 %1664 }
 0x1ac   :  { %v2707_v22 = vpop.eup %2706 }
 0x1ad   :  { %v2709_v21 = vpop.eup %2708  ;;  %v558_v6 = vrot.slane %v2707_v22, 7  ;;  %v1671_v54 = vpop.xlane.xlu1 %1670 }
 0x1ae   :  { %v2711_v14 = vpop.eup %2710  ;;  %v841_v17 = vrot.slane %v2709_v21, 6  ;;  %2718 = vrcp.f32 %v1671_v54  ;;  %v1381_v11 = vpop.xlane.xlu0 %1380  ;;  %v842_v35 = vrot.slane %v2709_v21, 7 }
 0x1af   :  { %v4176_v48 = vmul.f32 %v5098_v46, %v558_v6  ;;  %2720 = vrcp.f32 %v1381_v11  ;;  %v4185_v22 = vmul.f32 %v2711_v14, %v3835_v44 }
 0x1b0   :  { %v2713_v24 = vpop.eup %2712  ;;  %v4182_v53 = vmul.f32 %v5099_v37, %v841_v17  ;;  %2722 = vrcp.f32 %v1665_v43  ;;  %v4190_v17 = vmul.f32 %v5100_v27, %v842_v35  ;;  %v5101_v37 = vld [vmem:[#allocation90_spill] sm:$0xff] }
 0x1b1   :  { %v2715_v0 = vpop.eup %2714  ;;  %v813_v19 = vpop.xlane.xlu1 %812  ;;  %v1124_v54 = vrot.slane %v2713_v24, 5  ;;  %v1125_v58 = vrot.slane %v2713_v24, 6  ;;  %v1126_v11 = vrot.slane %v2713_v24, 7 }
 0x1b2   :  { %v1965_v47 = vrot.slane %v2715_v0, 1  ;;  %v1995_v6 = vmul.f32 %v2715_v0, %v3784_v1  ;;  %2724 = vrcp.f32 %v813_v19  ;;  %v1387_v21 = vpop.xlane.xlu0 %1386 }
 0x1b3   :  { %2726 = vrcp.f32 %v1387_v21  ;;  %v4195_v41 = vmul.f32 %v5101_v37, %v1124_v54  ;;  %v4198_v1 = vmul.f32 %v5102_v18, %v1125_v58  ;;  %v4202_v46 = vmul.f32 %v3678_v3, %v1126_v11  ;;  %v5104_v54 = vld [vmem:[#allocation67_spill] sm:$0xff] }
 0x1b4   :  { %v2717_v44 = vpop.eup %2716  ;;  %v1996_v43 = vmul.f32 %v3790_v63, %v1965_v47  ;;  %v2027_v14 = vrot.slane %v1995_v6, 6  ;;  %v5103_v63 = vld [vmem:[#allocation66_spill] sm:$0xff] }
 0x1b5   :  { %v529_v19 = vpop.xlane.xlu1 %528  ;;  %v1113_v0 = vrot.slane %v2717_v44, 1  ;;  %v1114_v24 = vrot.slane %v2717_v44, 2  ;;  %v1115_v62 = vrot.slane %v2717_v44, 3  ;;  %v1116_v21 = vrot.slane %v2717_v44, 4 }
 0x1b6   :  { %v2028_v45 = vrot.slane %v1996_v43, 5  ;;  %2728 = vrcp.f32 %v529_v19  ;;  %v1143_v27 = vmul.f32 %v2717_v44, %v3542_v25  ;;  %v5107_v43 = vld [vmem:[#allocation68_spill] sm:$0xff] }
 0x1b7   :  { %v254_v35 = vpop.xlane.xlu0 %253  ;;  %v1144_v47 = vmul.f32 %v5103_v63, %v1113_v0  ;;  %v1145_v6 = vmul.f32 %v5104_v54, %v1114_v24  ;;  %v1146_v19 = vmul.f32 %v5107_v43, %v1115_v62  ;;  %v1147_v39 = vmul.f32 %v5108_v26, %v1116_v21 }
 0x1b8   :  { %2730 = vrcp.f32 %v254_v35  ;;  %v4207_v58 = vpop.eup %2718  ;;  %v4210_v37 = vsel %vm81_vm7, %v2028_v45, %v2027_v14  ;;  %v1175_v44 = vrot.slane %v1143_v27, 3 }
 0x1b9   :  { %5105 = vst [vmem:[#allocation31_spill] sm:$0xff] %v4207_v58  ;;  %5106 = vst [vmem:[#allocation41_spill] sm:$0xff] %v4210_v37  ;;  %v2721_v3 = vpop.eup %2720  ;;  %v1176_v35 = vrot.slane %v1144_v47, 2  ;;  %v1178_v0 = vrot.slane %v1145_v6, 1  ;;  %v1181_v26 = vrot.slane %v1147_v39, 7 }
 0x1ba   :  { %v1397_v63 = vrot.slane %v2721_v3, 1  ;;  %v4218_v14 = vpop.eup %2722  ;;  %v1398_v21 = vrot.slane %v2721_v3, 2  ;;  %v1399_v43 = vrot.slane %v2721_v3, 3  ;;  %v4223_v47 = vmul.f32 %v2721_v3, %v3608_v55  ;;  %v5111_v3 = vld [vmem:[#allocation11_spill] sm:$0xff] }
 0x1bb   :  { %5109 = vst [vmem:[#allocation88_spill] sm:$0xff] %v4218_v14  ;;  %v1177_v62 = vsel %vm81_vm7, %v1176_v35, %v1175_v44 }
 0x1bc   :  { %v251_v11 = vpop.xlane.xlu1 %250  ;;  %v2725_v25 = vpop.eup %2724  ;;  %v1179_v27 = vsel %vm84_vm8, %v1178_v0, %v1177_v62  ;;  %v4226_v6 = vmul.f32 %v3610_v40, %v1397_v63  ;;  %v5110_v62 = vld [vmem:[#allocation9_spill] sm:$0xff]  ;;  %v5112_v40 = vld [vmem:[#allocation78_spill] sm:$0xff] }
 0x1bd   :  { %2732 = vrcp.f32 %v251_v11  ;;  %v4229_v45 = vpop.eup %2726  ;;  %v829_v54 = vrot.slane %v2725_v25, 1  ;;  %v830_v44 = vrot.slane %v2725_v25, 2  ;;  %v831_v39 = vrot.slane %v2725_v25, 3 }
 0x1be   :  { %v832_v35 = vrot.slane %v2725_v25, 4  ;;  %v833_v24 = vrot.slane %v2725_v25, 5  ;;  %v859_v28 = vmul.f32 %v2725_v25, %v3290_v38  ;;  %v1180_v0 = vsel %vm87_vm0, %v1146_v19, %v1179_v27 }
 0x1bf   :  { %v860_v55 = vmul.f32 %v5110_v62, %v829_v54  ;;  %v862_v37 = vmul.f32 %v5111_v3, %v831_v39  ;;  %v4236_v63 = vmul.f32 %v5112_v40, %v1398_v21  ;;  %v4247_v38 = vsel %vm90_vm1, %v1181_v26, %v1180_v0  ;;  %v5114_v21 = vld [vmem:[#allocation80_spill] sm:$0xff] }
 0x1c0   :  { %v532_v18 = vpop.xlane.xlu0 %531  ;;  %v4239_v10 = vpop.eup %2728  ;;  %v863_v51 = vmul.f32 %v3307_v20, %v832_v35  ;;  %v4244_v30 = vmul.f32 %v3314_v32, %v833_v24  ;;  %v891_v25 = vrot.slane %v859_v28, 2  ;;  %v4250_v39 = vmul.f32 %v5114_v21, %v1399_v43 }
 0x1c1   :  { %2734 = vrcp.f32 %v532_v18  ;;  %v5113_v18 = vld [vmem:[#allocation10_spill] sm:$0xff]  ;;  %v892_v54 = vrot.slane %v860_v55, 1  ;;  %v895_v27 = vrot.slane %v862_v37, 7 }
 0x1c2   :  { %v861_v33 = vmul.f32 %v5113_v18, %v830_v44  ;;  %v2731_v19 = vpop.eup %2730  ;;  %v897_v37 = vrot.slane %v863_v51, 6  ;;  %v899_v18 = vrot.slane %v4244_v30, 5 }
 0x1c3   :  { %v268_v62 = vrot.slane %v2731_v19, 1  ;;  %v269_v3 = vrot.slane %v2731_v19, 2  ;;  %v893_v32 = vsel %vm81_vm7, %v892_v54, %v891_v25  ;;  %v270_v24 = vrot.slane %v2731_v19, 3 }
 0x1c4   :  { %v271_v35 = vrot.slane %v2731_v19, 4  ;;  %v272_v26 = vrot.slane %v2731_v19, 5  ;;  %v894_v28 = vsel %vm84_vm8, %v861_v33, %v893_v32  ;;  %v273_v43 = vrot.slane %v2731_v19, 6 }
 0x1c5   :  { %v896_v55 = vsel %vm87_vm0, %v895_v27, %v894_v28  ;;  %v274_v21 = vrot.slane %v2731_v19, 7  ;;  %v300_v11 = vmul.f32 %v4997_v9, %v268_v62  ;;  %v299_v25 = vmul.f32 %v2731_v19, %v5000_v2 }
 0x1c6   :  { %v898_v44 = vsel %vm90_vm1, %v897_v37, %v896_v55  ;;  %v301_v54 = vmul.f32 %v4998_v31, %v269_v3  ;;  %v302_v40 = vmul.f32 %v5001_v5, %v270_v24  ;;  %v303_v33 = vmul.f32 %v5009_v7, %v271_v35  ;;  %v5117_v3 = vld [vmem:[#allocation38_spill] sm:$0xff]  ;;  %v5118_v35 = vld [vmem:[#allocation40_spill] sm:$0xff]  ;;  %v5119_v37 = vld [vmem:[#allocation69_spill] sm:$0xff] }
 0x1c7   :  { %v1384_v20 = vpop.xlane.xlu1 %1383  ;;  %v4255_v0 = vpop.eup %2732  ;;  %v304_v51 = vmul.f32 %v3919_v42, %v272_v26  ;;  %v305_v27 = vmul.f32 %v3926_v60, %v273_v43  ;;  %v337_v30 = vrot.slane %v300_v11, 7  ;;  %v5116_v60 = vld [vmem:[#allocation37_spill] sm:$0xff]  ;;  %v5120_v55 = vld [vmem:[#allocation12_spill] sm:$0xff] }
 0x1c8   :  { %5115 = vst [vmem:[#allocation32_spill] sm:$0xff] %v4255_v0  ;;  %2736 = vrcp.f32 %v1384_v20 }
 0x1c9   :  { %v338_v42 = vsel %vm81_vm7, %v337_v30, %v299_v25  ;;  %v339_v25 = vrot.slane %v301_v54, 6 }
 0x1cb   :  { %v4265_v20 = vpop.eup %2734 }
 0x1cc   :  { %v552_v32 = vrot.slane %v4265_v20, 1  ;;  %v553_v9 = vrot.slane %v4265_v20, 2  ;;  %v554_v62 = vrot.slane %v4265_v20, 3  ;;  %v555_v2 = vrot.slane %v4265_v20, 4 }
 0x1cd   :  { %v556_v31 = vrot.slane %v4265_v20, 5  ;;  %v557_v5 = vrot.slane %v4265_v20, 6  ;;  %v583_v7 = vmul.f32 %v4265_v20, %v5021_v61  ;;  %v5121_v61 = vld [vmem:[#allocation30_spill] sm:$0xff] }
 0x1ce   :  { %v816_v19 = vpop.xlane.xlu0 %815  ;;  %v584_v11 = vmul.f32 %v5116_v60, %v552_v32  ;;  %v585_v24 = vmul.f32 %v5117_v3, %v553_v9  ;;  %v586_v26 = vmul.f32 %v5118_v35, %v554_v62  ;;  %v587_v28 = vmul.f32 %v3967_v23, %v555_v2 }
 0x1cf   :  { %2738 = vrcp.f32 %v816_v19  ;;  %v588_v43 = vmul.f32 %v5119_v37, %v556_v31  ;;  %v589_v15 = vmul.f32 %v5120_v55, %v557_v5  ;;  %v621_v36 = vrot.slane %v583_v7, 1  ;;  %v5123_v37 = vld [vmem:[#allocation49_spill] sm:$0xff] }
 0x1d0   :  { %v623_v14 = vrot.slane %v585_v24, 7  ;;  %v625_v58 = vrot.slane %v586_v26, 6  ;;  %v306_v0 = vmul.f32 %v5121_v61, %v274_v21  ;;  %v627_v32 = vrot.slane %v587_v28, 5 }
 0x1d1   :  { %v622_v30 = vsel %vm81_vm7, %v584_v11, %v621_v36  ;;  %v629_v60 = vrot.slane %v588_v43, 4  ;;  %v341_v9 = vrot.slane %v302_v40, 5  ;;  %v631_v62 = vrot.slane %v589_v15, 3 }
 0x1d2   :  { %v4287_v3 = vpop.eup %2736  ;;  %v624_v23 = vsel %vm84_vm8, %v623_v14, %v622_v30  ;;  %v340_v2 = vsel %vm84_vm8, %v339_v25, %v338_v42  ;;  %v343_v31 = vrot.slane %v303_v33, 4  ;;  %v345_v19 = vrot.slane %v304_v51, 3  ;;  %v5125_v25 = vld [vmem:[#allocation50_spill] sm:$0xff] }
 0x1d3   :  { %v626_v5 = vsel %vm87_vm0, %v625_v58, %v624_v23  ;;  %v342_v7 = vsel %vm87_vm0, %v341_v9, %v340_v2  ;;  %v347_v21 = vrot.slane %v305_v27, 2  ;;  %v349_v40 = vrot.slane %v306_v0, 1 }
 0x1d4   :  { %v1668_v54 = vpop.xlane.xlu1 %1667  ;;  %v628_v36 = vsel %vm90_vm1, %v627_v32, %v626_v5  ;;  %v344_v11 = vsel %vm90_vm1, %v343_v31, %v342_v7  ;;  %v1400_v24 = vrot.slane %v4287_v3, 4  ;;  %v1401_v33 = vrot.slane %v4287_v3, 5 }
 0x1d5   :  { %v630_v14 = vsel %vm93_vm2, %v629_v60, %v628_v36  ;;  %v346_v15 = vsel %vm93_vm2, %v345_v19, %v344_v11  ;;  %v1402_v58 = vrot.slane %v4287_v3, 6  ;;  %v900_v51 = vsel %vm93_vm2, %v899_v18, %v898_v44  ;;  %v5124_v18 = vld [vmem:[#allocation47_spill] sm:$0xff] }
 0x1d6   :  { %v632_v42 = vsel %vm96_vm3, %v631_v62, %v630_v14  ;;  %v348_v27 = vsel %vm96_vm3, %v347_v21, %v346_v15  ;;  %v1403_v35 = vrot.slane %v4287_v3, 7  ;;  %2740 = vrcp.f32 %v1668_v54  ;;  %v5126_v60 = vld [vmem:[#allocation51_spill] sm:$0xff]  ;;  %v5129_v14 = vld [vmem:[#allocation42_spill] sm:$0xff] }
 0x1d7   :  { %v5122_v0 = vrot.slane %v4176_v48, 2  ;;  %v4310_v28 = vsel %vm99_vm4, %v349_v40, %v348_v27  ;;  %v1432_v43 = vmul.f32 %v5123_v37, %v1401_v33  ;;  %v1431_v61 = vmul.f32 %v5124_v18, %v1400_v24  ;;  %v5130_v15 = vld [vmem:[#allocation43_spill] sm:$0xff] }
 0x1d8   :  { %v354_v44 = vsub.f32 %v4179_v56, %v4310_v28  ;;  %v4319_v30 = vmul.f32 %v5125_v25, %v1402_v58  ;;  %v4322_v9 = vmul.f32 %v5126_v60, %v1403_v35  ;;  %v5127_v23 = vrot.slane %v4223_v47, 4  ;;  %v5132_v35 = vld [vmem:[#allocation45_spill] sm:$0xff] }
 0x1d9   :  { %v4307_v26 = vsel %vm99_vm4, %v5122_v0, %v632_v42  ;;  %v2739_v48 = vpop.eup %2738  ;;  %v5128_v62 = vrot.slane %v4226_v6, 3  ;;  %v1462_v31 = vrot.slane %v4236_v63, 2  ;;  %v1464_v5 = vrot.slane %v4250_v39, 1  ;;  %v5131_v39 = vld [vmem:[#allocation44_spill] sm:$0xff] }
 0x1da   :  { %v638_v55 = vsub.f32 %v4179_v56, %v4307_v26  ;;  %v1100_v32 = vpop.xlane.xlu0 %1099  ;;  %v834_v19 = vrot.slane %v2739_v48, 6  ;;  %v835_v21 = vrot.slane %v2739_v48, 7  ;;  %v356_v54 = vmul.f32 %v354_v44, %v354_v44 }
 0x1db   :  { %v1461_v2 = vsel %vm81_vm7, %v5128_v62, %v5127_v23  ;;  %2742 = vrcp.f32 %v1100_v32  ;;  %v836_v36 = vrot.slane %v2739_v48, 1  ;;  %v838_v11 = vrot.slane %v2739_v48, 3 }
 0x1dc   :  { %v640_v7 = vmul.f32 %v638_v55, %v638_v55  ;;  %v1467_v40 = vrot.slane %v1432_v43, 7  ;;  %v865_v47 = vmul.f32 %v5129_v14, %v834_v19  ;;  %v866_v6 = vmul.f32 %v5130_v15, %v835_v21 }
 0x1dd   :  { %v839_v33 = vrot.slane %v2739_v48, 4  ;;  %v837_v63 = vrot.slane %v2739_v48, 2  ;;  %v840_v42 = vrot.slane %v2739_v48, 5  ;;  %v867_v27 = vmul.f32 %v2739_v48, %v5131_v39 }
 0x1de   :  { %v644_v24 = vsel %vm17_vm6, %v640_v7, 0.0  ;;  %v1955_v58 = vpop.xlane.xlu0 %1954  ;;  %v868_v0 = vmul.f32 %v5132_v35, %v836_v36  ;;  %v901_v55 = vrot.slane %v865_v47, 4  ;;  %v903_v44 = vrot.slane %v866_v6, 3 }
 0x1df   :  { %645 = vadd.xlane.f32.xlu1 %v644_v24  ;;  %v360_v43 = vsel %vm17_vm6, %v356_v54, 0.0  ;;  %v1469_v18 = vrot.slane %v4319_v30, 6  ;;  %2744 = vrcp.f32 %v1955_v58  ;;  %v870_v25 = vmul.f32 %v4041_v13, %v838_v11  ;;  %v5133_v30 = vld [vmem:[#allocation46_spill] sm:$0xff] }
 0x1e0   :  { %v871_v32 = vmul.f32 %v4045_v4, %v839_v33  ;;  %v872_v60 = vmul.f32 %v4050_v16, %v840_v42  ;;  %v902_v23 = vsel %vm96_vm3, %v901_v55, %v900_v51  ;;  %v905_v62 = vrot.slane %v867_v27, 2  ;;  %v4343_v19 = vpop.eup %2740 }
 0x1e1   :  { %v1952_v37 = vpop.xlane.xlu1 %1951  ;;  %v906_v48 = vrot.slane %v868_v0, 1  ;;  %v1463_v7 = vsel %vm84_vm8, %v1462_v31, %v1461_v2  ;;  %v4346_v21 = vsel %vm99_vm4, %v903_v44, %v902_v23  ;;  %v869_v54 = vmul.f32 %v5133_v30, %v837_v63 }
 0x1e2   :  { %2746 = vrcp.f32 %v1952_v37  ;;  %v909_v13 = vrot.slane %v870_v25, 7  ;;  %v921_v4 = vsub.f32 %v4185_v22, %v4346_v21  ;;  %v911_v51 = vrot.slane %v871_v32, 6  ;;  %v5134_v37 = vld [vmem:[#allocation56_spill] sm:$0xff] }
 0x1e3   :  { %361 = vadd.xlane.f32.xlu1 %v360_v43  ;;  %v907_v16 = vsel %vm81_vm7, %v906_v48, %v905_v62  ;;  %v1465_v36 = vsel %vm87_vm0, %v1464_v5, %v1463_v7  ;;  %v913_v31 = vrot.slane %v872_v60, 5  ;;  %v1471_v24 = vrot.slane %v4322_v9, 5 }
 0x1e4   :  { %v908_v2 = vsel %vm84_vm8, %v869_v54, %v907_v16  ;;  %v1466_v11 = vsel %vm90_vm1, %v1431_v61, %v1465_v36  ;;  %v923_v47 = vmul.f32 %v921_v4, %v921_v4  ;;  %v545_v33 = vrot.slane %v4239_v10, 1 }
 0x1e5   :  { %v2743_v14 = vpop.eup %2742  ;;  %v910_v15 = vsel %vm87_vm0, %v909_v13, %v908_v2  ;;  %v1468_v6 = vsel %vm93_vm2, %v1467_v40, %v1466_v11  ;;  %v5135_v44 = vrot.slane %v4182_v53, 4  ;;  %v546_v60 = vrot.slane %v4239_v10, 2 }
 0x1e6   :  { %v1117_v58 = vrot.slane %v2743_v14, 5  ;;  %v1118_v63 = vrot.slane %v2743_v14, 6  ;;  %v1119_v42 = vrot.slane %v2743_v14, 7  ;;  %v912_v5 = vsel %vm90_vm1, %v911_v51, %v910_v15 }
 0x1e7   :  { %v925_v27 = vsel %vm17_vm6, %v923_v47, 0.0  ;;  %v914_v61 = vsel %vm93_vm2, %v913_v31, %v912_v5  ;;  %v1470_v9 = vsel %vm96_vm3, %v1469_v18, %v1468_v6  ;;  %v1120_v35 = vrot.slane %v2743_v14, 1 }
 0x1e8   :  { %926 = vadd.xlane.f32.xlu0 %v925_v27  ;;  %v1148_v0 = vmul.f32 %v5067_v8, %v1117_v58  ;;  %v1149_v40 = vmul.f32 %v5068_v59, %v1118_v63  ;;  %v1150_v55 = vmul.f32 %v5134_v37, %v1119_v42  ;;  %v916_v43 = vsel %vm96_vm3, %v5135_v44, %v914_v61  ;;  %v5139_v37 = vld [vmem:[#allocation22_spill] sm:$0xff] }
 0x1e9   :  { %v2236_v39 = vpop.xlane.xlu1 %2235  ;;  %v4370_v25 = vsel %vm99_vm4, %v1471_v24, %v1470_v9  ;;  %v1121_v32 = vrot.slane %v2743_v14, 2  ;;  %v4373_v18 = vpop.eup %2744  ;;  %v5136_v8 = vrot.slane %v4190_v17, 3  ;;  %v1122_v48 = vrot.slane %v2743_v14, 3  ;;  %v5137_v9 = vld [vmem:[#allocation20_spill] sm:$0xff] }
 0x1ea   :  { %2748 = vrcp.f32 %v2236_v39  ;;  %v1183_v23 = vrot.slane %v1148_v0, 6  ;;  %v1185_v62 = vrot.slane %v1149_v40, 5  ;;  %v1489_v30 = vsub.f32 %v4185_v22, %v4370_v25  ;;  %v5138_v0 = vld [vmem:[#allocation21_spill] sm:$0xff]  ;;  %v2239_v44 = vpop.xlane.xlu0 %2238 }
 0x1eb   :  { %v4378_v59 = vsel %vm99_vm4, %v5136_v8, %v916_v43  ;;  %v1123_v54 = vrot.slane %v2743_v14, 4  ;;  %v547_v13 = vrot.slane %v4239_v10, 3  ;;  %v1187_v17 = vrot.slane %v1150_v55, 4 }
 0x1ec   :  { %v922_v53 = vsub.f32 %v4179_v56, %v4378_v59  ;;  %v4385_v4 = vpop.eup %2746  ;;  %v1184_v16 = vsel %vm93_vm2, %v1183_v23, %v4247_v38  ;;  %v1151_v51 = vmul.f32 %v2743_v14, %v5075_v57  ;;  %v1152_v36 = vmul.f32 %v5081_v49, %v1120_v35 }
 0x1ed   :  { %v2233_v7 = vpop.xlane.xlu1 %2232  ;;  %v1186_v2 = vsel %vm96_vm3, %v1185_v62, %v1184_v16  ;;  %v1153_v11 = vmul.f32 %v4095_v34, %v1121_v32  ;;  %v1491_v47 = vmul.f32 %v1489_v30, %v1489_v30  ;;  %v1154_v15 = vmul.f32 %v4103_v52, %v1122_v48  ;;  %v5140_v62 = vld [vmem:[#allocation23_spill] sm:$0xff]  ;;  %v5141_v48 = vld [vmem:[#allocation25_spill] sm:$0xff] }
 0x1ee   :  { %2750 = vrcp.f32 %v2233_v7  ;;  %v924_v31 = vmul.f32 %v922_v53, %v922_v53  ;;  %v4394_v24 = vsel %vm99_vm4, %v1187_v17, %v1186_v2  ;;  %v1155_v6 = vmul.f32 %v4109_v50, %v1123_v54  ;;  %v5142_v53 = vld [vmem:[#allocation26_spill] sm:$0xff]  ;;  %v5143_v30 = vld [vmem:[#allocation29_spill] sm:$0xff]  ;;  %v5145_v17 = vld [vmem:[#allocation35_spill] sm:$0xff] }
 0x1ef   :  { %v1205_v38 = vsub.f32 %v4185_v22, %v4394_v24  ;;  %v1189_v49 = vrot.slane %v1151_v51, 3  ;;  %v1190_v14 = vrot.slane %v1152_v36, 2  ;;  %v1192_v58 = vrot.slane %v1153_v11, 1 }
 0x1f0   :  { %v928_v57 = vsel %vm17_vm6, %v924_v31, 0.0  ;;  %v1195_v63 = vrot.slane %v1155_v6, 7  ;;  %v548_v34 = vrot.slane %v4239_v10, 4  ;;  %v549_v42 = vrot.slane %v4239_v10, 5 }
 0x1f1   :  { %929 = vadd.xlane.f32.xlu1 %v928_v57  ;;  %v1207_v5 = vmul.f32 %v1205_v38, %v1205_v38  ;;  %v1191_v39 = vsel %vm81_vm7, %v1190_v14, %v1189_v49  ;;  %v550_v52 = vrot.slane %v4239_v10, 6  ;;  %v551_v50 = vrot.slane %v4265_v20, 7 }
 0x1f2   :  { %v1193_v61 = vsel %vm84_vm8, %v1192_v58, %v1191_v39  ;;  %v575_v35 = vmul.f32 %v4239_v10, %v5137_v9  ;;  %v576_v40 = vmul.f32 %v5138_v0, %v545_v33  ;;  %v577_v55 = vmul.f32 %v5139_v37, %v546_v60 }
 0x1f3   :  { %v1209_v32 = vsel %vm17_vm6, %v1207_v5, 0.0  ;;  %v1194_v23 = vsel %vm87_vm0, %v1154_v15, %v1193_v61  ;;  %v578_v20 = vmul.f32 %v5140_v62, %v547_v13  ;;  %v579_v7 = vmul.f32 %v5141_v48, %v548_v34  ;;  %v5150_v62 = vld [vmem:[#allocation13_spill] sm:$0xff]  ;;  %v5151_v48 = vld [vmem:[#allocation24_spill] sm:$0xff] }
 0x1f4   :  { %v4406_v27 = vpop.eup %2748  ;;  %1210 = vadd.xlane.f32.xlu0 %v1209_v32  ;;  %v1196_v8 = vsel %vm90_vm1, %v1195_v63, %v1194_v23  ;;  %v580_v10 = vmul.f32 %v5142_v53, %v549_v42  ;;  %v581_v33 = vmul.f32 %v5143_v30, %v550_v52  ;;  %v5144_v54 = vrot.slane %v4195_v41, 6  ;;  %v5149_v32 = vld [vmem:[#allocation34_spill] sm:$0xff]  ;;  %v5153_v30 = vld [vmem:[#allocation115_spill] sm:$0xff] }
 0x1f5   :  { %v2249_v43 = vrot.slane %v4406_v27, 1  ;;  %v582_v51 = vmul.f32 %v5145_v17, %v551_v50  ;;  %v607_v36 = vrot.slane %v575_v35, 1  ;;  %2752 = vrcp.f32 %v2239_v44  ;;  %v5152_v53 = vld [vmem:[#allocation114_spill] sm:$0xff] }
 0x1f6   :  { %v1198_v16 = vsel %vm93_vm2, %v5144_v54, %v1196_v8  ;;  %v5146_v13 = vrot.slane %v4198_v1, 5  ;;  %v609_v31 = vrot.slane %v577_v55, 7  ;;  %v611_v11 = vrot.slane %v578_v20, 6 }
 0x1f7   :  { %v4422_v60 = vmul.f32 %v5085_v29, %v2249_v43  ;;  %v1493_v6 = vsel %vm17_vm6, %v1491_v47, 0.0  ;;  %v5147_v29 = vrot.slane %v4202_v46, 4  ;;  %v608_v41 = vsel %vm81_vm7, %v576_v40, %v607_v36 }
 0x1f8   :  { %v1200_v2 = vsel %vm96_vm3, %v5146_v13, %v1198_v16  ;;  %v2751_v15 = vpop.eup %2750  ;;  %v613_v57 = vrot.slane %v579_v7, 5  ;;  %1494 = vadd.xlane.f32.xlu0 %v1493_v6  ;;  %v610_v14 = vsel %vm84_vm8, %v609_v31, %v608_v41  ;;  %v615_v58 = vrot.slane %v580_v10, 4  ;;  %v5155_v16 = vld [vmem:[#allocation117_spill] sm:$0xff]  ;;  %v5156_v41 = vld [vmem:[#allocation32_spill] sm:$0xff] }
 0x1f9   :  { %v4435_v38 = vsel %vm99_vm4, %v5147_v29, %v1200_v2  ;;  %v2312_v49 = vrot.slane %v4422_v60, 6  ;;  %v612_v63 = vsel %vm87_vm0, %v611_v11, %v610_v14  ;;  %v617_v47 = vrot.slane %v581_v33, 3  ;;  %v5154_v33 = vld [vmem:[#allocation116_spill] sm:$0xff] }
 0x1fa   :  { %v1206_v1 = vsub.f32 %v4179_v56, %v4435_v38  ;;  %v619_v34 = vrot.slane %v582_v51, 2  ;;  %v1404_v46 = vrot.slane %v4287_v3, 1  ;;  %v614_v5 = vsel %vm90_vm1, %v613_v57, %v612_v63 }
 0x1fb   :  { %v1405_v39 = vrot.slane %v4287_v3, 2  ;;  %v1406_v52 = vrot.slane %v4287_v3, 3  ;;  %v4448_v50 = vmul.f32 %v2751_v15, %v4158_v12  ;;  %v616_v61 = vsel %vm93_vm2, %v615_v58, %v614_v5  ;;  %v5148_v12 = vld [vmem:[#allocation52_spill] sm:$0xff] }
 0x1fc   :  { %v1208_v42 = vmul.f32 %v1206_v1, %v1206_v1  ;;  %v1407_v9 = vrot.slane %v4229_v45, 4  ;;  %v1408_v35 = vrot.slane %v4229_v45, 5  ;;  %v618_v40 = vsel %vm96_vm3, %v617_v47, %v616_v61 }
 0x1fd   :  { %v1409_v37 = vrot.slane %v4229_v45, 6  ;;  %v1410_v55 = vrot.slane %v4229_v45, 7  ;;  %v4458_v44 = vsel %vm99_vm4, %v619_v34, %v618_v40  ;;  %v1435_v43 = vmul.f32 %v4287_v3, %v5148_v12  ;;  %v5159_v40 = vld [vmem:[#allocation16_spill] sm:$0xff] }
 0x1fe   :  { %v1212_v0 = vsel %vm17_vm6, %v1208_v42, 0.0  ;;  %v1436_v23 = vmul.f32 %v5149_v32, %v1404_v46  ;;  %v1437_v20 = vmul.f32 %v5150_v62, %v1405_v39  ;;  %v637_v8 = vsub.f32 %v4185_v22, %v4458_v44  ;;  %v5162_v62 = vld [vmem:[#allocation27_spill] sm:$0xff] }
 0x1ff   :  { %1213 = vadd.xlane.f32.xlu1 %v1212_v0  ;;  %v1438_v7 = vmul.f32 %v5151_v48, %v1406_v52  ;;  %v1439_v10 = vmul.f32 %v5152_v53, %v1407_v9  ;;  %v1440_v45 = vmul.f32 %v5153_v30, %v1408_v35  ;;  %v1441_v54 = vmul.f32 %v5154_v33, %v1409_v37  ;;  %v4471_v3 = vpop.eup %2752  ;;  %v5157_v52 = vld [vmem:[#allocation14_spill] sm:$0xff]  ;;  %v5158_v9 = vld [vmem:[#allocation15_spill] sm:$0xff] }
 0x200   :  { %v1442_v17 = vmul.f32 %v5155_v16, %v1410_v55  ;;  %v1473_v51 = vrot.slane %v1435_v43, 4  ;;  %v1474_v36 = vrot.slane %v1436_v23, 3  ;;  %v639_v13 = vmul.f32 %v637_v8, %v637_v8  ;;  %v5160_v55 = vld [vmem:[#allocation17_spill] sm:$0xff]  ;;  %v5161_v43 = vld [vmem:[#allocation19_spill] sm:$0xff] }
 0x201   :  { %v1476_v2 = vrot.slane %v1437_v20, 2  ;;  %v1478_v31 = vrot.slane %v1438_v7, 1  ;;  %v1481_v11 = vrot.slane %v1440_v45, 7  ;;  %v1483_v6 = vrot.slane %v1441_v54, 6  ;;  %v5163_v8 = vld [vmem:[#allocation33_spill] sm:$0xff]  ;;  %v5164_v7 = vld [vmem:[#allocation8_spill] sm:$0xff] }
 0x202   :  { %v1475_v15 = vsel %vm81_vm7, %v1474_v36, %v1473_v51  ;;  %v1485_v29 = vrot.slane %v1442_v17, 5  ;;  %v261_v57 = vrot.slane %v5156_v41, 1  ;;  %v641_v1 = vsel %vm17_vm6, %v639_v13, 0.0 }
 0x203   :  { %v1477_v14 = vsel %vm84_vm8, %v1476_v2, %v1475_v15  ;;  %v262_v58 = vrot.slane %v5156_v41, 2  ;;  %v263_v63 = vrot.slane %v5156_v41, 3  ;;  %642 = vadd.xlane.f32.xlu0 %v641_v1  ;;  %v264_v34 = vrot.slane %v5156_v41, 4  ;;  %v5166_v1 = vld [vmem:[#allocation65_spill] sm:$0xff] }
 0x204   :  { %v1479_v47 = vsel %vm87_vm0, %v1478_v31, %v1477_v14  ;;  %v265_v46 = vrot.slane %v5156_v41, 5  ;;  %v266_v42 = vrot.slane %v5156_v41, 6  ;;  %v267_v39 = vrot.slane %v5156_v41, 7 }
 0x205   :  { %v1480_v5 = vsel %vm90_vm1, %v1439_v10, %v1479_v47  ;;  %v291_v61 = vmul.f32 %v5156_v41, %v5157_v52  ;;  %v292_v35 = vmul.f32 %v5158_v9, %v261_v57  ;;  %v293_v37 = vmul.f32 %v5159_v40, %v262_v58  ;;  %v5167_v58 = vld [vmem:[#allocation36_spill] sm:$0xff]  ;;  %v5172_v9 = vld [vmem:[#allocation95_spill] sm:$0xff] }
 0x206   :  { %v1482_v0 = vsel %vm93_vm2, %v1481_v11, %v1480_v5  ;;  %v294_v12 = vmul.f32 %v5160_v55, %v263_v63  ;;  %v295_v32 = vmul.f32 %v5161_v43, %v264_v34  ;;  %v296_v20 = vmul.f32 %v5162_v62, %v265_v46  ;;  %v5168_v47 = vld [vmem:[#allocation28_spill] sm:$0xff] }
 0x207   :  { %v1484_v23 = vsel %vm96_vm3, %v1483_v6, %v1482_v0  ;;  %v297_v48 = vmul.f32 %v5163_v8, %v266_v42  ;;  %v298_v53 = vmul.f32 %v5164_v7, %v267_v39  ;;  %v323_v30 = vrot.slane %v292_v35, 7  ;;  %v5165_v6 = vld [vmem:[#allocation31_spill] sm:$0xff]  ;;  %v5170_v39 = vld [vmem:[#allocation94_spill] sm:$0xff] }
 0x208   :  { %v4497_v10 = vsel %vm99_vm4, %v1485_v29, %v1484_v23  ;;  %v325_v45 = vrot.slane %v293_v37, 6  ;;  %v327_v33 = vrot.slane %v294_v12, 5  ;;  %v329_v16 = vrot.slane %v295_v32, 4  ;;  %v5174_v37 = vld [vmem:[#allocation96_spill] sm:$0xff]  ;;  %v5175_v12 = vld [vmem:[#allocation97_spill] sm:$0xff]  ;;  %v5176_v32 = vld [vmem:[#allocation98_spill] sm:$0xff] }
 0x209   :  { %v1490_v54 = vsub.f32 %v4179_v56, %v4497_v10  ;;  %v331_v17 = vrot.slane %v296_v20, 3  ;;  %v333_v51 = vrot.slane %v297_v48, 2  ;;  %v324_v36 = vsel %vm81_vm7, %v323_v30, %v291_v61 }
 0x20a   :  { %v335_v13 = vrot.slane %v298_v53, 1  ;;  %v1688_v2 = vrot.slane %v4343_v19, 1  ;;  %v1689_v31 = vrot.slane %v4343_v19, 2  ;;  %v326_v15 = vsel %vm84_vm8, %v325_v45, %v324_v36 }
 0x20b   :  { %v1492_v11 = vmul.f32 %v1490_v54, %v1490_v54  ;;  %v1693_v29 = vrot.slane %v5165_v6, 6  ;;  %v1694_v41 = vrot.slane %v5165_v6, 7  ;;  %v328_v57 = vsel %vm87_vm0, %v327_v33, %v326_v15 }
 0x20c   :  { %v1719_v14 = vmul.f32 %v4343_v19, %v5166_v1  ;;  %v1720_v63 = vmul.f32 %v5167_v58, %v1688_v2  ;;  %v1721_v34 = vmul.f32 %v5168_v47, %v1689_v31  ;;  %v330_v42 = vsel %vm90_vm1, %v329_v16, %v328_v57  ;;  %v5178_v1 = vld [vmem:[#allocation99_spill] sm:$0xff]  ;;  %v5179_v58 = vld [vmem:[#allocation100_spill] sm:$0xff] }
 0x20d   :  { %v1496_v46 = vsel %vm17_vm6, %v1492_v11, 0.0  ;;  %v5169_v5 = vrot.slane %v5165_v6, 3  ;;  %v5171_v61 = vrot.slane %v5165_v6, 4  ;;  %v332_v0 = vsel %vm93_vm2, %v331_v17, %v330_v42  ;;  %v5177_v17 = vld [vmem:[#allocation88_spill] sm:$0xff] }
 0x20e   :  { %1497 = vadd.xlane.f32.xlu1 %v1496_v46  ;;  %v5173_v40 = vrot.slane %v5165_v6, 5  ;;  %v1725_v43 = vmul.f32 %v5175_v12, %v1693_v29  ;;  %v1726_v23 = vmul.f32 %v5176_v32, %v1694_v41  ;;  %v334_v62 = vsel %vm96_vm3, %v333_v51, %v332_v0  ;;  %v5180_v46 = vld [vmem:[#allocation101_spill] sm:$0xff]  ;;  %v5184_v0 = vld [vmem:[#allocation63_spill] sm:$0xff]  ;;  %v5185_v12 = vld [vmem:[#allocation64_spill] sm:$0xff] }
 0x20f   :  { %v1722_v52 = vmul.f32 %v5170_v39, %v5169_v5  ;;  %v1723_v35 = vmul.f32 %v5172_v9, %v5171_v61  ;;  %v1757_v20 = vrot.slane %v1719_v14, 5  ;;  %v1758_v8 = vrot.slane %v1720_v63, 4  ;;  %v5181_v5 = vld [vmem:[#allocation59_spill] sm:$0xff]  ;;  %v5182_v61 = vld [vmem:[#allocation60_spill] sm:$0xff] }
 0x210   :  { %v1724_v55 = vmul.f32 %v5174_v37, %v5173_v40  ;;  %v1760_v48 = vrot.slane %v1721_v34, 3  ;;  %v4528_v7 = vsel %vm99_vm4, %v335_v13, %v334_v62  ;;  %v1767_v45 = vrot.slane %v1725_v43, 7 }
 0x211   :  { %v1762_v53 = vrot.slane %v1722_v52, 2  ;;  %v1764_v30 = vrot.slane %v1723_v35, 1  ;;  %v353_v33 = vsub.f32 %v4185_v22, %v4528_v7  ;;  %v1759_v54 = vsel %vm81_vm7, %v1758_v8, %v1757_v20  ;;  %v5183_v35 = vld [vmem:[#allocation61_spill] sm:$0xff] }
 0x212   :  { %v1769_v16 = vrot.slane %v1726_v23, 6  ;;  %v1681_v36 = vrot.slane %v5177_v17, 1  ;;  %v1761_v2 = vsel %vm84_vm8, %v1760_v48, %v1759_v54  ;;  %v1682_v51 = vrot.slane %v5177_v17, 2 }
 0x213   :  { %v1683_v31 = vrot.slane %v4343_v19, 3  ;;  %v1684_v13 = vrot.slane %v4343_v19, 4  ;;  %v355_v11 = vmul.f32 %v353_v33, %v353_v33  ;;  %v1763_v15 = vsel %vm87_vm0, %v1762_v53, %v1761_v2 }
 0x214   :  { %v1685_v6 = vrot.slane %v4343_v19, 5  ;;  %v1686_v29 = vrot.slane %v4343_v19, 6  ;;  %v1765_v41 = vsel %vm90_vm1, %v1764_v30, %v1763_v15  ;;  %v1687_v57 = vrot.slane %v4343_v19, 7 }
 0x215   :  { %v1711_v14 = vmul.f32 %v5177_v17, %v5178_v1  ;;  %v1712_v63 = vmul.f32 %v5179_v58, %v1681_v36  ;;  %v357_v47 = vsel %vm17_vm6, %v355_v11, 0.0  ;;  %v1766_v34 = vsel %vm93_vm2, %v1724_v55, %v1765_v41 }
 0x216   :  { %v1713_v42 = vmul.f32 %v5180_v46, %v1682_v51  ;;  %v1714_v39 = vmul.f32 %v5181_v5, %v1683_v31  ;;  %358 = vadd.xlane.f32.xlu0 %v357_v47  ;;  %v1768_v52 = vsel %vm96_vm3, %v1767_v45, %v1766_v34  ;;  %v1715_v9 = vmul.f32 %v5182_v61, %v1684_v13  ;;  %v5192_v61 = vld [vmem:[#allocation112_spill] sm:$0xff] }
 0x217   :  { %v1716_v19 = vmul.f32 %v5183_v35, %v1685_v6  ;;  %v1717_v40 = vmul.f32 %v5184_v0, %v1686_v29  ;;  %v4555_v37 = vsel %vm99_vm4, %v1769_v16, %v1768_v52  ;;  %v1718_v43 = vmul.f32 %v5185_v12, %v1687_v57  ;;  %v5186_v6 = vld [vmem:[#allocation77_spill] sm:$0xff]  ;;  %v5187_v57 = vld [vmem:[#allocation79_spill] sm:$0xff] }
 0x218   :  { %v1743_v32 = vrot.slane %v1711_v14, 5  ;;  %v1744_v55 = vrot.slane %v1712_v63, 4  ;;  %v1774_v23 = vsub.f32 %v4179_v56, %v4555_v37  ;;  %v1746_v62 = vrot.slane %v1713_v42, 3  ;;  %v5188_v14 = vld [vmem:[#allocation108_spill] sm:$0xff]  ;;  %v5189_v63 = vld [vmem:[#allocation109_spill] sm:$0xff]  ;;  %v5190_v42 = vld [vmem:[#allocation110_spill] sm:$0xff] }
 0x219   :  { %v1748_v20 = vrot.slane %v1714_v39, 2  ;;  %v1750_v8 = vrot.slane %v1715_v9, 1  ;;  %v1753_v53 = vrot.slane %v1717_v40, 7  ;;  %v1755_v30 = vrot.slane %v1718_v43, 6  ;;  %v5191_v39 = vld [vmem:[#allocation111_spill] sm:$0xff]  ;;  %v5193_v40 = vld [vmem:[#allocation113_spill] sm:$0xff] }
 0x21a   :  { %v1745_v48 = vsel %vm81_vm7, %v1744_v55, %v1743_v32  ;;  %v1972_v45 = vrot.slane %v4385_v4, 1  ;;  %v1776_v33 = vmul.f32 %v1774_v23, %v1774_v23  ;;  %v1973_v16 = vrot.slane %v4373_v18, 2 }
 0x21b   :  { %v1747_v54 = vsel %vm84_vm8, %v1746_v62, %v1745_v48  ;;  %v1974_v17 = vrot.slane %v4373_v18, 3  ;;  %v1975_v2 = vrot.slane %v4373_v18, 4  ;;  %v1976_v51 = vrot.slane %v4373_v18, 5 }
 0x21c   :  { %v1749_v36 = vsel %vm87_vm0, %v1748_v20, %v1747_v54  ;;  %v1977_v31 = vrot.slane %v4373_v18, 6  ;;  %v1780_v13 = vsel %vm17_vm6, %v1776_v33, 0.0  ;;  %v1978_v15 = vrot.slane %v4373_v18, 7 }
 0x21d   :  { %v1751_v11 = vsel %vm90_vm1, %v1750_v8, %v1749_v36  ;;  %v2003_v29 = vmul.f32 %v4385_v4, %v5186_v6  ;;  %1781 = vadd.xlane.f32.xlu1 %v1780_v13  ;;  %v2004_v1 = vmul.f32 %v5187_v57, %v1972_v45  ;;  %v2005_v58 = vmul.f32 %v5188_v14, %v1973_v16  ;;  %v5194_v36 = vld [vmem:[#allocation72_spill] sm:$0xff] }
 0x21e   :  { %v1752_v41 = vsel %vm93_vm2, %v1716_v19, %v1751_v11  ;;  %v2006_v47 = vmul.f32 %v5189_v63, %v1974_v17  ;;  %v2311_v34 = vrot.slane %v4448_v50, 7  ;;  %v2007_v5 = vmul.f32 %v5190_v42, %v1975_v2 }
 0x21f   :  { %v1754_v46 = vsel %vm96_vm3, %v1753_v53, %v1752_v41  ;;  %v2008_v18 = vmul.f32 %v5191_v39, %v1976_v51  ;;  %v2009_v9 = vmul.f32 %v5192_v61, %v1977_v31  ;;  %v2041_v35 = vrot.slane %v2003_v29, 6  ;;  %v5195_v51 = vld [vmem:[#allocation73_spill] sm:$0xff]  ;;  %v5197_v29 = vld [vmem:[#allocation75_spill] sm:$0xff] }
 0x220   :  { %v4583_v52 = vsel %vm99_vm4, %v1755_v30, %v1754_v46  ;;  %v2042_v19 = vrot.slane %v2004_v1, 5  ;;  %v2010_v12 = vmul.f32 %v5193_v40, %v1978_v15  ;;  %v2044_v43 = vrot.slane %v2005_v58, 4  ;;  %v5196_v15 = vld [vmem:[#allocation74_spill] sm:$0xff]  ;;  %v5198_v1 = vld [vmem:[#allocation89_spill] sm:$0xff] }
 0x221   :  { %v1773_v0 = vsub.f32 %v4185_v22, %v4583_v52  ;;  %v2046_v50 = vrot.slane %v2006_v47, 3  ;;  %v2048_v55 = vrot.slane %v2007_v5, 2  ;;  %v2050_v23 = vrot.slane %v2008_v18, 1  ;;  %v5199_v47 = vld [vmem:[#allocation76_spill] sm:$0xff]  ;;  %v5200_v18 = vld [vmem:[#allocation41_spill] sm:$0xff] }
 0x222   :  { %v2043_v32 = vsel %vm81_vm7, %v2042_v19, %v2041_v35  ;;  %v1966_v62 = vrot.slane %v4385_v4, 2  ;;  %v1967_v48 = vrot.slane %v4385_v4, 3  ;;  %v1968_v53 = vrot.slane %v4385_v4, 4 }
 0x223   :  { %v1775_v20 = vmul.f32 %v1773_v0, %v1773_v0  ;;  %v2045_v8 = vsel %vm84_vm8, %v2044_v43, %v2043_v32  ;;  %v1969_v45 = vrot.slane %v4385_v4, 5  ;;  %v1970_v33 = vrot.slane %v4385_v4, 6 }
 0x224   :  { %v2047_v30 = vsel %vm87_vm0, %v2046_v50, %v2045_v8  ;;  %v1971_v54 = vrot.slane %v4385_v4, 7  ;;  %v1997_v2 = vmul.f32 %v5194_v36, %v1966_v62  ;;  %v1998_v31 = vmul.f32 %v5195_v51, %v1967_v48  ;;  %v5201_v62 = vld [vmem:[#allocation87_spill] sm:$0xff]  ;;  %v5202_v8 = vld [vmem:[#allocation102_spill] sm:$0xff] }
 0x225   :  { %v1777_v16 = vsel %vm17_vm6, %v1775_v20, 0.0  ;;  %v2049_v17 = vsel %vm90_vm1, %v2048_v55, %v2047_v30  ;;  %v2053_v11 = vrot.slane %v2010_v12, 7  ;;  %v1999_v6 = vmul.f32 %v5196_v15, %v1968_v53  ;;  %v5203_v53 = vld [vmem:[#allocation103_spill] sm:$0xff] }
 0x226   :  { %1778 = vadd.xlane.f32.xlu0 %v1777_v16  ;;  %v2051_v13 = vsel %vm93_vm2, %v2050_v23, %v2049_v17  ;;  %v2000_v41 = vmul.f32 %v5197_v29, %v1969_v45  ;;  %v2002_v4 = vmul.f32 %v5198_v1, %v1971_v54  ;;  %v2030_v14 = vrot.slane %v1997_v2, 4  ;;  %v5204_v54 = vld [vmem:[#allocation104_spill] sm:$0xff]  ;;  %v5205_v17 = vld [vmem:[#allocation105_spill] sm:$0xff] }
 0x227   :  { %v2052_v57 = vsel %vm96_vm3, %v2009_v9, %v2051_v13  ;;  %v2032_v58 = vrot.slane %v1998_v31, 3  ;;  %v2001_v46 = vmul.f32 %v5199_v47, %v1970_v33  ;;  %v2034_v42 = vrot.slane %v1999_v6, 2  ;;  %v5206_v31 = vld [vmem:[#allocation106_spill] sm:$0xff] }
 0x228   :  { %v4608_v63 = vsel %vm99_vm4, %v2053_v11, %v2052_v57  ;;  %v2256_v5 = vrot.slane %v4471_v3, 1  ;;  %v2031_v61 = vsel %vm84_vm8, %v2030_v14, %v5200_v18  ;;  %v2036_v35 = vrot.slane %v2000_v41, 1  ;;  %v5207_v11 = vld [vmem:[#allocation107_spill] sm:$0xff] }
 0x229   :  { %v2058_v39 = vsub.f32 %v4179_v56, %v4608_v63  ;;  %v2257_v9 = vrot.slane %v4471_v3, 2  ;;  %v2033_v19 = vsel %vm87_vm0, %v2032_v58, %v2031_v61  ;;  %v2258_v0 = vrot.slane %v4471_v3, 3 }
 0x22a   :  { %v2259_v40 = vrot.slane %v4471_v3, 4  ;;  %v2260_v12 = vrot.slane %v4471_v3, 5  ;;  %v2035_v50 = vsel %vm90_vm1, %v2034_v42, %v2033_v19  ;;  %v2039_v32 = vrot.slane %v2002_v4, 7 }
 0x22b   :  { %v2060_v43 = vmul.f32 %v2058_v39, %v2058_v39  ;;  %v2261_v55 = vrot.slane %v4471_v3, 6  ;;  %v2037_v23 = vsel %vm93_vm2, %v2036_v35, %v2035_v50  ;;  %v2287_v20 = vmul.f32 %v4406_v27, %v5201_v62  ;;  %v5208_v35 = vld [vmem:[#allocation83_spill] sm:$0xff]  ;;  %v5211_v50 = vld [vmem:[#allocation86_spill] sm:$0xff] }
 0x22c   :  { %v2288_v48 = vmul.f32 %v5202_v8, %v2256_v5  ;;  %v2289_v30 = vmul.f32 %v5203_v53, %v2257_v9  ;;  %v2038_v33 = vsel %vm96_vm3, %v2001_v46, %v2037_v23  ;;  %v2290_v16 = vmul.f32 %v5204_v54, %v2258_v0  ;;  %v5209_v0 = vld [vmem:[#allocation84_spill] sm:$0xff] }
 0x22d   :  { %v2064_v45 = vsel %vm17_vm6, %v2060_v43, 0.0  ;;  %v2291_v36 = vmul.f32 %v5205_v17, %v2259_v40  ;;  %v2313_v2 = vsel %vm81_vm7, %v2312_v49, %v2311_v34  ;;  %v4636_v51 = vsel %vm99_vm4, %v2039_v32, %v2038_v33 }
 0x22e   :  { %2065 = vadd.xlane.f32.xlu1 %v2064_v45  ;;  %v2292_v13 = vmul.f32 %v5206_v31, %v2260_v12  ;;  %v2293_v15 = vmul.f32 %v5207_v11, %v2261_v55  ;;  %v2057_v6 = vsub.f32 %v4185_v22, %v4636_v51  ;;  %v2325_v29 = vrot.slane %v2287_v20, 7  ;;  %v5210_v12 = vld [vmem:[#allocation85_spill] sm:$0xff]  ;;  %v5212_v55 = vld [vmem:[#allocation62_spill] sm:$0xff]  ;;  %v5213_v20 = vld [vmem:[#allocation39_spill] sm:$0xff] }
 0x22f   :  { %v2326_v41 = vrot.slane %v2288_v48, 6  ;;  %v2328_v57 = vrot.slane %v2289_v30, 5  ;;  %v2262_v1 = vrot.slane %v4471_v3, 7  ;;  %v2330_v4 = vrot.slane %v2290_v16, 4 }
 0x230   :  { %v2332_v60 = vrot.slane %v2291_v36, 3  ;;  %v2334_v14 = vrot.slane %v2292_v13, 2  ;;  %v2059_v49 = vmul.f32 %v2057_v6, %v2057_v6  ;;  %v2250_v58 = vrot.slane %v4406_v27, 2  ;;  %v5214_v6 = vld [vmem:[#allocation18_spill] sm:$0xff] }
 0x231   :  { %v2327_v34 = vsel %vm81_vm7, %v2326_v41, %v2325_v29  ;;  %v2251_v47 = vrot.slane %v4406_v27, 3  ;;  %v2252_v42 = vrot.slane %v4406_v27, 4  ;;  %v2253_v5 = vrot.slane %v4406_v27, 5 }
 0x232   :  { %v2329_v46 = vsel %vm84_vm8, %v2328_v57, %v2327_v34  ;;  %v2254_v39 = vrot.slane %v4406_v27, 6  ;;  %v2061_v3 = vsel %vm17_vm6, %v2059_v49, 0.0  ;;  %v2336_v61 = vrot.slane %v2293_v15, 1 }
 0x233   :  { %v2331_v18 = vsel %vm87_vm0, %v2330_v4, %v2329_v46  ;;  %v2281_v9 = vmul.f32 %v5208_v35, %v2250_v58  ;;  %2062 = vadd.xlane.f32.xlu0 %v2061_v3  ;;  %v2282_v40 = vmul.f32 %v5209_v0, %v2251_v47  ;;  %v2283_v43 = vmul.f32 %v5210_v12, %v2252_v42 }
 0x234   :  { %v2333_v19 = vsel %vm90_vm1, %v2332_v60, %v2331_v18  ;;  %v2284_v32 = vmul.f32 %v5211_v50, %v2253_v5  ;;  %v2294_v23 = vmul.f32 %v5212_v55, %v2262_v1  ;;  %v2285_v8 = vmul.f32 %v5213_v20, %v2254_v39 }
 0x235   :  { %v2335_v62 = vsel %vm93_vm2, %v2334_v14, %v2333_v19  ;;  %v2314_v48 = vrot.slane %v2281_v9, 5  ;;  %v2255_v30 = vrot.slane %v4406_v27, 7  ;;  %v2316_v45 = vrot.slane %v2282_v40, 4 }
 0x236   :  { %v2337_v53 = vsel %vm96_vm3, %v2336_v61, %v2335_v62  ;;  %v2318_v16 = vrot.slane %v2283_v43, 3  ;;  %v2320_v31 = vrot.slane %v2284_v32, 2  ;;  %v2322_v11 = vrot.slane %v2285_v8, 1 }
 0x237   :  { %v4663_v33 = vsel %vm99_vm4, %v2294_v23, %v2337_v53  ;;  %v2315_v54 = vsel %vm84_vm8, %v2314_v48, %v2313_v2  ;;  %v2286_v29 = vmul.f32 %v5214_v6, %v2255_v30 }
 0x238   :  { %v2342_v17 = vsub.f32 %v4179_v56, %v4663_v33  ;;  %v2317_v36 = vsel %vm87_vm0, %v2316_v45, %v2315_v54  ;;  %vm2396_vm0 = vcmask 130112  }
 0x239   :  { %v2319_v13 = vsel %vm90_vm1, %v2318_v16, %v2317_v36  ;;  %vm2399_vm1 = vcmask 122880  }
 0x23a   :  { %v2344_v15 = vmul.f32 %v2342_v17, %v2342_v17  ;;  %v2321_v27 = vsel %vm93_vm2, %v2320_v31, %v2319_v13 }
 0x23b   :  { %v2323_v41 = vsel %vm96_vm3, %v2322_v11, %v2321_v27 }
 0x23c   :  { %v2348_v57 = vsel %vm17_vm6, %v2344_v15, 0.0  ;;  %v4675_v2 = vsel %vm99_vm4, %v2286_v29, %v2323_v41 }
 0x23d   :  { %2349 = vadd.xlane.f32.xlu1 %v2348_v57  ;;  %v2341_v1 = vsub.f32 %v4185_v22, %v4675_v2 }
 0x23f   :  { %v2343_v4 = vmul.f32 %v2341_v1, %v2341_v1 }
 0x241   :  { %v2345_v60 = vsel %vm17_vm6, %v2343_v4, 0.0 }
 0x242   :  { %2346 = vadd.xlane.f32.xlu0 %v2345_v60 }
 0x26c   :  { %v646_v49 = vpop.xlane.xlu1 %645 }
 0x26d   :  { %v648_v40 = vsub.f32 0.0, %v646_v49 }
 0x26f   :  { %v651_v62 = vmul.f32 1.442695, %v648_v40 }
 0x270   :  { %v362_v58 = vpop.xlane.xlu1 %361 }
 0x271   :  { %v364_v0 = vsub.f32 0.0, %v362_v58 }
 0x273   :  { %v367_v55 = vmul.f32 1.442695, %v364_v0 }
 0x275   :  { %v927_v14 = vpop.xlane.xlu0 %926 }
 0x276   :  { %v931_v9 = vsub.f32 0.0, %v927_v14 }
 0x278   :  { %v933_v50 = vmul.f32 1.442695, %v931_v9 }
 0x27e   :  { %v930_v46 = vpop.xlane.xlu1 %929 }
 0x27f   :  { %v932_v43 = vsub.f32 0.0, %v930_v46 }
 0x281   :  { %v1211_v34 = vpop.xlane.xlu0 %1210  ;;  %v935_v20 = vmul.f32 1.442695, %v932_v43 }
 0x282   :  { %v1215_v32 = vsub.f32 0.0, %v1211_v34 }
 0x284   :  { %v1217_v53 = vmul.f32 1.442695, %v1215_v32 }
 0x285   :  { %v1495_v47 = vpop.xlane.xlu0 %1494 }
 0x286   :  { %v1499_v30 = vsub.f32 0.0, %v1495_v47 }
 0x288   :  { %v1501_v13 = vmul.f32 1.442695, %v1499_v30 }
 0x28c   :  { %v1214_v5 = vpop.xlane.xlu1 %1213 }
 0x28d   :  { %v1216_v23 = vsub.f32 0.0, %v1214_v5 }
 0x28f   :  { %v1219_v54 = vmul.f32 1.442695, %v1216_v23 }
 0x290   :  { %v643_v42 = vpop.xlane.xlu0 %642 }
 0x291   :  { %v647_v18 = vsub.f32 0.0, %v643_v42 }
 0x293   :  { %v649_v19 = vmul.f32 1.442695, %v647_v18 }
 0x29b   :  { %v1498_v61 = vpop.xlane.xlu1 %1497 }
 0x29c   :  { %v1500_v8 = vsub.f32 0.0, %v1498_v61 }
 0x29e   :  { %v1503_v17 = vmul.f32 1.442695, %v1500_v8 }
 0x2a3   :  { %v359_v39 = vpop.xlane.xlu0 %358 }
 0x2a4   :  { %v363_v3 = vsub.f32 0.0, %v359_v39 }
 0x2a6   :  { %v365_v35 = vmul.f32 1.442695, %v363_v3 }
 0x2a8   :  { %2754 = vpow2.f32 %v365_v35 }
 0x2a9   :  { %2756 = vpow2.f32 %v649_v19 }
 0x2aa   :  { %v1782_v12 = vpop.xlane.xlu1 %1781  ;;  %2758 = vpow2.f32 %v933_v50 }
 0x2ab   :  { %2760 = vpow2.f32 %v367_v55  ;;  %v1784_v16 = vsub.f32 0.0, %v1782_v12 }
 0x2ac   :  { %2762 = vpow2.f32 %v651_v62 }
 0x2ad   :  { %2764 = vpow2.f32 %v935_v20  ;;  %v1787_v15 = vmul.f32 1.442695, %v1784_v16 }
 0x2ae   :  { %2766 = vpow2.f32 %v1217_v53 }
 0x2af   :  { %2768 = vpow2.f32 %v1219_v54 }
 0x2b0   :  { %2770 = vpow2.f32 %v1503_v17 }
 0x2b1   :  { %2772 = vpow2.f32 %v1501_v13 }
 0x2b2   :  { %v2755_v31 = vpop.eup %2754  ;;  %2774 = vpow2.f32 %v1787_v15 }
 0x2b3   :  { %v1779_v48 = vpop.xlane.xlu0 %1778  ;;  %v2757_v29 = vpop.eup %2756  ;;  %v369_v27 = vmul.f32 %v2755_v31, %v4528_v7 }
 0x2b4   :  { %v1783_v11 = vsub.f32 0.0, %v1779_v48  ;;  %v653_v4 = vmul.f32 %v2757_v29, %v4458_v44  ;;  %v2759_v60 = vpop.eup %2758 }
 0x2b5   :  { %v2761_v14 = vpop.eup %2760  ;;  %v937_v42 = vmul.f32 %v2759_v60, %v4346_v21 }
 0x2b6   :  { %v1785_v57 = vmul.f32 1.442695, %v1783_v11  ;;  %v655_v49 = vadd.f32 %v653_v4, %v369_v27  ;;  %v2763_v34 = vpop.eup %2762  ;;  %v370_v39 = vmul.f32 %v2761_v14, %v4310_v28 }
 0x2b7   :  { %v2765_v46 = vpop.eup %2764  ;;  %v654_v44 = vmul.f32 %v2763_v34, %v4307_v26 }
 0x2b8   :  { %v2767_v7 = vpop.eup %2766  ;;  %v939_v61 = vadd.f32 %v937_v42, %v655_v49  ;;  %v938_v35 = vmul.f32 %v2765_v46, %v4378_v59 }
 0x2b9   :  { %v2769_v3 = vpop.eup %2768  ;;  %v1221_v0 = vmul.f32 %v2767_v7, %v4394_v24  ;;  %v656_v21 = vadd.f32 %v654_v44, %v370_v39 }
 0x2ba   :  { %v2771_v9 = vpop.eup %2770  ;;  %v1222_v43 = vmul.f32 %v2769_v3, %v4435_v38 }
 0x2bb   :  { %v2066_v45 = vpop.xlane.xlu1 %2065  ;;  %v2773_v40 = vpop.eup %2772  ;;  %v1223_v28 = vadd.f32 %v1221_v0, %v939_v61  ;;  %v940_v55 = vadd.f32 %v938_v35, %v656_v21  ;;  %v1506_v23 = vmul.f32 %v2771_v9, %v4497_v10 }
 0x2bc   :  { %v2068_v36 = vsub.f32 0.0, %v2066_v45  ;;  %v2775_v50 = vpop.eup %2774  ;;  %v1505_v59 = vmul.f32 %v2773_v40, %v4370_v25 }
 0x2bd   :  { %v1224_v20 = vadd.f32 %v1222_v43, %v940_v55  ;;  %v1790_v8 = vmul.f32 %v2775_v50, %v4555_v37 }
 0x2be   :  { %v2071_v41 = vmul.f32 1.442695, %v2068_v36  ;;  %v1507_v24 = vadd.f32 %v1505_v59, %v1223_v28 }
 0x2bf   :  { %v1508_v48 = vadd.f32 %v1506_v23, %v1224_v20 }
 0x2c0   :  { %v2063_v6 = vpop.xlane.xlu0 %2062  ;;  %2776 = vpow2.f32 %v2071_v41 }
 0x2c1   :  { %v2067_v1 = vsub.f32 0.0, %v2063_v6  ;;  %2778 = vpow2.f32 %v1785_v57  ;;  %v1792_v45 = vadd.f32 %v1790_v8, %v1508_v48 }
 0x2c3   :  { %v2069_v58 = vmul.f32 1.442695, %v2067_v1 }
 0x2c5   :  { %2780 = vpow2.f32 %v2069_v58 }
 0x2ca   :  { %v2350_v47 = vpop.xlane.xlu1 %2349  ;;  %v2777_v26 = vpop.eup %2776 }
 0x2cb   :  { %v2352_v5 = vsub.f32 0.0, %v2350_v47  ;;  %v2779_v62 = vpop.eup %2778  ;;  %v2074_v53 = vmul.f32 %v2777_v26, %v4608_v63 }
 0x2cc   :  { %v1789_v38 = vmul.f32 %v2779_v62, %v4583_v52  ;;  %v45_v52 = vsel %vm17_vm6, %v4179_v56, -inf }
 0x2cd   :  { %v2355_v18 = vmul.f32 1.442695, %v2352_v5  ;;  %v2076_v17 = vadd.f32 %v2074_v53, %v1792_v45 }
 0x2ce   :  { %v1791_v16 = vadd.f32 %v1789_v38, %v1507_v24 }
 0x2cf   :  { %2782 = vpow2.f32 %v2355_v18  ;;  %v2347_v19 = vpop.xlane.xlu0 %2346  ;;  %v2781_v30 = vpop.eup %2780 }
 0x2d0   :  { %v2351_v12 = vsub.f32 0.0, %v2347_v19  ;;  %v2073_v25 = vmul.f32 %v2781_v30, %v4636_v51  ;;  %v2385_v51 = vlaneseq }
 0x2d2   :  { %v2353_v32 = vmul.f32 1.442695, %v2351_v12  ;;  %v2075_v31 = vadd.f32 %v2073_v25, %v1791_v16  ;;  %v2386_v6 = vand.u32 127, %v2385_v51  ;;  %v2388_v27 = vshrl.u32 %v2385_v51, 7 }
 0x2d4   :  { %2784 = vpow2.f32 %v2353_v32  ;;  %v2391_v41 = vadd.s32 4294967288, %v2386_v6  ;;  %v2389_v4 = vsub.s32 %v2386_v6, %v2388_v27 }
 0x2d6   :  { %v2394_v57 = vsub.s32 %v2391_v41, %v2388_v27 }
 0x2d9   :  { %v2783_v54 = vpop.eup %2782 }
 0x2da   :  { %v2358_v10 = vmul.f32 %v2783_v54, %v4663_v33  ;;  %v42_v33 = vsel %vm17_vm6, %v4185_v22, -inf }
 0x2dc   :  { %v2360_v36 = vadd.f32 %v2358_v10, %v2076_v17 }
 0x2de   :  { %v2785_v13 = vpop.eup %2784  ;;  %v2364_v37 = vsel %vm17_vm6, %v2360_v36, 0.0 }
 0x2df   :  { %2365 = vadd.xlane.f32.xlu1 %v2364_v37  ;;  %v2357_v11 = vmul.f32 %v2785_v13, %v4675_v2 }
 0x2e1   :  { %v2359_v63 = vadd.f32 %v2357_v11, %v2075_v31 }
 0x2e3   :  { %v2361_v15 = vsel %vm17_vm6, %v2359_v63, 0.0  ;;  %46 = vmax.xlane.f32.xlu1 %v45_v52 }
 0x2e4   :  { %2362 = vadd.xlane.f32.xlu0 %v2361_v15 }
 0x2e8   :  { %43 = vmax.xlane.f32.xlu0 %v42_v33 }
 0x36c   :  { %v2366_v29 = vpop.xlane.xlu1 %2365 }
 0x36d   :  { %2786 = vrcp.f32 %v2366_v29 }
 0x370   :  { %v47_v1 = vpop.xlane.xlu1 %46 }
 0x371   :  { %v2363_v2 = vpop.xlane.xlu0 %2362  ;;  %v2395_v60 = vrot.slane %v47_v1, %v2394_v57 }
 0x372   :  { %2788 = vrcp.f32 %v2363_v2 }
 0x375   :  { %v44_v14 = vpop.xlane.xlu0 %43 }
 0x376   :  { %v2390_v49 = vrot.slane %v44_v14, %v2389_v4 }
 0x377   :  { %v2787_v34 = vpop.eup %2786 }
 0x378   :  { %v2372_v58 = vmul.f32 %v2787_v34, %v2360_v36  ;;  %v2397_v47 = vsel %vm2396_vm0, %v2395_v60, %v2390_v49 }
 0x379   :  { %2400 = vst.msk [vmem:[#allocation2] sm:$0x1] %vm2399_vm1, %v2397_v47 }
 0x37a   :  { %v2374_v46 = vsub.f32 %v4179_v56, %v2372_v58 }
 0x37c   :  { %v2789_v42 = vpop.eup %2788  ;;  %v2376_v5 = vmul.f32 %v2374_v46, %v2374_v46 }
 0x37d   :  { %v2371_v7 = vmul.f32 %v2789_v42, %v2359_v63 }
 0x37e   :  { %v2380_v39 = vsel %vm17_vm6, %v2376_v5, 0.0 }
 0x37f   :  { %2381 = vadd.xlane.f32.xlu1 %v2380_v39  ;;  %v2373_v3 = vsub.f32 %v4185_v22, %v2371_v7 }
 0x381   :  { %v2375_v18 = vmul.f32 %v2373_v3, %v2373_v3 }
 0x383   :  { %v2377_v61 = vsel %vm17_vm6, %v2375_v18, 0.0 }
 0x384   :  { %2378 = vadd.xlane.f32.xlu0 %v2377_v61 }
 0x385   :  { %2819 = shalt.err (!%p2816_p4)
}
 0x386   :  { %s2820_s7 = scalar_lea.hbm %s4736_s2, 16 }
 0x387   :  { %p2821_p5 = scmp.ne.s32.totalorder %s4736_s2, %s2820_s7  ;;  %p2824_p6 = scmp.lt.u32.totalorder %s2820_s7, %s4736_s2 }
 0x389   :  { %p2826_p7 = pnand %p2824_p6, %p2821_p5 }
 0x38b   :  { %2829 = shalt.err (!%p2826_p7)
}
 0x38c   :  { %2423 = dma.vmem_to_hbm [thread:$0]  %s2421_s29, 16, %s4736_s2, [#allocation3]  }
 0x38d   :  { %s2857_s14 = smov [#allocation4]  }
 0x38e   :  { %s2430_s15 = sshll.u32 %s2857_s14, 4  ;;  %s2431_s15 = int_to_ptr.vmem [resolvable:$true] %s2430_s15 }
 0x38f   :  { %s2830_s16 = scalar_lea.vmem %s2431_s15, 16  ;;  %s2834_s17 = scalar_lea.vmem %s2431_s15, 32 }
 0x390   :  { %p2831_p8 = scmp.ne.s32.totalorder %s2431_s15, %s2830_s16  ;;  %p2835_p9 = scmp.lt.s32.totalorder %s2431_s15, %s2431_s15 }
 0x391   :  { %p2836_p10 = scmp.lt.s32.totalorder %s2834_s17, %s2830_s16 }
 0x393   :  { %p2837_p11 = por %p2836_p10, %p2835_p9 }
 0x395   :  { %p2838_p12 = pnand %p2837_p11, %p2831_p8 }
 0x40c   :  { %v2382_v56 = vpop.xlane.xlu1 %2381 }
 0x40d   :  { %v2410_v22 = vrot.slane %v2382_v56, %v2394_v57 }
 0x411   :  { %v2379_v44 = vpop.xlane.xlu0 %2378 }
 0x412   :  { %v2406_v35 = vrot.slane %v2379_v44, %v2389_v4 }
 0x414   :  { %v2411_v9 = vsel %vm2396_vm0, %v2410_v22, %v2406_v35 }
 0x415   :  { %2413 = vst.msk [vmem:[#allocation4] sm:$0x1] %vm2399_vm1, %v2411_v9 }
 0x416   :  { %2841 = shalt.err (!%p2838_p12)
}
 0x417   :  { %s2842_s19 = scalar_lea.hbm %s4737_s3, 16 }
 0x418   :  { %p2843_p13 = scmp.ne.s32.totalorder %s4737_s3, %s2842_s19  ;;  %p2846_p0 = scmp.lt.u32.totalorder %s2842_s19, %s4737_s3 }
 0x41a   :  { %p2848_p1 = pnand %p2846_p0, %p2843_p13 }
 0x41c   :  { %2851 = shalt.err (!%p2848_p1)
}
 0x41d   :  { %2433 = dma.vmem_to_hbm [thread:$0]  %s2431_s15, 16, %s4737_s3, [#allocation5]  }
 0x41e   :  { %2852 = dma.done.wait [#allocation3], 16  }
 0x41f   :  { %2853 = vsyncadd [#allocation3], 4294967280 }
 0x420   :  { %2854 = dma.done.wait [#allocation5], 16  }
 0x421   :  { %2855 = vsyncadd [#allocation5], 4294967280 }
 0x422   :  { %2440 = vsyncpa [#allocation3], 1 }
 0x423   :  { %2441 = vsyncpa [#allocation5], 1 }

</bundles_post_ra>
